<compile_context>
chip_gen: v6e
topology: v6e:2x2x1
jax: 0.10.0
libtpu: 0.0.40
codegen_flags: <defaults>
</compile_context>

<pallas_src>
import math
from functools import partial

import jax
import jax.numpy as jnp
from jax.experimental import pallas as pl
from jax.experimental.pallas import tpu as pltpu

_LN_EPS = 1e-5
_GELU_C = math.sqrt(2.0 / math.pi)


# ----------------------------- in-kernel helpers -----------------------------

def _gelu(x):
    # tanh-approx GELU: tanh lowers to the EUP slot instead of a VALU erf poly.
    return 0.5 * x * (1.0 + jnp.tanh(_GELU_C * (x + 0.044715 * x * x * x)))


def _layer_norm(x, w, b):
    mu = jnp.mean(x, axis=-1, keepdims=True)
    xc = x - mu
    var = jnp.mean(xc * xc, axis=-1, keepdims=True)
    return xc * jax.lax.rsqrt(var + _LN_EPS) * w + b


def _dot(a, b):
    # bf16 MXU operands, f32 accumulation (weights pre-cast to bf16).
    return jnp.dot(a.astype(jnp.bfloat16), b.astype(jnp.bfloat16),
                   preferred_element_type=jnp.float32)


# --------------------------------- kernels -----------------------------------

def afno_pre_kernel(x_ref, keep_ref, lnw_ref, lnb_ref, out_ref):
    # PAD mask folded in-kernel (keep streamed as (tn,1)); LayerNorm over D.
    x = x_ref[0] * keep_ref[0]
    out_ref[0] = _layer_norm(x, lnw_ref[...], lnb_ref[...])


def afno_freq_kernel(zr_ref, zi_ref, w1t_ref, w1b_ref, b1_ref, w2_ref, b2_ref,
                     or_ref, oi_ref, *, lam):
    # Complex block-diag 2-layer MLP, complex soft-shrink on |z| (matches spec).
    # Layer 1 split over Re/Im bf16 streams: zr@[Wr|Wi] + zi@[-Wi|Wr].
    # NOTE(v6e): the dense block-diagonal fusion does ~num_blocks x redundant
    # MXU FLOPs; keep dense unless a bundle dump shows this kernel MXU-bound.
    D = or_ref.shape[-1]
    h = jnp.dot(zr_ref[0], w1t_ref[...], preferred_element_type=jnp.float32)
    h = h + jnp.dot(zi_ref[0], w1b_ref[...], preferred_element_type=jnp.float32)
    h = _gelu(h + b1_ref[...])                              # (tf, 2H)
    o = _dot(h, w2_ref[...]) + b2_ref[...]                  # (tf, 2D) = [Re | Im]
    o_r = o[:, :D]
    o_i = o[:, D:]
    mag = jnp.sqrt(o_r * o_r + o_i * o_i)
    scale = jnp.maximum(mag - lam, 0.0) * pl.reciprocal(mag + 1e-9, approx=True)
    or_ref[0] = o_r * scale
    oi_ref[0] = o_i * scale


def afno_post_kernel(xn_ref, y_ref, keep_ref, gamma_ref, lnw_ref, lnb_ref,
                     w1_ref, b1_ref, w2_ref, b2_ref, out_ref):
    # AFNO residual (y masked in-kernel; dropout == identity) + msa FFN.
    m = xn_ref[0] + gamma_ref[...] * (y_ref[0] * keep_ref[0])
    h = _layer_norm(m, lnw_ref[...], lnb_ref[...])
    h = _gelu(_dot(h, w1_ref[...]) + b1_ref[...])
    out_ref[0] = m + _dot(h, w2_ref[...]) + b2_ref[...]


def seq_pool_kernel(msa_ref, w_ref, inv_ref, out_ref):
    # Masked mean over the sequence axis (reduction axis = last grid dim).
    s_idx = pl.program_id(2)

    @pl.when(s_idx == 0)
    def _():
        out_ref[...] = jnp.zeros_like(out_ref)

    m = msa_ref[0]                                  # (ts, tl, D)
    w = w_ref[0]                                    # (ts, 1)   1.0 = valid row
    out_ref[0] += jnp.sum(m * w[:, :, None], axis=0)

    @pl.when(s_idx == pl.num_programs(2) - 1)
    def _():
        out_ref[0] = out_ref[0] * inv_ref[0]        # * 1/seq_valid


def residue_update_kernel(pooled_ref, res_ref, seq_lnw_ref, seq_lnb_ref,
                          wog_ref, bog_ref, attn_lnw_ref, attn_lnb_ref,
                          wqkv_ref, bqkv_ref,
                          xn_out_ref, q_out_ref, kv_out_ref, *, d_model, q_scale):
    D = d_model
    # gated residue update (fused update|gate projection); dropout == identity
    n = _layer_norm(pooled_ref[0], seq_lnw_ref[...], seq_lnb_ref[...])
    og = _dot(n, wog_ref[...]) + bog_ref[...]       # (tq, 2D) = [update | gate]
    upd = og[:, :D]
    gate = jax.nn.sigmoid(og[:, D:])
    x = res_ref[0] + gate * upd
    # pre-attention LayerNorm + fused QKV projection
    xn = _layer_norm(x, attn_lnw_ref[...], attn_lnb_ref[...])
    qkv = _dot(xn, wqkv_ref[...]) + bqkv_ref[...]   # (tq, 3D)
    xn_out_ref[0] = xn
    q_out_ref[0] = (qkv[:, :D] * q_scale).astype(jnp.bfloat16)   # pre-scaled Q
    kv_out_ref[0] = qkv[:, D:].astype(jnp.bfloat16)


def residue_attn_ffn_kernel(xn_ref, q_ref, kv_ref, kpad_ref, wo_ref, bo_ref,
                            ffn_lnw_ref, ffn_lnb_ref, wf1_ref, bf1_ref,
                            wf2_ref, bf2_ref, out_ref, *, n_heads, d_model):
    # q-tiled residue self-attention (K/V = one per-batch block, fetched once)
    # + out projection + FFN.  Residual is on the NORMED x, matching the spec.
    D = d_model
    Lk = kv_ref.shape[1]
    tq = q_ref.shape[1]
    dh = D // n_heads

    q = jnp.transpose(q_ref[0].reshape(tq, n_heads, dh), (1, 0, 2))      # (H,tq,dh)
    kv = kv_ref[0]                                                        # (Lk,2D)
    k = jnp.transpose(kv[:, :D].reshape(Lk, n_heads, dh), (1, 0, 2))
    v = jnp.transpose(kv[:, D:].reshape(Lk, n_heads, dh), (1, 0, 2))

    # NOTE: these einsums contract over dh = D/n_heads; MXU runs at dh/width
    # efficiency when dh < the MXU contraction width.
    s = jnp.einsum('hqd,hkd->hqk', q, k, preferred_element_type=jnp.float32)
    s = s + kpad_ref[0] * (-1e30)        # finite mask -> no NaN even if all-PAD
    m = jnp.max(s, axis=-1, keepdims=True)
    p = jnp.exp(s - m)
    a = p * pl.reciprocal(jnp.sum(p, axis=-1, keepdims=True), approx=True)
    ctx = jnp.einsum('hqk,hkd->hqd', a.astype(jnp.bfloat16), v,
                     preferred_element_type=jnp.float32)                  # (H,tq,dh)
    attn = _dot(jnp.transpose(ctx, (1, 0, 2)).reshape(tq, D), wo_ref[...]) + bo_ref[...]

    y = xn_ref[0] + attn
    h = _layer_norm(y, ffn_lnw_ref[...], ffn_lnb_ref[...])
    h = _gelu(_dot(h, wf1_ref[...]) + bf1_ref[...])
    out_ref[0] = y + _dot(h, wf2_ref[...]) + bf2_ref[...]


# ------------------------------ spec / tiling helpers --------------------------

def _act_spec(tile, width):
    return pl.BlockSpec((1, tile, width), lambda b, j: (b, j, 0))


def _full_spec(a):
    nd = a.ndim
    return pl.BlockSpec(tuple(a.shape), lambda *_: (0,) * nd)


def _tile_and_pad(n, target):
    """Return (tile, padded_n): tile is a multiple of 8 (or == padded_n),
    padded_n is a multiple of tile.  Never degenerates to one giant block."""
    target = max(8, int(target))
    for t in range(min(target, n), 7, -1):
        if t % 8 == 0 and n % t == 0:
            return t, n
    if n <= target:
        t = ((n + 7) // 8) * 8
        return t, t
    t = (min(target, n) // 8) * 8
    return t, ((n + t - 1) // t) * t


def _divisor_or_full(n, target):
    for t in range(min(target, n), 7, -1):
        if t % 8 == 0 and n % t == 0:
            return t
    return n


def _pad_rows(x, n_to):
    n = x.shape[1]
    if n == n_to:
        return x
    return jnp.pad(x, ((0, 0), (0, n_to - n)) + ((0, 0),) * (x.ndim - 2))


def _vmem_limit_bytes():
    # generation-aware scoped VMEM: ~89 MiB on v5e/v6e (128 MiB), ~44 MiB on v7x.
    try:
        cap = pltpu.get_tpu_info().vmem_capacity_bytes
    except Exception:
        cap = 64 * 1024 * 1024
    return max(32 * 1024 * 1024, min(int(cap * 0.7), 96 * 1024 * 1024))


def _cparams(sem, vlim):
    return pltpu.CompilerParams(dimension_semantics=sem, vmem_limit_bytes=vlim)


# ------------------------------ full forward ----------------------------------

def evoformer_lite_block(wp, msa, residue, pad_mask, seq_pad_mask, *, n_heads,
                         tile_tokens=512, tile_freq=512, tile_q=128):
    B, S, L, D = msa.shape
    Lh = L // 2 + 1
    N, Nh = S * L, S * Lh
    f32, bf16 = jnp.float32, jnp.bfloat16

    tn, Np = _tile_and_pad(N, tile_tokens)
    tf_, Nhp = _tile_and_pad(Nh, tile_freq)
    tq, Lp = _tile_and_pad(L, tile_q)
    vlim = _vmem_limit_bytes()
    # TODO(synk): if production D is not a multiple of 128, pad D (lane density)
    # to avoid masked partial stores on the (.., D)-wide outputs.

    # ---- masks (keep streamed into kernels; no XLA mask pass over (B,N,D)) ----
    pad = jnp.logical_or(seq_pad_mask[:, :, None], pad_mask[:, None, :])      # [B,S,L]
    keep = _pad_rows((~pad).astype(f32).reshape(B, N)[..., None], Np)         # [B,Np,1]
    x2 = _pad_rows(msa.astype(f32).reshape(B, N, D), Np)

    # ---- AFNOMix2D: mask + LayerNorm (streamed over (batch, token-tile)) ------
    xn2 = pl.pallas_call(
        afno_pre_kernel,
        grid=(B, Np // tn),
        in_specs=[_act_spec(tn, D), _act_spec(tn, 1),
                  _full_spec(wp['mix_ln_w']), _full_spec(wp['mix_ln_b'])],
        out_specs=_act_spec(tn, D),
        out_shape=jax.ShapeDtypeStruct((B, Np, D), f32),
        compiler_params=_cparams(("parallel", "parallel"), vlim),
    )(x2, keep, wp['mix_ln_w'], wp['mix_ln_b'])

    # TODO(synk): no Pallas FFT primitive on TPU; rfft2 / irfft2 stay in XLA.
    xn4 = xn2[:, :N].reshape(B, S, L, D)
    z = jnp.fft.rfft2(xn4, axes=(1, 2), norm='ortho')                         # [B,S,Lh,D]
    zr = _pad_rows(jnp.real(z).reshape(B, Nh, D).astype(bf16), Nhp)           # bf16 stream
    zi = _pad_rows(jnp.imag(z).reshape(B, Nh, D).astype(bf16), Nhp)

    o_r, o_i = pl.pallas_call(
        partial(afno_freq_kernel, lam=0.01),
        grid=(B, Nhp // tf_),
        in_specs=[_act_spec(tf_, D), _act_spec(tf_, D),
                  _full_spec(wp['w1t']), _full_spec(wp['w1b']), _full_spec(wp['b1c']),
                  _full_spec(wp['w2c']), _full_spec(wp['b2c'])],
        out_specs=(_act_spec(tf_, D), _act_spec(tf_, D)),
        out_shape=(jax.ShapeDtypeStruct((B, Nhp, D), f32),
                   jax.ShapeDtypeStruct((B, Nhp, D), f32)),
        compiler_params=_cparams(("parallel", "parallel"), vlim),
    )(zr, zi, wp['w1t'], wp['w1b'], wp['b1c'], wp['w2c'], wp['b2c'])

    zo = jax.lax.complex(o_r[:, :Nh], o_i[:, :Nh]).reshape(B, S, Lh, D)
    y4 = jnp.fft.irfft2(zo, s=(S, L), axes=(1, 2), norm='ortho')              # [B,S,L,D]
    y2 = _pad_rows(y4.reshape(B, N, D), Np)

    # ---- AFNO residual + msa_transition FFN (streamed) ------------------------
    msa2 = pl.pallas_call(
        afno_post_kernel,
        grid=(B, Np // tn),
        in_specs=[_act_spec(tn, D), _act_spec(tn, D), _act_spec(tn, 1),
                  _full_spec(wp['gamma']),
                  _full_spec(wp['tr_ln_w']), _full_spec(wp['tr_ln_b']),
                  _full_spec(wp['tr_w1']), _full_spec(wp['tr_b1']),
                  _full_spec(wp['tr_w2']), _full_spec(wp['tr_b2'])],
        out_specs=_act_spec(tn, D),
        out_shape=jax.ShapeDtypeStruct((B, Np, D), f32),
        compiler_params=_cparams(("parallel", "parallel"), vlim),
    )(xn2, y2, keep, wp['gamma'], wp['tr_ln_w'], wp['tr_ln_b'],
      wp['tr_w1'], wp['tr_b1'], wp['tr_w2'], wp['tr_b2'])
    msa_out = msa2[:, :N].reshape(B, S, L, D)

    # ---- masked sequence-mean pool (tiled reduction over S) -------------------
    seq_w = (~seq_pad_mask).astype(f32)[..., None]                            # [B,S,1]
    inv_valid = 1.0 / jnp.sum(seq_w, axis=1, keepdims=True)                   # [B,1,1]
    ts = _divisor_or_full(S, 32)
    tl = _divisor_or_full(L, 128)
    pooled = pl.pallas_call(
        seq_pool_kernel,
        grid=(B, L // tl, S // ts),
        in_specs=[pl.BlockSpec((1, ts, tl, D), lambda b, l, s: (b, s, l, 0)),
                  pl.BlockSpec((1, ts, 1), lambda b, l, s: (b, s, 0)),
                  pl.BlockSpec((1, 1, 1), lambda b, l, s: (b, 0, 0))],
        out_specs=pl.BlockSpec((1, tl, D), lambda b, l, s: (b, l, 0)),
        out_shape=jax.ShapeDtypeStruct((B, L, D), f32),
        compiler_params=_cparams(("parallel", "parallel", "arbitrary"), vlim),
    )(msa_out, seq_w, inv_valid)

    # ---- residue track: gated update + QKV (q-tiled) --------------------------
    pooled_p = _pad_rows(pooled, Lp)
    res_p = _pad_rows(residue.astype(f32), Lp)
    dh = D // n_heads

    xn_r, q_r, kv_r = pl.pallas_call(
        partial(residue_update_kernel, d_model=D, q_scale=1.0 / math.sqrt(dh)),
        grid=(B, Lp // tq),
        in_specs=[_act_spec(tq, D), _act_spec(tq, D),
                  _full_spec(wp['seq_ln_w']), _full_spec(wp['seq_ln_b']),
                  _full_spec(wp['seq_wog']), _full_spec(wp['seq_bog']),
                  _full_spec(wp['attn_ln_w']), _full_spec(wp['attn_ln_b']),
                  _full_spec(wp['wqkv']), _full_spec(wp['bqkv'])],
        out_specs=(_act_spec(tq, D), _act_spec(tq, D), _act_spec(tq, 2 * D)),
        out_shape=(jax.ShapeDtypeStruct((B, Lp, D), f32),
                   jax.ShapeDtypeStruct((B, Lp, D), bf16),
                   jax.ShapeDtypeStruct((B, Lp, 2 * D), bf16)),
        compiler_params=_cparams(("parallel", "parallel"), vlim),
    )(pooled_p, res_p, wp['seq_ln_w'], wp['seq_ln_b'], wp['seq_wog'], wp['seq_bog'],
      wp['attn_ln_w'], wp['attn_ln_b'], wp['wqkv'], wp['bqkv'])

    # ---- residue track: attention (q-tiled, per-batch K/V block) + FFN --------
    kpad = jnp.pad(pad_mask, ((0, 0), (0, Lp - L)), constant_values=True)
    kpad = kpad.astype(f32)[:, None, :]                                       # [B,1,Lp]

    res2 = pl.pallas_call(
        partial(residue_attn_ffn_kernel, n_heads=n_heads, d_model=D),
        grid=(B, Lp // tq),
        in_specs=[_act_spec(tq, D),                                   # xn tile
                  _act_spec(tq, D),                                   # q tile (bf16)
                  pl.BlockSpec((1, Lp, 2 * D), lambda b, q: (b, 0, 0)),  # K/V (once/batch)
                  pl.BlockSpec((1, 1, Lp), lambda b, q: (b, 0, 0)),      # key pad
                  _full_spec(wp['wo']), _full_spec(wp['bo']),
                  _full_spec(wp['ffn_ln_w']), _full_spec(wp['ffn_ln_b']),
                  _full_spec(wp['ffn_w1']), _full_spec(wp['ffn_b1']),
                  _full_spec(wp['ffn_w2']), _full_spec(wp['ffn_b2'])],
        out_specs=_act_spec(tq, D),
        out_shape=jax.ShapeDtypeStruct((B, Lp, D), f32),
        compiler_params=_cparams(("parallel", "parallel"), vlim),
    )(xn_r, q_r, kv_r, kpad, wp['wo'], wp['bo'],
      wp['ffn_ln_w'], wp['ffn_ln_b'], wp['ffn_w1'], wp['ffn_b1'],
      wp['ffn_w2'], wp['ffn_b2'])

    return msa_out, res2[:, :L]


# ------------------------------ parameters ------------------------------------

def make_params(key, D, nb=8, hidden_factor=1, expansion=4):
    blk = D // nb
    ks = jax.random.split(key, 16)

    def rn(k, shape, s=0.02):
        return (s * jax.random.normal(k, shape)).astype(jnp.float32)

    def bd(w):  # [nb, i, j] -> block-diagonal [nb*i, nb*j] (== blockwise einsum)
        return jax.scipy.linalg.block_diag(*[w[i] for i in range(w.shape[0])])

    w1 = rn(ks[0], (2, nb, blk, blk * hidden_factor))
    b1 = rn(ks[1], (2, nb, blk * hidden_factor))
    w2 = rn(ks[2], (2, nb, blk * hidden_factor, blk))
    b2 = rn(ks[3], (2, nb, blk))
    params = dict(
        # AFNO mix
        mix_ln_w=jnp.ones((1, D)), mix_ln_b=jnp.zeros((1, D)),
        gamma=jnp.full((1, D), 0.1),
        w1r=bd(w1[0]), w1i=bd(w1[1]),
        b1r=b1[0].reshape(1, -1), b1i=b1[1].reshape(1, -1),
        w2r=bd(w2[0]), w2i=bd(w2[1]),
        b2r=b2[0].reshape(1, -1), b2i=b2[1].reshape(1, -1),
        # msa_transition (LN + FFN)
        tr_ln_w=jnp.ones((1, D)), tr_ln_b=jnp.zeros((1, D)),
        tr_w1=rn(ks[4], (D, expansion * D)), tr_b1=rn(ks[5], (1, expansion * D), 0.01),
        tr_w2=rn(ks[6], (expansion * D, D)), tr_b2=rn(ks[7], (1, D), 0.01),
        # sequence track (zero-init projections, gate bias = 1, as in __init__)
        seq_ln_w=jnp.ones((1, D)), seq_ln_b=jnp.zeros((1, D)),
        seq_out_w=jnp.zeros((D, D)), seq_out_b=jnp.zeros((1, D)),
        seq_gate_w=jnp.zeros((D, D)), seq_gate_b=jnp.ones((1, D)),
        # residue self-attention + FFN
        attn_ln_w=jnp.ones((1, D)), attn_ln_b=jnp.zeros((1, D)),
        wq=rn(ks[8], (D, D)), bq=jnp.zeros((1, D)),
        wk=rn(ks[9], (D, D)), bk=jnp.zeros((1, D)),
        wv=rn(ks[10], (D, D)), bv=jnp.zeros((1, D)),
        wo=rn(ks[11], (D, D)), bo=jnp.zeros((1, D)),
        ffn_ln_w=jnp.ones((1, D)), ffn_ln_b=jnp.zeros((1, D)),
        ffn_w1=rn(ks[12], (D, expansion * D)), ffn_b1=rn(ks[13], (1, expansion * D), 0.01),
        ffn_w2=rn(ks[14], (expansion * D, D)), ffn_b2=rn(ks[15], (1, D), 0.01),
    )
    return {k: v.astype(jnp.float32) for k, v in params.items()}


def prepare_params(p):
    """Fuse / bf16-cast all weights ONCE (outside jit) — no per-call weight prep."""
    bf16 = jnp.bfloat16
    w1t = jnp.concatenate([p['w1r'], p['w1i']], axis=1)           # zR side
    w1b = jnp.concatenate([-p['w1i'], p['w1r']], axis=1)          # zI side
    w2c = jnp.concatenate(
        [jnp.concatenate([p['w2r'], p['w2i']], axis=1),
         jnp.concatenate([-p['w2i'], p['w2r']], axis=1)], axis=0)
    return dict(
        mix_ln_w=p['mix_ln_w'], mix_ln_b=p['mix_ln_b'], gamma=p['gamma'],
        w1t=w1t.astype(bf16), w1b=w1b.astype(bf16),
        b1c=jnp.concatenate([p['b1r'], p['b1i']], axis=1),
        w2c=w2c.astype(bf16),
        b2c=jnp.concatenate([p['b2r'], p['b2i']], axis=1),
        tr_ln_w=p['tr_ln_w'], tr_ln_b=p['tr_ln_b'],
        tr_w1=p['tr_w1'].astype(bf16), tr_b1=p['tr_b1'],
        tr_w2=p['tr_w2'].astype(bf16), tr_b2=p['tr_b2'],
        seq_ln_w=p['seq_ln_w'], seq_ln_b=p['seq_ln_b'],
        seq_wog=jnp.concatenate([p['seq_out_w'], p['seq_gate_w']], axis=1).astype(bf16),
        seq_bog=jnp.concatenate([p['seq_out_b'], p['seq_gate_b']], axis=1),
        attn_ln_w=p['attn_ln_w'], attn_ln_b=p['attn_ln_b'],
        wqkv=jnp.concatenate([p['wq'], p['wk'], p['wv']], axis=1).astype(bf16),
        bqkv=jnp.concatenate([p['bq'], p['bk'], p['bv']], axis=1),
        wo=p['wo'].astype(bf16), bo=p['bo'],
        ffn_ln_w=p['ffn_ln_w'], ffn_ln_b=p['ffn_ln_b'],
        ffn_w1=p['ffn_w1'].astype(bf16), ffn_b1=p['ffn_b1'],
        ffn_w2=p['ffn_w2'].astype(bf16), ffn_b2=p['ffn_b2'],
    )


# ---------------------------------- main ---------------------------------------

if __name__ == "__main__":
    B, S, L, D, H = 2, 4, 8, 32, 4          # d_model=32, num_blocks=8 -> block=4

    key = jax.random.PRNGKey(0)
    k1, k2, k3 = jax.random.split(key, 3)
    msa = (0.5 * jax.random.normal(k1, (B, S, L, D))).astype(jnp.float32)
    residue = (0.5 * jax.random.normal(k2, (B, L, D))).astype(jnp.float32)
    pad_mask = jnp.zeros((B, L), jnp.bool_).at[1, L - 2:].set(True)
    seq_pad_mask = jnp.zeros((B, S), jnp.bool_).at[1, S - 1:].set(True)

    params = make_params(k3, D, nb=8)
    wp = prepare_params(params)              # fused / bf16 weights, once, outside jit

    fwd = jax.jit(evoformer_lite_block,
                  static_argnames=("n_heads", "tile_tokens", "tile_freq", "tile_q"))
    # small tile targets so the demo exercises multi-tile grids + the pad path.
    msa_out, res_out = fwd(wp, msa, residue, pad_mask, seq_pad_mask,
                           n_heads=H, tile_tokens=8, tile_freq=8, tile_q=8)
    jax.block_until_ready((msa_out, res_out))

    assert msa_out.shape == (B, S, L, D) and res_out.shape == (B, L, D)
    assert bool(jnp.all(jnp.isfinite(msa_out))) and bool(jnp.all(jnp.isfinite(res_out)))
    print("KERNEL_OK")
</pallas_src>

<mosaic_0001>
module attributes {stable_mosaic.version = 11 : i64} {
  func.func @afno_pre_kernel(%arg0: i32, %arg1: i32, %arg2: memref<1x8x32xf32, #tpu.memory_space<vmem>>, %arg3: memref<1x8x1xf32, #tpu.memory_space<vmem>>, %arg4: memref<1x32xf32, #tpu.memory_space<vmem>>, %arg5: memref<1x32xf32, #tpu.memory_space<vmem>>, %arg6: memref<1x8x32xf32, #tpu.memory_space<vmem>>) attributes {dimension_semantics = [#tpu.dimension_semantics<parallel>, #tpu.dimension_semantics<parallel>], iteration_bounds = array<i64: 2, 4>, scalar_prefetch = 0 : i64, scratch_operands = 0 : i64, tpu.core_type = #tpu.core_type<tc>, window_params = [{transform_indices = @transform_0, window_bounds = array<i64: 1, 8, 32>}, {transform_indices = @transform_1, window_bounds = array<i64: 1, 8, 1>}, {pipeline_mode = #tpu.pipeline_mode<synchronous>, transform_indices = @transform_2, window_bounds = array<i64: 1, 32>}, {pipeline_mode = #tpu.pipeline_mode<synchronous>, transform_indices = @transform_3, window_bounds = array<i64: 1, 32>}, {transform_indices = @transform_4, window_bounds = array<i64: 1, 8, 32>}]} {
    %c0 = arith.constant 0 : index
    %c0_0 = arith.constant 0 : index
    %c0_1 = arith.constant 0 : index
    %0 = vector.load %arg2[%c0, %c0_0, %c0_1] : memref<1x8x32xf32, #tpu.memory_space<vmem>>, vector<1x8x32xf32>
    %1 = vector.shape_cast %0 : vector<1x8x32xf32> to vector<8x32xf32>
    %c0_2 = arith.constant 0 : index
    %c0_3 = arith.constant 0 : index
    %c0_4 = arith.constant 0 : index
    %2 = vector.load %arg3[%c0_2, %c0_3, %c0_4] : memref<1x8x1xf32, #tpu.memory_space<vmem>>, vector<1x8x1xf32>
    %3 = vector.shape_cast %2 : vector<1x8x1xf32> to vector<8x1xf32>
    %4 = vector.broadcast %3 : vector<8x1xf32> to vector<8x32xf32>
    %5 = arith.mulf %1, %4 : vector<8x32xf32>
    %c0_5 = arith.constant 0 : index
    %c0_6 = arith.constant 0 : index
    %6 = vector.load %arg4[%c0_5, %c0_6] : memref<1x32xf32, #tpu.memory_space<vmem>>, vector<1x32xf32>
    %c0_7 = arith.constant 0 : index
    %c0_8 = arith.constant 0 : index
    %7 = vector.load %arg5[%c0_7, %c0_8] : memref<1x32xf32, #tpu.memory_space<vmem>>, vector<1x32xf32>
    %cst = arith.constant dense<0.000000e+00> : vector<8xf32>
    %8 = vector.multi_reduction <add>, %5, %cst [1] : vector<8x32xf32> to vector<8xf32>
    %9 = vector.shape_cast %8 : vector<8xf32> to vector<8x1xf32>
    %cst_9 = arith.constant 3.200000e+01 : f32
    %10 = vector.broadcast %cst_9 : f32 to vector<8x1xf32>
    %11 = arith.divf %9, %10 : vector<8x1xf32>
    %12 = vector.broadcast %11 : vector<8x1xf32> to vector<8x32xf32>
    %13 = arith.subf %5, %12 : vector<8x32xf32>
    %14 = arith.mulf %13, %13 : vector<8x32xf32>
    %cst_10 = arith.constant dense<0.000000e+00> : vector<8xf32>
    %15 = vector.multi_reduction <add>, %14, %cst_10 [1] : vector<8x32xf32> to vector<8xf32>
    %16 = vector.shape_cast %15 : vector<8xf32> to vector<8x1xf32>
    %cst_11 = arith.constant 3.200000e+01 : f32
    %17 = vector.broadcast %cst_11 : f32 to vector<8x1xf32>
    %18 = arith.divf %16, %17 : vector<8x1xf32>
    %cst_12 = arith.constant 9.99999974E-6 : f32
    %19 = vector.broadcast %cst_12 : f32 to vector<8x1xf32>
    %20 = arith.addf %18, %19 : vector<8x1xf32>
    %21 = math.rsqrt %20 : vector<8x1xf32>
    %22 = vector.broadcast %21 : vector<8x1xf32> to vector<8x32xf32>
    %23 = arith.mulf %13, %22 : vector<8x32xf32>
    %24 = vector.broadcast %6 : vector<1x32xf32> to vector<8x32xf32>
    %25 = arith.mulf %23, %24 : vector<8x32xf32>
    %26 = vector.broadcast %7 : vector<1x32xf32> to vector<8x32xf32>
    %27 = arith.addf %25, %26 : vector<8x32xf32>
    %c0_13 = arith.constant 0 : index
    %c0_14 = arith.constant 0 : index
    %c0_15 = arith.constant 0 : index
    %28 = vector.load %arg6[%c0_13, %c0_14, %c0_15] : memref<1x8x32xf32, #tpu.memory_space<vmem>>, vector<1x8x32xf32>
    %29 = vector.shape_cast %28 : vector<1x8x32xf32> to vector<8x32xf32>
    %30 = vector.shape_cast %27 : vector<8x32xf32> to vector<1x8x32xf32>
    tpu.vector_store %arg6[%c0_13, %c0_14, %c0_15], %30 {strides = array<i32>} : memref<1x8x32xf32, #tpu.memory_space<vmem>>, vector<1x8x32xf32>,
    return
  }
  func.func @transform_0(%arg0: i32, %arg1: i32) -> (i32, i32, i32) {
    %c0_i32 = arith.constant 0 : i32
    %c0_i32_0 = arith.constant 0 : i32
    return %arg0, %arg1, %c0_i32 : i32, i32, i32
  }
  func.func @transform_1(%arg0: i32, %arg1: i32) -> (i32, i32, i32) {
    %c0_i32 = arith.constant 0 : i32
    %c0_i32_0 = arith.constant 0 : i32
    return %arg0, %arg1, %c0_i32 : i32, i32, i32
  }
  func.func @transform_2(%arg0: i32, %arg1: i32) -> (i32, i32) {
    %c0_i32 = arith.constant 0 : i32
    %c0_i32_0 = arith.constant 0 : i32
    %c0_i32_1 = arith.constant 0 : i32
    return %c0_i32, %c0_i32_0 : i32, i32
  }
  func.func @transform_3(%arg0: i32, %arg1: i32) -> (i32, i32) {
    %c0_i32 = arith.constant 0 : i32
    %c0_i32_0 = arith.constant 0 : i32
    %c0_i32_1 = arith.constant 0 : i32
    return %c0_i32, %c0_i32_0 : i32, i32
  }
  func.func @transform_4(%arg0: i32, %arg1: i32) -> (i32, i32, i32) {
    %c0_i32 = arith.constant 0 : i32
    %c0_i32_0 = arith.constant 0 : i32
    return %arg0, %arg1, %c0_i32 : i32, i32, i32
  }
}

module attributes {stable_mosaic.version = 11 : i64} {
  func.func @afno_freq_kernel(%arg0: i32, %arg1: i32, %arg2: memref<1x8x32xbf16, #tpu.memory_space<vmem>>, %arg3: memref<1x8x32xbf16, #tpu.memory_space<vmem>>, %arg4: memref<32x64xbf16, #tpu.memory_space<vmem>>, %arg5: memref<32x64xbf16, #tpu.memory_space<vmem>>, %arg6: memref<1x64xf32, #tpu.memory_space<vmem>>, %arg7: memref<64x64xbf16, #tpu.memory_space<vmem>>, %arg8: memref<1x64xf32, #tpu.memory_space<vmem>>, %arg9: memref<1x8x32xf32, #tpu.memory_space<vmem>>, %arg10: memref<1x8x32xf32, #tpu.memory_space<vmem>>) attributes {dimension_semantics = [#tpu.dimension_semantics<parallel>, #tpu.dimension_semantics<parallel>], iteration_bounds = array<i64: 2, 3>, scalar_prefetch = 0 : i64, scratch_operands = 0 : i64, tpu.core_type = #tpu.core_type<tc>, window_params = [{transform_indices = @transform_0, window_bounds = array<i64: 1, 8, 32>}, {transform_indices = @transform_1, window_bounds = array<i64: 1, 8, 32>}, {pipeline_mode = #tpu.pipeline_mode<synchronous>, transform_indices = @transform_2, window_bounds = array<i64: 32, 64>}, {pipeline_mode = #tpu.pipeline_mode<synchronous>, transform_indices = @transform_3, window_bounds = array<i64: 32, 64>}, {pipeline_mode = #tpu.pipeline_mode<synchronous>, transform_indices = @transform_4, window_bounds = array<i64: 1, 64>}, {pipeline_mode = #tpu.pipeline_mode<synchronous>, transform_indices = @transform_5, window_bounds = array<i64: 64, 64>}, {pipeline_mode = #tpu.pipeline_mode<synchronous>, transform_indices = @transform_6, window_bounds = array<i64: 1, 64>}, {transform_indices = @transform_7, window_bounds = array<i64: 1, 8, 32>}, {transform_indices = @transform_8, window_bounds = array<i64: 1, 8, 32>}]} {
    %c0 = arith.constant 0 : index
    %c0_0 = arith.constant 0 : index
    %c0_1 = arith.constant 0 : index
    %0 = vector.load %arg2[%c0, %c0_0, %c0_1] : memref<1x8x32xbf16, #tpu.memory_space<vmem>>, vector<1x8x32xbf16>
    %1 = vector.shape_cast %0 : vector<1x8x32xbf16> to vector<8x32xbf16>
    %c0_2 = arith.constant 0 : index
    %c0_3 = arith.constant 0 : index
    %2 = vector.load %arg4[%c0_2, %c0_3] : memref<32x64xbf16, #tpu.memory_space<vmem>>, vector<32x64xbf16>
    %cst = arith.constant dense<0.000000e+00> : vector<8x64xf32>
    %3 = tpu.matmul %1, %2, %cst {dimension_numbers = #tpu.dot_dimension_numbers<[1], [0], [0], [1], [0, 0, 1, 1], [], []>} : vector<8x32xbf16>, vector<32x64xbf16>, vector<8x64xf32> -> vector<8x64xf32>
    %c0_4 = arith.constant 0 : index
    %c0_5 = arith.constant 0 : index
    %c0_6 = arith.constant 0 : index
    %4 = vector.load %arg3[%c0_4, %c0_5, %c0_6] : memref<1x8x32xbf16, #tpu.memory_space<vmem>>, vector<1x8x32xbf16>
    %5 = vector.shape_cast %4 : vector<1x8x32xbf16> to vector<8x32xbf16>
    %c0_7 = arith.constant 0 : index
    %c0_8 = arith.constant 0 : index
    %6 = vector.load %arg5[%c0_7, %c0_8] : memref<32x64xbf16, #tpu.memory_space<vmem>>, vector<32x64xbf16>
    %cst_9 = arith.constant dense<0.000000e+00> : vector<8x64xf32>
    %7 = tpu.matmul %5, %6, %cst_9 {dimension_numbers = #tpu.dot_dimension_numbers<[1], [0], [0], [1], [0, 0, 1, 1], [], []>} : vector<8x32xbf16>, vector<32x64xbf16>, vector<8x64xf32> -> vector<8x64xf32>
    %8 = arith.addf %3, %7 : vector<8x64xf32>
    %c0_10 = arith.constant 0 : index
    %c0_11 = arith.constant 0 : index
    %9 = vector.load %arg6[%c0_10, %c0_11] : memref<1x64xf32, #tpu.memory_space<vmem>>, vector<1x64xf32>
    %10 = vector.broadcast %9 : vector<1x64xf32> to vector<8x64xf32>
    %11 = arith.addf %8, %10 : vector<8x64xf32>
    %cst_12 = arith.constant 5.000000e-01 : f32
    %12 = vector.broadcast %cst_12 : f32 to vector<8x64xf32>
    %13 = arith.mulf %12, %11 : vector<8x64xf32>
    %cst_13 = arith.constant 4.471500e-02 : f32
    %14 = vector.broadcast %cst_13 : f32 to vector<8x64xf32>
    %15 = arith.mulf %14, %11 : vector<8x64xf32>
    %16 = arith.mulf %15, %11 : vector<8x64xf32>
    %17 = arith.mulf %16, %11 : vector<8x64xf32>
    %18 = arith.addf %11, %17 : vector<8x64xf32>
    %cst_14 = arith.constant 0.797884583 : f32
    %19 = vector.broadcast %cst_14 : f32 to vector<8x64xf32>
    %20 = arith.mulf %19, %18 : vector<8x64xf32>
    %21 = math.tanh %20 : vector<8x64xf32>
    %cst_15 = arith.constant 1.000000e+00 : f32
    %22 = vector.broadcast %cst_15 : f32 to vector<8x64xf32>
    %23 = arith.addf %22, %21 : vector<8x64xf32>
    %24 = arith.mulf %13, %23 : vector<8x64xf32>
    %c0_16 = arith.constant 0 : index
    %c0_17 = arith.constant 0 : index
    %25 = vector.load %arg7[%c0_16, %c0_17] : memref<64x64xbf16, #tpu.memory_space<vmem>>, vector<64x64xbf16>
    %26 = arith.truncf %24 : vector<8x64xf32> to vector<8x64xbf16>
    %cst_18 = arith.constant dense<0.000000e+00> : vector<8x64xf32>
    %27 = tpu.matmul %26, %25, %cst_18 {dimension_numbers = #tpu.dot_dimension_numbers<[1], [0], [0], [1], [0, 0, 1, 1], [], []>} : vector<8x64xbf16>, vector<64x64xbf16>, vector<8x64xf32> -> vector<8x64xf32>
    %c0_19 = arith.constant 0 : index
    %c0_20 = arith.constant 0 : index
    %28 = vector.load %arg8[%c0_19, %c0_20] : memref<1x64xf32, #tpu.memory_space<vmem>>, vector<1x64xf32>
    %29 = vector.broadcast %28 : vector<1x64xf32> to vector<8x64xf32>
    %30 = arith.addf %27, %29 : vector<8x64xf32>
    %31 = vector.extract_strided_slice %30 {offsets = [0, 0], sizes = [8, 32], strides = [1, 1]} : vector<8x64xf32> to vector<8x32xf32>
    %32 = vector.extract_strided_slice %30 {offsets = [0, 32], sizes = [8, 32], strides = [1, 1]} : vector<8x64xf32> to vector<8x32xf32>
    %33 = arith.mulf %31, %31 : vector<8x32xf32>
    %34 = arith.mulf %32, %32 : vector<8x32xf32>
    %35 = arith.addf %33, %34 : vector<8x32xf32>
    %36 = math.sqrt %35 : vector<8x32xf32>
    %cst_21 = arith.constant 0.00999999977 : f32
    %37 = vector.broadcast %cst_21 : f32 to vector<8x32xf32>
    %38 = arith.subf %36, %37 : vector<8x32xf32>
    %cst_22 = arith.constant 0.000000e+00 : f32
    %39 = vector.broadcast %cst_22 : f32 to vector<8x32xf32>
    %40 = arith.maximumf %38, %39 : vector<8x32xf32>
    %cst_23 = arith.constant 9.99999971E-10 : f32
    %41 = vector.broadcast %cst_23 : f32 to vector<8x32xf32>
    %42 = arith.addf %36, %41 : vector<8x32xf32>
    %43 = tpu.reciprocal %42 {approx = true} : vector<8x32xf32> -> vector<8x32xf32>
    %44 = arith.mulf %40, %43 : vector<8x32xf32>
    %45 = arith.mulf %31, %44 : vector<8x32xf32>
    %c0_24 = arith.constant 0 : index
    %c0_25 = arith.constant 0 : index
    %c0_26 = arith.constant 0 : index
    %46 = vector.load %arg9[%c0_24, %c0_25, %c0_26] : memref<1x8x32xf32, #tpu.memory_space<vmem>>, vector<1x8x32xf32>
    %47 = vector.shape_cast %46 : vector<1x8x32xf32> to vector<8x32xf32>
    %48 = vector.shape_cast %45 : vector<8x32xf32> to vector<1x8x32xf32>
    tpu.vector_store %arg9[%c0_24, %c0_25, %c0_26], %48 {strides = array<i32>} : memref<1x8x32xf32, #tpu.memory_space<vmem>>, vector<1x8x32xf32>,
    %49 = arith.mulf %32, %44 : vector<8x32xf32>
    %c0_27 = arith.constant 0 : index
    %c0_28 = arith.constant 0 : index
    %c0_29 = arith.constant 0 : index
    %50 = vector.load %arg10[%c0_27, %c0_28, %c0_29] : memref<1x8x32xf32, #tpu.memory_space<vmem>>, vector<1x8x32xf32>
    %51 = vector.shape_cast %50 : vector<1x8x32xf32> to vector<8x32xf32>
    %52 = vector.shape_cast %49 : vector<8x32xf32> to vector<1x8x32xf32>
    tpu.vector_store %arg10[%c0_27, %c0_28, %c0_29], %52 {strides = array<i32>} : memref<1x8x32xf32, #tpu.memory_space<vmem>>, vector<1x8x32xf32>,
    return
  }
  func.func @transform_0(%arg0: i32, %arg1: i32) -> (i32, i32, i32) {
    %c0_i32 = arith.constant 0 : i32
    %c0_i32_0 = arith.constant 0 : i32
    return %arg0, %arg1, %c0_i32 : i32, i32, i32
  }
  func.func @transform_1(%arg0: i32, %arg1: i32) -> (i32, i32, i32) {
    %c0_i32 = arith.constant 0 : i32
    %c0_i32_0 = arith.constant 0 : i32
    return %arg0, %arg1, %c0_i32 : i32, i32, i32
  }
  func.func @transform_2(%arg0: i32, %arg1: i32) -> (i32, i32) {
    %c0_i32 = arith.constant 0 : i32
    %c0_i32_0 = arith.constant 0 : i32
    %c0_i32_1 = arith.constant 0 : i32
    return %c0_i32, %c0_i32_0 : i32, i32
  }
  func.func @transform_3(%arg0: i32, %arg1: i32) -> (i32, i32) {
    %c0_i32 = arith.constant 0 : i32
    %c0_i32_0 = arith.constant 0 : i32
    %c0_i32_1 = arith.constant 0 : i32
    return %c0_i32, %c0_i32_0 : i32, i32
  }
  func.func @transform_4(%arg0: i32, %arg1: i32) -> (i32, i32) {
    %c0_i32 = arith.constant 0 : i32
    %c0_i32_0 = arith.constant 0 : i32
    %c0_i32_1 = arith.constant 0 : i32
    return %c0_i32, %c0_i32_0 : i32, i32
  }
  func.func @transform_5(%arg0: i32, %arg1: i32) -> (i32, i32) {
    %c0_i32 = arith.constant 0 : i32
    %c0_i32_0 = arith.constant 0 : i32
    %c0_i32_1 = arith.constant 0 : i32
    return %c0_i32, %c0_i32_0 : i32, i32
  }
  func.func @transform_6(%arg0: i32, %arg1: i32) -> (i32, i32) {
    %c0_i32 = arith.constant 0 : i32
    %c0_i32_0 = arith.constant 0 : i32
    %c0_i32_1 = arith.constant 0 : i32
    return %c0_i32, %c0_i32_0 : i32, i32
  }
  func.func @transform_7(%arg0: i32, %arg1: i32) -> (i32, i32, i32) {
    %c0_i32 = arith.constant 0 : i32
    %c0_i32_0 = arith.constant 0 : i32
    return %arg0, %arg1, %c0_i32 : i32, i32, i32
  }
  func.func @transform_8(%arg0: i32, %arg1: i32) -> (i32, i32, i32) {
    %c0_i32 = arith.constant 0 : i32
    %c0_i32_0 = arith.constant 0 : i32
    return %arg0, %arg1, %c0_i32 : i32, i32, i32
  }
}

module attributes {stable_mosaic.version = 11 : i64} {
  func.func @afno_post_kernel(%arg0: i32, %arg1: i32, %arg2: memref<1x8x32xf32, #tpu.memory_space<vmem>>, %arg3: memref<1x8x32xf32, #tpu.memory_space<vmem>>, %arg4: memref<1x8x1xf32, #tpu.memory_space<vmem>>, %arg5: memref<1x32xf32, #tpu.memory_space<vmem>>, %arg6: memref<1x32xf32, #tpu.memory_space<vmem>>, %arg7: memref<1x32xf32, #tpu.memory_space<vmem>>, %arg8: memref<32x128xbf16, #tpu.memory_space<vmem>>, %arg9: memref<1x128xf32, #tpu.memory_space<vmem>>, %arg10: memref<128x32xbf16, #tpu.memory_space<vmem>>, %arg11: memref<1x32xf32, #tpu.memory_space<vmem>>, %arg12: memref<1x8x32xf32, #tpu.memory_space<vmem>>) attributes {dimension_semantics = [#tpu.dimension_semantics<parallel>, #tpu.dimension_semantics<parallel>], iteration_bounds = array<i64: 2, 4>, scalar_prefetch = 0 : i64, scratch_operands = 0 : i64, tpu.core_type = #tpu.core_type<tc>, window_params = [{transform_indices = @transform_0, window_bounds = array<i64: 1, 8, 32>}, {transform_indices = @transform_1, window_bounds = array<i64: 1, 8, 32>}, {transform_indices = @transform_2, window_bounds = array<i64: 1, 8, 1>}, {pipeline_mode = #tpu.pipeline_mode<synchronous>, transform_indices = @transform_3, window_bounds = array<i64: 1, 32>}, {pipeline_mode = #tpu.pipeline_mode<synchronous>, transform_indices = @transform_4, window_bounds = array<i64: 1, 32>}, {pipeline_mode = #tpu.pipeline_mode<synchronous>, transform_indices = @transform_5, window_bounds = array<i64: 1, 32>}, {pipeline_mode = #tpu.pipeline_mode<synchronous>, transform_indices = @transform_6, window_bounds = array<i64: 32, 128>}, {pipeline_mode = #tpu.pipeline_mode<synchronous>, transform_indices = @transform_7, window_bounds = array<i64: 1, 128>}, {pipeline_mode = #tpu.pipeline_mode<synchronous>, transform_indices = @transform_8, window_bounds = array<i64: 128, 32>}, {pipeline_mode = #tpu.pipeline_mode<synchronous>, transform_indices = @transform_9, window_bounds = array<i64: 1, 32>}, {transform_indices = @transform_10, window_bounds = array<i64: 1, 8, 32>}]} {
    %c0 = arith.constant 0 : index
    %c0_0 = arith.constant 0 : index
    %c0_1 = arith.constant 0 : index
    %0 = vector.load %arg2[%c0, %c0_0, %c0_1] : memref<1x8x32xf32, #tpu.memory_space<vmem>>, vector<1x8x32xf32>
    %1 = vector.shape_cast %0 : vector<1x8x32xf32> to vector<8x32xf32>
    %c0_2 = arith.constant 0 : index
    %c0_3 = arith.constant 0 : index
    %2 = vector.load %arg5[%c0_2, %c0_3] : memref<1x32xf32, #tpu.memory_space<vmem>>, vector<1x32xf32>
    %c0_4 = arith.constant 0 : index
    %c0_5 = arith.constant 0 : index
    %c0_6 = arith.constant 0 : index
    %3 = vector.load %arg3[%c0_4, %c0_5, %c0_6] : memref<1x8x32xf32, #tpu.memory_space<vmem>>, vector<1x8x32xf32>
    %4 = vector.shape_cast %3 : vector<1x8x32xf32> to vector<8x32xf32>
    %c0_7 = arith.constant 0 : index
    %c0_8 = arith.constant 0 : index
    %c0_9 = arith.constant 0 : index
    %5 = vector.load %arg4[%c0_7, %c0_8, %c0_9] : memref<1x8x1xf32, #tpu.memory_space<vmem>>, vector<1x8x1xf32>
    %6 = vector.shape_cast %5 : vector<1x8x1xf32> to vector<8x1xf32>
    %7 = vector.broadcast %6 : vector<8x1xf32> to vector<8x32xf32>
    %8 = arith.mulf %4, %7 : vector<8x32xf32>
    %9 = vector.broadcast %2 : vector<1x32xf32> to vector<8x32xf32>
    %10 = arith.mulf %9, %8 : vector<8x32xf32>
    %11 = arith.addf %1, %10 : vector<8x32xf32>
    %c0_10 = arith.constant 0 : index
    %c0_11 = arith.constant 0 : index
    %12 = vector.load %arg6[%c0_10, %c0_11] : memref<1x32xf32, #tpu.memory_space<vmem>>, vector<1x32xf32>
    %c0_12 = arith.constant 0 : index
    %c0_13 = arith.constant 0 : index
    %13 = vector.load %arg7[%c0_12, %c0_13] : memref<1x32xf32, #tpu.memory_space<vmem>>, vector<1x32xf32>
    %cst = arith.constant dense<0.000000e+00> : vector<8xf32>
    %14 = vector.multi_reduction <add>, %11, %cst [1] : vector<8x32xf32> to vector<8xf32>
    %15 = vector.shape_cast %14 : vector<8xf32> to vector<8x1xf32>
    %cst_14 = arith.constant 3.200000e+01 : f32
    %16 = vector.broadcast %cst_14 : f32 to vector<8x1xf32>
    %17 = arith.divf %15, %16 : vector<8x1xf32>
    %18 = vector.broadcast %17 : vector<8x1xf32> to vector<8x32xf32>
    %19 = arith.subf %11, %18 : vector<8x32xf32>
    %20 = arith.mulf %19, %19 : vector<8x32xf32>
    %cst_15 = arith.constant dense<0.000000e+00> : vector<8xf32>
    %21 = vector.multi_reduction <add>, %20, %cst_15 [1] : vector<8x32xf32> to vector<8xf32>
    %22 = vector.shape_cast %21 : vector<8xf32> to vector<8x1xf32>
    %cst_16 = arith.constant 3.200000e+01 : f32
    %23 = vector.broadcast %cst_16 : f32 to vector<8x1xf32>
    %24 = arith.divf %22, %23 : vector<8x1xf32>
    %cst_17 = arith.constant 9.99999974E-6 : f32
    %25 = vector.broadcast %cst_17 : f32 to vector<8x1xf32>
    %26 = arith.addf %24, %25 : vector<8x1xf32>
    %27 = math.rsqrt %26 : vector<8x1xf32>
    %28 = vector.broadcast %27 : vector<8x1xf32> to vector<8x32xf32>
    %29 = arith.mulf %19, %28 : vector<8x32xf32>
    %30 = vector.broadcast %12 : vector<1x32xf32> to vector<8x32xf32>
    %31 = arith.mulf %29, %30 : vector<8x32xf32>
    %32 = vector.broadcast %13 : vector<1x32xf32> to vector<8x32xf32>
    %33 = arith.addf %31, %32 : vector<8x32xf32>
    %c0_18 = arith.constant 0 : index
    %c0_19 = arith.constant 0 : index
    %34 = vector.load %arg8[%c0_18, %c0_19] : memref<32x128xbf16, #tpu.memory_space<vmem>>, vector<32x128xbf16>
    %35 = arith.truncf %33 : vector<8x32xf32> to vector<8x32xbf16>
    %cst_20 = arith.constant dense<0.000000e+00> : vector<8x128xf32>
    %36 = tpu.matmul %35, %34, %cst_20 {dimension_numbers = #tpu.dot_dimension_numbers<[1], [0], [0], [1], [0, 0, 1, 1], [], []>} : vector<8x32xbf16>, vector<32x128xbf16>, vector<8x128xf32> -> vector<8x128xf32>
    %c0_21 = arith.constant 0 : index
    %c0_22 = arith.constant 0 : index
    %37 = vector.load %arg9[%c0_21, %c0_22] : memref<1x128xf32, #tpu.memory_space<vmem>>, vector<1x128xf32>
    %38 = vector.broadcast %37 : vector<1x128xf32> to vector<8x128xf32>
    %39 = arith.addf %36, %38 : vector<8x128xf32>
    %cst_23 = arith.constant 5.000000e-01 : f32
    %40 = vector.broadcast %cst_23 : f32 to vector<8x128xf32>
    %41 = arith.mulf %40, %39 : vector<8x128xf32>
    %cst_24 = arith.constant 4.471500e-02 : f32
    %42 = vector.broadcast %cst_24 : f32 to vector<8x128xf32>
    %43 = arith.mulf %42, %39 : vector<8x128xf32>
    %44 = arith.mulf %43, %39 : vector<8x128xf32>
    %45 = arith.mulf %44, %39 : vector<8x128xf32>
    %46 = arith.addf %39, %45 : vector<8x128xf32>
    %cst_25 = arith.constant 0.797884583 : f32
    %47 = vector.broadcast %cst_25 : f32 to vector<8x128xf32>
    %48 = arith.mulf %47, %46 : vector<8x128xf32>
    %49 = math.tanh %48 : vector<8x128xf32>
    %cst_26 = arith.constant 1.000000e+00 : f32
    %50 = vector.broadcast %cst_26 : f32 to vector<8x128xf32>
    %51 = arith.addf %50, %49 : vector<8x128xf32>
    %52 = arith.mulf %41, %51 : vector<8x128xf32>
    %c0_27 = arith.constant 0 : index
    %c0_28 = arith.constant 0 : index
    %53 = vector.load %arg10[%c0_27, %c0_28] : memref<128x32xbf16, #tpu.memory_space<vmem>>, vector<128x32xbf16>
    %54 = arith.truncf %52 : vector<8x128xf32> to vector<8x128xbf16>
    %cst_29 = arith.constant dense<0.000000e+00> : vector<8x32xf32>
    %55 = tpu.matmul %54, %53, %cst_29 {dimension_numbers = #tpu.dot_dimension_numbers<[1], [0], [0], [1], [0, 0, 1, 1], [], []>} : vector<8x128xbf16>, vector<128x32xbf16>, vector<8x32xf32> -> vector<8x32xf32>
    %56 = arith.addf %11, %55 : vector<8x32xf32>
    %c0_30 = arith.constant 0 : index
    %c0_31 = arith.constant 0 : index
    %57 = vector.load %arg11[%c0_30, %c0_31] : memref<1x32xf32, #tpu.memory_space<vmem>>, vector<1x32xf32>
    %58 = vector.broadcast %57 : vector<1x32xf32> to vector<8x32xf32>
    %59 = arith.addf %56, %58 : vector<8x32xf32>
    %c0_32 = arith.constant 0 : index
    %c0_33 = arith.constant 0 : index
    %c0_34 = arith.constant 0 : index
    %60 = vector.load %arg12[%c0_32, %c0_33, %c0_34] : memref<1x8x32xf32, #tpu.memory_space<vmem>>, vector<1x8x32xf32>
    %61 = vector.shape_cast %60 : vector<1x8x32xf32> to vector<8x32xf32>
    %62 = vector.shape_cast %59 : vector<8x32xf32> to vector<1x8x32xf32>
    tpu.vector_store %arg12[%c0_32, %c0_33, %c0_34], %62 {strides = array<i32>} : memref<1x8x32xf32, #tpu.memory_space<vmem>>, vector<1x8x32xf32>,
    return
  }
  func.func @transform_0(%arg0: i32, %arg1: i32) -> (i32, i32, i32) {
    %c0_i32 = arith.constant 0 : i32
    %c0_i32_0 = arith.constant 0 : i32
    return %arg0, %arg1, %c0_i32 : i32, i32, i32
  }
  func.func @transform_1(%arg0: i32, %arg1: i32) -> (i32, i32, i32) {
    %c0_i32 = arith.constant 0 : i32
    %c0_i32_0 = arith.constant 0 : i32
    return %arg0, %arg1, %c0_i32 : i32, i32, i32
  }
  func.func @transform_2(%arg0: i32, %arg1: i32) -> (i32, i32, i32) {
    %c0_i32 = arith.constant 0 : i32
    %c0_i32_0 = arith.constant 0 : i32
    return %arg0, %arg1, %c0_i32 : i32, i32, i32
  }
  func.func @transform_3(%arg0: i32, %arg1: i32) -> (i32, i32) {
    %c0_i32 = arith.constant 0 : i32
    %c0_i32_0 = arith.constant 0 : i32
    %c0_i32_1 = arith.constant 0 : i32
    return %c0_i32, %c0_i32_0 : i32, i32
  }
  func.func @transform_4(%arg0: i32, %arg1: i32) -> (i32, i32) {
    %c0_i32 = arith.constant 0 : i32
    %c0_i32_0 = arith.constant 0 : i32
    %c0_i32_1 = arith.constant 0 : i32
    return %c0_i32, %c0_i32_0 : i32, i32
  }
  func.func @transform_5(%arg0: i32, %arg1: i32) -> (i32, i32) {
    %c0_i32 = arith.constant 0 : i32
    %c0_i32_0 = arith.constant 0 : i32
    %c0_i32_1 = arith.constant 0 : i32
    return %c0_i32, %c0_i32_0 : i32, i32
  }
  func.func @transform_6(%arg0: i32, %arg1: i32) -> (i32, i32) {
    %c0_i32 = arith.constant 0 : i32
    %c0_i32_0 = arith.constant 0 : i32
    %c0_i32_1 = arith.constant 0 : i32
    return %c0_i32, %c0_i32_0 : i32, i32
  }
  func.func @transform_7(%arg0: i32, %arg1: i32) -> (i32, i32) {
    %c0_i32 = arith.constant 0 : i32
    %c0_i32_0 = arith.constant 0 : i32
    %c0_i32_1 = arith.constant 0 : i32
    return %c0_i32, %c0_i32_0 : i32, i32
  }
  func.func @transform_8(%arg0: i32, %arg1: i32) -> (i32, i32) {
    %c0_i32 = arith.constant 0 : i32
    %c0_i32_0 = arith.constant 0 : i32
    %c0_i32_1 = arith.constant 0 : i32
    return %c0_i32, %c0_i32_0 : i32, i32
  }
  func.func @transform_9(%arg0: i32, %arg1: i32) -> (i32, i32) {
    %c0_i32 = arith.constant 0 : i32
    %c0_i32_0 = arith.constant 0 : i32
    %c0_i32_1 = arith.constant 0 : i32
    return %c0_i32, %c0_i32_0 : i32, i32
  }
  func.func @transform_10(%arg0: i32, %arg1: i32) -> (i32, i32, i32) {
    %c0_i32 = arith.constant 0 : i32
    %c0_i32_0 = arith.constant 0 : i32
    return %arg0, %arg1, %c0_i32 : i32, i32, i32
  }
}

module attributes {stable_mosaic.version = 11 : i64} {
  func.func @seq_pool_kernel(%arg0: i32, %arg1: i32, %arg2: i32, %arg3: memref<1x4x8x32xf32, #tpu.memory_space<vmem>>, %arg4: memref<1x4x1xf32, #tpu.memory_space<vmem>>, %arg5: memref<1x1x1xf32, #tpu.memory_space<vmem>>, %arg6: memref<1x8x32xf32, #tpu.memory_space<vmem>>) attributes {dimension_semantics = [#tpu.dimension_semantics<parallel>, #tpu.dimension_semantics<parallel>, #tpu.dimension_semantics<arbitrary>], iteration_bounds = array<i64: 2, 1, 1>, scalar_prefetch = 0 : i64, scratch_operands = 0 : i64, tpu.core_type = #tpu.core_type<tc>, window_params = [{transform_indices = @transform_0, window_bounds = array<i64: 1, 4, 8, 32>}, {transform_indices = @transform_1, window_bounds = array<i64: 1, 4, 1>}, {transform_indices = @transform_2, window_bounds = array<i64: 1, 1, 1>}, {transform_indices = @transform_3, window_bounds = array<i64: 1, 8, 32>}]} {
    %c0_i32 = arith.constant 0 : i32
    %0 = arith.cmpi eq, %arg2, %c0_i32 : i32
    %1 = arith.extui %0 : i1 to i32
    %c0_i32_0 = arith.constant 0 : i32
    %2 = arith.cmpi ne, %1, %c0_i32_0 : i32
    scf.if %2 {
      %cst_15 = arith.constant 0.000000e+00 : f32
      %20 = vector.broadcast %cst_15 : f32 to vector<1x8x32xf32>
      %c0_16 = arith.constant 0 : index
      %c0_17 = arith.constant 0 : index
      %c0_18 = arith.constant 0 : index
      %21 = vector.load %arg6[%c0_16, %c0_17, %c0_18] : memref<1x8x32xf32, #tpu.memory_space<vmem>>, vector<1x8x32xf32>
      tpu.vector_store %arg6[%c0_16, %c0_17, %c0_18], %20 {strides = array<i32>} : memref<1x8x32xf32, #tpu.memory_space<vmem>>, vector<1x8x32xf32>,
    } else {
    }
    %c0 = arith.constant 0 : index
    %c0_1 = arith.constant 0 : index
    %c0_2 = arith.constant 0 : index
    %c0_3 = arith.constant 0 : index
    %3 = vector.load %arg3[%c0, %c0_1, %c0_2, %c0_3] : memref<1x4x8x32xf32, #tpu.memory_space<vmem>>, vector<1x4x8x32xf32>
    %4 = vector.shape_cast %3 : vector<1x4x8x32xf32> to vector<4x8x32xf32>
    %c0_4 = arith.constant 0 : index
    %c0_5 = arith.constant 0 : index
    %c0_6 = arith.constant 0 : index
    %5 = vector.load %arg4[%c0_4, %c0_5, %c0_6] : memref<1x4x1xf32, #tpu.memory_space<vmem>>, vector<1x4x1xf32>
    %6 = vector.shape_cast %5 : vector<1x4x1xf32> to vector<4x1xf32>
    %c0_7 = arith.constant 0 : index
    %c0_8 = arith.constant 0 : index
    %c0_9 = arith.constant 0 : index
    %7 = vector.load %arg6[%c0_7, %c0_8, %c0_9] : memref<1x8x32xf32, #tpu.memory_space<vmem>>, vector<1x8x32xf32>
    %8 = vector.shape_cast %7 : vector<1x8x32xf32> to vector<8x32xf32>
    %9 = vector.shape_cast %6 : vector<4x1xf32> to vector<4x1x1xf32>
    %10 = vector.broadcast %9 : vector<4x1x1xf32> to vector<4x8x32xf32>
    %11 = arith.mulf %4, %10 : vector<4x8x32xf32>
    %cst = arith.constant dense<0.000000e+00> : vector<8x32xf32>
    %12 = vector.multi_reduction <add>, %11, %cst [0] : vector<4x8x32xf32> to vector<8x32xf32>
    %13 = arith.addf %8, %12 : vector<8x32xf32>
    %c0_10 = arith.constant 0 : index
    %c0_11 = arith.constant 0 : index
    %c0_12 = arith.constant 0 : index
    %14 = vector.load %arg6[%c0_10, %c0_11, %c0_12] : memref<1x8x32xf32, #tpu.memory_space<vmem>>, vector<1x8x32xf32>
    %15 = vector.shape_cast %14 : vector<1x8x32xf32> to vector<8x32xf32>
    %16 = vector.shape_cast %13 : vector<8x32xf32> to vector<1x8x32xf32>
    tpu.vector_store %arg6[%c0_10, %c0_11, %c0_12], %16 {strides = array<i32>} : memref<1x8x32xf32, #tpu.memory_space<vmem>>, vector<1x8x32xf32>,
    %c0_i32_13 = arith.constant 0 : i32
    %17 = arith.cmpi eq, %arg2, %c0_i32_13 : i32
    %18 = arith.extui %17 : i1 to i32
    %c0_i32_14 = arith.constant 0 : i32
    %19 = arith.cmpi ne, %18, %c0_i32_14 : i32
    scf.if %19 {
      %c0_15 = arith.constant 0 : index
      %c0_16 = arith.constant 0 : index
      %c0_17 = arith.constant 0 : index
      %20 = vector.load %arg6[%c0_15, %c0_16, %c0_17] : memref<1x8x32xf32, #tpu.memory_space<vmem>>, vector<1x8x32xf32>
      %21 = vector.shape_cast %20 : vector<1x8x32xf32> to vector<8x32xf32>
      %c0_18 = arith.constant 0 : index
      %c0_19 = arith.constant 0 : index
      %c0_20 = arith.constant 0 : index
      %22 = vector.load %arg5[%c0_18, %c0_19, %c0_20] : memref<1x1x1xf32, #tpu.memory_space<vmem>>, vector<1x1x1xf32>
      %23 = vector.shape_cast %22 : vector<1x1x1xf32> to vector<1x1xf32>
      %24 = vector.broadcast %23 : vector<1x1xf32> to vector<8x32xf32>
      %25 = arith.mulf %21, %24 : vector<8x32xf32>
      %c0_21 = arith.constant 0 : index
      %c0_22 = arith.constant 0 : index
      %c0_23 = arith.constant 0 : index
      %26 = vector.load %arg6[%c0_21, %c0_22, %c0_23] : memref<1x8x32xf32, #tpu.memory_space<vmem>>, vector<1x8x32xf32>
      %27 = vector.shape_cast %26 : vector<1x8x32xf32> to vector<8x32xf32>
      %28 = vector.shape_cast %25 : vector<8x32xf32> to vector<1x8x32xf32>
      tpu.vector_store %arg6[%c0_21, %c0_22, %c0_23], %28 {strides = array<i32>} : memref<1x8x32xf32, #tpu.memory_space<vmem>>, vector<1x8x32xf32>,
    } else {
    }
    return
  }
  func.func @transform_0(%arg0: i32, %arg1: i32, %arg2: i32) -> (i32, i32, i32, i32) {
    %c0_i32 = arith.constant 0 : i32
    %c0_i32_0 = arith.constant 0 : i32
    return %arg0, %arg2, %arg1, %c0_i32 : i32, i32, i32, i32
  }
  func.func @transform_1(%arg0: i32, %arg1: i32, %arg2: i32) -> (i32, i32, i32) {
    %c0_i32 = arith.constant 0 : i32
    %c0_i32_0 = arith.constant 0 : i32
    return %arg0, %arg2, %c0_i32 : i32, i32, i32
  }
  func.func @transform_2(%arg0: i32, %arg1: i32, %arg2: i32) -> (i32, i32, i32) {
    %c0_i32 = arith.constant 0 : i32
    %c0_i32_0 = arith.constant 0 : i32
    %c0_i32_1 = arith.constant 0 : i32
    return %arg0, %c0_i32, %c0_i32_0 : i32, i32, i32
  }
  func.func @transform_3(%arg0: i32, %arg1: i32, %arg2: i32) -> (i32, i32, i32) {
    %c0_i32 = arith.constant 0 : i32
    %c0_i32_0 = arith.constant 0 : i32
    return %arg0, %arg1, %c0_i32 : i32, i32, i32
  }
}

module attributes {stable_mosaic.version = 11 : i64} {
  func.func @residue_attn_ffn_kernel(%arg0: i32, %arg1: i32, %arg2: memref<1x8x32xf32, #tpu.memory_space<vmem>>, %arg3: memref<1x8x32xbf16, #tpu.memory_space<vmem>>, %arg4: memref<1x8x64xbf16, #tpu.memory_space<vmem>>, %arg5: memref<1x1x8xf32, #tpu.memory_space<vmem>>, %arg6: memref<32x32xbf16, #tpu.memory_space<vmem>>, %arg7: memref<1x32xf32, #tpu.memory_space<vmem>>, %arg8: memref<1x32xf32, #tpu.memory_space<vmem>>, %arg9: memref<1x32xf32, #tpu.memory_space<vmem>>, %arg10: memref<32x128xbf16, #tpu.memory_space<vmem>>, %arg11: memref<1x128xf32, #tpu.memory_space<vmem>>, %arg12: memref<128x32xbf16, #tpu.memory_space<vmem>>, %arg13: memref<1x32xf32, #tpu.memory_space<vmem>>, %arg14: memref<1x8x32xf32, #tpu.memory_space<vmem>>) attributes {dimension_semantics = [#tpu.dimension_semantics<parallel>, #tpu.dimension_semantics<parallel>], iteration_bounds = array<i64: 2, 1>, scalar_prefetch = 0 : i64, scratch_operands = 0 : i64, tpu.core_type = #tpu.core_type<tc>, window_params = [{transform_indices = @transform_0, window_bounds = array<i64: 1, 8, 32>}, {transform_indices = @transform_1, window_bounds = array<i64: 1, 8, 32>}, {transform_indices = @transform_2, window_bounds = array<i64: 1, 8, 64>}, {transform_indices = @transform_3, window_bounds = array<i64: 1, 1, 8>}, {pipeline_mode = #tpu.pipeline_mode<synchronous>, transform_indices = @transform_4, window_bounds = array<i64: 32, 32>}, {pipeline_mode = #tpu.pipeline_mode<synchronous>, transform_indices = @transform_5, window_bounds = array<i64: 1, 32>}, {pipeline_mode = #tpu.pipeline_mode<synchronous>, transform_indices = @transform_6, window_bounds = array<i64: 1, 32>}, {pipeline_mode = #tpu.pipeline_mode<synchronous>, transform_indices = @transform_7, window_bounds = array<i64: 1, 32>}, {pipeline_mode = #tpu.pipeline_mode<synchronous>, transform_indices = @transform_8, window_bounds = array<i64: 32, 128>}, {pipeline_mode = #tpu.pipeline_mode<synchronous>, transform_indices = @transform_9, window_bounds = array<i64: 1, 128>}, {pipeline_mode = #tpu.pipeline_mode<synchronous>, transform_indices = @transform_10, window_bounds = array<i64: 128, 32>}, {pipeline_mode = #tpu.pipeline_mode<synchronous>, transform_indices = @transform_11, window_bounds = array<i64: 1, 32>}, {transform_indices = @transform_12, window_bounds = array<i64: 1, 8, 32>}]} {
    %c0 = arith.constant 0 : index
    %c0_0 = arith.constant 0 : index
    %c0_1 = arith.constant 0 : index
    %0 = vector.load %arg3[%c0, %c0_0, %c0_1] : memref<1x8x32xbf16, #tpu.memory_space<vmem>>, vector<1x8x32xbf16>
    %1 = vector.shape_cast %0 : vector<1x8x32xbf16> to vector<8x32xbf16>
    %2 = vector.shape_cast %1 : vector<8x32xbf16> to vector<8x4x8xbf16>
    %3 = tpu.transpose %2, [1, 0, 2] : vector<8x4x8xbf16> -> vector<4x8x8xbf16>
    %c0_2 = arith.constant 0 : index
    %c0_3 = arith.constant 0 : index
    %c0_4 = arith.constant 0 : index
    %4 = vector.load %arg4[%c0_2, %c0_3, %c0_4] : memref<1x8x64xbf16, #tpu.memory_space<vmem>>, vector<1x8x64xbf16>
    %5 = vector.shape_cast %4 : vector<1x8x64xbf16> to vector<8x64xbf16>
    %6 = vector.extract_strided_slice %5 {offsets = [0, 0], sizes = [8, 32], strides = [1, 1]} : vector<8x64xbf16> to vector<8x32xbf16>
    %7 = vector.shape_cast %6 : vector<8x32xbf16> to vector<8x4x8xbf16>
    %8 = tpu.transpose %7, [1, 0, 2] : vector<8x4x8xbf16> -> vector<4x8x8xbf16>
    %9 = vector.extract_strided_slice %5 {offsets = [0, 32], sizes = [8, 32], strides = [1, 1]} : vector<8x64xbf16> to vector<8x32xbf16>
    %10 = vector.shape_cast %9 : vector<8x32xbf16> to vector<8x4x8xbf16>
    %11 = tpu.transpose %10, [1, 0, 2] : vector<8x4x8xbf16> -> vector<4x8x8xbf16>
    "tpu.trace_start"() <{level = 10 : i32, message = "hqd,hkd->hqk"}> : () -> ()
    %cst = arith.constant dense<0.000000e+00> : vector<4x8x8xf32>
    %12 = tpu.matmul %3, %8, %cst {dimension_numbers = #tpu.dot_dimension_numbers<[2], [2], [1], [1], [0, 0, 0, 1, 1, 1], [0], [0]>} : vector<4x8x8xbf16>, vector<4x8x8xbf16>, vector<4x8x8xf32> -> vector<4x8x8xf32>
    "tpu.trace_stop"() : () -> ()
    %c0_5 = arith.constant 0 : index
    %c0_6 = arith.constant 0 : index
    %c0_7 = arith.constant 0 : index
    %13 = vector.load %arg5[%c0_5, %c0_6, %c0_7] : memref<1x1x8xf32, #tpu.memory_space<vmem>>, vector<1x1x8xf32>
    %14 = vector.shape_cast %13 : vector<1x1x8xf32> to vector<1x8xf32>
    %cst_8 = arith.constant -1.000000e+30 : f32
    %15 = vector.broadcast %cst_8 : f32 to vector<1x8xf32>
    %16 = arith.mulf %14, %15 : vector<1x8xf32>
    %17 = vector.shape_cast %16 : vector<1x8xf32> to vector<1x1x8xf32>
    %18 = vector.broadcast %17 : vector<1x1x8xf32> to vector<4x8x8xf32>
    %19 = arith.addf %12, %18 : vector<4x8x8xf32>
    %cst_9 = arith.constant dense<0xFF800000> : vector<4x8xf32>
    %20 = vector.multi_reduction <maximumf>, %19, %cst_9 [2] : vector<4x8x8xf32> to vector<4x8xf32>
    %21 = vector.shape_cast %20 : vector<4x8xf32> to vector<4x8x1xf32>
    %22 = vector.broadcast %21 : vector<4x8x1xf32> to vector<4x8x8xf32>
    %23 = arith.subf %19, %22 : vector<4x8x8xf32>
    %24 = math.exp %23 : vector<4x8x8xf32>
    %cst_10 = arith.constant dense<0.000000e+00> : vector<4x8xf32>
    %25 = vector.multi_reduction <add>, %24, %cst_10 [2] : vector<4x8x8xf32> to vector<4x8xf32>
    %26 = vector.shape_cast %25 : vector<4x8xf32> to vector<4x8x1xf32>
    %27 = tpu.reciprocal %26 {approx = true} : vector<4x8x1xf32> -> vector<4x8x1xf32>
    %28 = vector.broadcast %27 : vector<4x8x1xf32> to vector<4x8x8xf32>
    %29 = arith.mulf %24, %28 : vector<4x8x8xf32>
    %30 = arith.truncf %29 : vector<4x8x8xf32> to vector<4x8x8xbf16>
    "tpu.trace_start"() <{level = 10 : i32, message = "hqk,hkd->hqd"}> : () -> ()
    %cst_11 = arith.constant dense<0.000000e+00> : vector<4x8x8xf32>
    %31 = tpu.matmul %30, %11, %cst_11 {dimension_numbers = #tpu.dot_dimension_numbers<[2], [1], [1], [2], [0, 0, 0, 1, 1, 2], [0], [0]>} : vector<4x8x8xbf16>, vector<4x8x8xbf16>, vector<4x8x8xf32> -> vector<4x8x8xf32>
    "tpu.trace_stop"() : () -> ()
    %32 = tpu.transpose %31, [1, 0, 2] : vector<4x8x8xf32> -> vector<8x4x8xf32>
    %33 = vector.shape_cast %32 : vector<8x4x8xf32> to vector<8x32xf32>
    %c0_12 = arith.constant 0 : index
    %c0_13 = arith.constant 0 : index
    %34 = vector.load %arg6[%c0_12, %c0_13] : memref<32x32xbf16, #tpu.memory_space<vmem>>, vector<32x32xbf16>
    %35 = arith.truncf %33 : vector<8x32xf32> to vector<8x32xbf16>
    %cst_14 = arith.constant dense<0.000000e+00> : vector<8x32xf32>
    %36 = tpu.matmul %35, %34, %cst_14 {dimension_numbers = #tpu.dot_dimension_numbers<[1], [0], [0], [1], [0, 0, 1, 1], [], []>} : vector<8x32xbf16>, vector<32x32xbf16>, vector<8x32xf32> -> vector<8x32xf32>
    %c0_15 = arith.constant 0 : index
    %c0_16 = arith.constant 0 : index
    %37 = vector.load %arg7[%c0_15, %c0_16] : memref<1x32xf32, #tpu.memory_space<vmem>>, vector<1x32xf32>
    %38 = vector.broadcast %37 : vector<1x32xf32> to vector<8x32xf32>
    %39 = arith.addf %36, %38 : vector<8x32xf32>
    %c0_17 = arith.constant 0 : index
    %c0_18 = arith.constant 0 : index
    %c0_19 = arith.constant 0 : index
    %40 = vector.load %arg2[%c0_17, %c0_18, %c0_19] : memref<1x8x32xf32, #tpu.memory_space<vmem>>, vector<1x8x32xf32>
    %41 = vector.shape_cast %40 : vector<1x8x32xf32> to vector<8x32xf32>
    %42 = arith.addf %41, %39 : vector<8x32xf32>
    %c0_20 = arith.constant 0 : index
    %c0_21 = arith.constant 0 : index
    %43 = vector.load %arg8[%c0_20, %c0_21] : memref<1x32xf32, #tpu.memory_space<vmem>>, vector<1x32xf32>
    %c0_22 = arith.constant 0 : index
    %c0_23 = arith.constant 0 : index
    %44 = vector.load %arg9[%c0_22, %c0_23] : memref<1x32xf32, #tpu.memory_space<vmem>>, vector<1x32xf32>
    %cst_24 = arith.constant dense<0.000000e+00> : vector<8xf32>
    %45 = vector.multi_reduction <add>, %42, %cst_24 [1] : vector<8x32xf32> to vector<8xf32>
    %46 = vector.shape_cast %45 : vector<8xf32> to vector<8x1xf32>
    %cst_25 = arith.constant 3.200000e+01 : f32
    %47 = vector.broadcast %cst_25 : f32 to vector<8x1xf32>
    %48 = arith.divf %46, %47 : vector<8x1xf32>
    %49 = vector.broadcast %48 : vector<8x1xf32> to vector<8x32xf32>
    %50 = arith.subf %42, %49 : vector<8x32xf32>
    %51 = arith.mulf %50, %50 : vector<8x32xf32>
    %cst_26 = arith.constant dense<0.000000e+00> : vector<8xf32>
    %52 = vector.multi_reduction <add>, %51, %cst_26 [1] : vector<8x32xf32> to vector<8xf32>
    %53 = vector.shape_cast %52 : vector<8xf32> to vector<8x1xf32>
    %cst_27 = arith.constant 3.200000e+01 : f32
    %54 = vector.broadcast %cst_27 : f32 to vector<8x1xf32>
    %55 = arith.divf %53, %54 : vector<8x1xf32>
    %cst_28 = arith.constant 9.99999974E-6 : f32
    %56 = vector.broadcast %cst_28 : f32 to vector<8x1xf32>
    %57 = arith.addf %55, %56 : vector<8x1xf32>
    %58 = math.rsqrt %57 : vector<8x1xf32>
    %59 = vector.broadcast %58 : vector<8x1xf32> to vector<8x32xf32>
    %60 = arith.mulf %50, %59 : vector<8x32xf32>
    %61 = vector.broadcast %43 : vector<1x32xf32> to vector<8x32xf32>
    %62 = arith.mulf %60, %61 : vector<8x32xf32>
    %63 = vector.broadcast %44 : vector<1x32xf32> to vector<8x32xf32>
    %64 = arith.addf %62, %63 : vector<8x32xf32>
    %c0_29 = arith.constant 0 : index
    %c0_30 = arith.constant 0 : index
    %65 = vector.load %arg10[%c0_29, %c0_30] : memref<32x128xbf16, #tpu.memory_space<vmem>>, vector<32x128xbf16>
    %66 = arith.truncf %64 : vector<8x32xf32> to vector<8x32xbf16>
    %cst_31 = arith.constant dense<0.000000e+00> : vector<8x128xf32>
    %67 = tpu.matmul %66, %65, %cst_31 {dimension_numbers = #tpu.dot_dimension_numbers<[1], [0], [0], [1], [0, 0, 1, 1], [], []>} : vector<8x32xbf16>, vector<32x128xbf16>, vector<8x128xf32> -> vector<8x128xf32>
    %c0_32 = arith.constant 0 : index
    %c0_33 = arith.constant 0 : index
    %68 = vector.load %arg11[%c0_32, %c0_33] : memref<1x128xf32, #tpu.memory_space<vmem>>, vector<1x128xf32>
    %69 = vector.broadcast %68 : vector<1x128xf32> to vector<8x128xf32>
    %70 = arith.addf %67, %69 : vector<8x128xf32>
    %cst_34 = arith.constant 5.000000e-01 : f32
    %71 = vector.broadcast %cst_34 : f32 to vector<8x128xf32>
    %72 = arith.mulf %71, %70 : vector<8x128xf32>
    %cst_35 = arith.constant 4.471500e-02 : f32
    %73 = vector.broadcast %cst_35 : f32 to vector<8x128xf32>
    %74 = arith.mulf %73, %70 : vector<8x128xf32>
    %75 = arith.mulf %74, %70 : vector<8x128xf32>
    %76 = arith.mulf %75, %70 : vector<8x128xf32>
    %77 = arith.addf %70, %76 : vector<8x128xf32>
    %cst_36 = arith.constant 0.797884583 : f32
    %78 = vector.broadcast %cst_36 : f32 to vector<8x128xf32>
    %79 = arith.mulf %78, %77 : vector<8x128xf32>
    %80 = math.tanh %79 : vector<8x128xf32>
    %cst_37 = arith.constant 1.000000e+00 : f32
    %81 = vector.broadcast %cst_37 : f32 to vector<8x128xf32>
    %82 = arith.addf %81, %80 : vector<8x128xf32>
    %83 = arith.mulf %72, %82 : vector<8x128xf32>
    %c0_38 = arith.constant 0 : index
    %c0_39 = arith.constant 0 : index
    %84 = vector.load %arg12[%c0_38, %c0_39] : memref<128x32xbf16, #tpu.memory_space<vmem>>, vector<128x32xbf16>
    %85 = arith.truncf %83 : vector<8x128xf32> to vector<8x128xbf16>
    %cst_40 = arith.constant dense<0.000000e+00> : vector<8x32xf32>
    %86 = tpu.matmul %85, %84, %cst_40 {dimension_numbers = #tpu.dot_dimension_numbers<[1], [0], [0], [1], [0, 0, 1, 1], [], []>} : vector<8x128xbf16>, vector<128x32xbf16>, vector<8x32xf32> -> vector<8x32xf32>
    %87 = arith.addf %42, %86 : vector<8x32xf32>
    %c0_41 = arith.constant 0 : index
    %c0_42 = arith.constant 0 : index
    %88 = vector.load %arg13[%c0_41, %c0_42] : memref<1x32xf32, #tpu.memory_space<vmem>>, vector<1x32xf32>
    %89 = vector.broadcast %88 : vector<1x32xf32> to vector<8x32xf32>
    %90 = arith.addf %87, %89 : vector<8x32xf32>
    %c0_43 = arith.constant 0 : index
    %c0_44 = arith.constant 0 : index
    %c0_45 = arith.constant 0 : index
    %91 = vector.load %arg14[%c0_43, %c0_44, %c0_45] : memref<1x8x32xf32, #tpu.memory_space<vmem>>, vector<1x8x32xf32>
    %92 = vector.shape_cast %91 : vector<1x8x32xf32> to vector<8x32xf32>
    %93 = vector.shape_cast %90 : vector<8x32xf32> to vector<1x8x32xf32>
    tpu.vector_store %arg14[%c0_43, %c0_44, %c0_45], %93 {strides = array<i32>} : memref<1x8x32xf32, #tpu.memory_space<vmem>>, vector<1x8x32xf32>,
    return
  }
  func.func @transform_0(%arg0: i32, %arg1: i32) -> (i32, i32, i32) {
    %c0_i32 = arith.constant 0 : i32
    %c0_i32_0 = arith.constant 0 : i32
    return %arg0, %arg1, %c0_i32 : i32, i32, i32
  }
  func.func @transform_1(%arg0: i32, %arg1: i32) -> (i32, i32, i32) {
    %c0_i32 = arith.constant 0 : i32
    %c0_i32_0 = arith.constant 0 : i32
    return %arg0, %arg1, %c0_i32 : i32, i32, i32
  }
  func.func @transform_2(%arg0: i32, %arg1: i32) -> (i32, i32, i32) {
    %c0_i32 = arith.constant 0 : i32
    %c0_i32_0 = arith.constant 0 : i32
    %c0_i32_1 = arith.constant 0 : i32
    return %arg0, %c0_i32, %c0_i32_0 : i32, i32, i32
  }
  func.func @transform_3(%arg0: i32, %arg1: i32) -> (i32, i32, i32) {
    %c0_i32 = arith.constant 0 : i32
    %c0_i32_0 = arith.constant 0 : i32
    %c0_i32_1 = arith.constant 0 : i32
    return %arg0, %c0_i32, %c0_i32_0 : i32, i32, i32
  }
  func.func @transform_4(%arg0: i32, %arg1: i32) -> (i32, i32) {
    %c0_i32 = arith.constant 0 : i32
    %c0_i32_0 = arith.constant 0 : i32
    %c0_i32_1 = arith.constant 0 : i32
    return %c0_i32, %c0_i32_0 : i32, i32
  }
  func.func @transform_5(%arg0: i32, %arg1: i32) -> (i32, i32) {
    %c0_i32 = arith.constant 0 : i32
    %c0_i32_0 = arith.constant 0 : i32
    %c0_i32_1 = arith.constant 0 : i32
    return %c0_i32, %c0_i32_0 : i32, i32
  }
  func.func @transform_6(%arg0: i32, %arg1: i32) -> (i32, i32) {
    %c0_i32 = arith.constant 0 : i32
    %c0_i32_0 = arith.constant 0 : i32
    %c0_i32_1 = arith.constant 0 : i32
    return %c0_i32, %c0_i32_0 : i32, i32
  }
  func.func @transform_7(%arg0: i32, %arg1: i32) -> (i32, i32) {
    %c0_i32 = arith.constant 0 : i32
    %c0_i32_0 = arith.constant 0 : i32
    %c0_i32_1 = arith.constant 0 : i32
    return %c0_i32, %c0_i32_0 : i32, i32
  }
  func.func @transform_8(%arg0: i32, %arg1: i32) -> (i32, i32) {
    %c0_i32 = arith.constant 0 : i32
    %c0_i32_0 = arith.constant 0 : i32
    %c0_i32_1 = arith.constant 0 : i32
    return %c0_i32, %c0_i32_0 : i32, i32
  }
  func.func @transform_9(%arg0: i32, %arg1: i32) -> (i32, i32) {
    %c0_i32 = arith.constant 0 : i32
    %c0_i32_0 = arith.constant 0 : i32
    %c0_i32_1 = arith.constant 0 : i32
    return %c0_i32, %c0_i32_0 : i32, i32
  }
  func.func @transform_10(%arg0: i32, %arg1: i32) -> (i32, i32) {
    %c0_i32 = arith.constant 0 : i32
    %c0_i32_0 = arith.constant 0 : i32
    %c0_i32_1 = arith.constant 0 : i32
    return %c0_i32, %c0_i32_0 : i32, i32
  }
  func.func @transform_11(%arg0: i32, %arg1: i32) -> (i32, i32) {
    %c0_i32 = arith.constant 0 : i32
    %c0_i32_0 = arith.constant 0 : i32
    %c0_i32_1 = arith.constant 0 : i32
    return %c0_i32, %c0_i32_0 : i32, i32
  }
  func.func @transform_12(%arg0: i32, %arg1: i32) -> (i32, i32, i32) {
    %c0_i32 = arith.constant 0 : i32
    %c0_i32_0 = arith.constant 0 : i32
    return %arg0, %arg1, %c0_i32 : i32, i32, i32
  }
}

module attributes {stable_mosaic.version = 11 : i64} {
  func.func @residue_update_kernel(%arg0: i32, %arg1: i32, %arg2: memref<1x8x32xf32, #tpu.memory_space<vmem>>, %arg3: memref<1x8x32xf32, #tpu.memory_space<vmem>>, %arg4: memref<1x32xf32, #tpu.memory_space<vmem>>, %arg5: memref<1x32xf32, #tpu.memory_space<vmem>>, %arg6: memref<32x64xbf16, #tpu.memory_space<vmem>>, %arg7: memref<1x64xf32, #tpu.memory_space<vmem>>, %arg8: memref<1x32xf32, #tpu.memory_space<vmem>>, %arg9: memref<1x32xf32, #tpu.memory_space<vmem>>, %arg10: memref<32x96xbf16, #tpu.memory_space<vmem>>, %arg11: memref<1x96xf32, #tpu.memory_space<vmem>>, %arg12: memref<1x8x32xf32, #tpu.memory_space<vmem>>, %arg13: memref<1x8x32xbf16, #tpu.memory_space<vmem>>, %arg14: memref<1x8x64xbf16, #tpu.memory_space<vmem>>) attributes {dimension_semantics = [#tpu.dimension_semantics<parallel>, #tpu.dimension_semantics<parallel>], iteration_bounds = array<i64: 2, 1>, scalar_prefetch = 0 : i64, scratch_operands = 0 : i64, tpu.core_type = #tpu.core_type<tc>, window_params = [{transform_indices = @transform_0, window_bounds = array<i64: 1, 8, 32>}, {transform_indices = @transform_1, window_bounds = array<i64: 1, 8, 32>}, {pipeline_mode = #tpu.pipeline_mode<synchronous>, transform_indices = @transform_2, window_bounds = array<i64: 1, 32>}, {pipeline_mode = #tpu.pipeline_mode<synchronous>, transform_indices = @transform_3, window_bounds = array<i64: 1, 32>}, {pipeline_mode = #tpu.pipeline_mode<synchronous>, transform_indices = @transform_4, window_bounds = array<i64: 32, 64>}, {pipeline_mode = #tpu.pipeline_mode<synchronous>, transform_indices = @transform_5, window_bounds = array<i64: 1, 64>}, {pipeline_mode = #tpu.pipeline_mode<synchronous>, transform_indices = @transform_6, window_bounds = array<i64: 1, 32>}, {pipeline_mode = #tpu.pipeline_mode<synchronous>, transform_indices = @transform_7, window_bounds = array<i64: 1, 32>}, {pipeline_mode = #tpu.pipeline_mode<synchronous>, transform_indices = @transform_8, window_bounds = array<i64: 32, 96>}, {pipeline_mode = #tpu.pipeline_mode<synchronous>, transform_indices = @transform_9, window_bounds = array<i64: 1, 96>}, {transform_indices = @transform_10, window_bounds = array<i64: 1, 8, 32>}, {transform_indices = @transform_11, window_bounds = array<i64: 1, 8, 32>}, {transform_indices = @transform_12, window_bounds = array<i64: 1, 8, 64>}]} {
    %c0 = arith.constant 0 : index
    %c0_0 = arith.constant 0 : index
    %c0_1 = arith.constant 0 : index
    %0 = vector.load %arg2[%c0, %c0_0, %c0_1] : memref<1x8x32xf32, #tpu.memory_space<vmem>>, vector<1x8x32xf32>
    %1 = vector.shape_cast %0 : vector<1x8x32xf32> to vector<8x32xf32>
    %c0_2 = arith.constant 0 : index
    %c0_3 = arith.constant 0 : index
    %2 = vector.load %arg4[%c0_2, %c0_3] : memref<1x32xf32, #tpu.memory_space<vmem>>, vector<1x32xf32>
    %c0_4 = arith.constant 0 : index
    %c0_5 = arith.constant 0 : index
    %3 = vector.load %arg5[%c0_4, %c0_5] : memref<1x32xf32, #tpu.memory_space<vmem>>, vector<1x32xf32>
    %cst = arith.constant dense<0.000000e+00> : vector<8xf32>
    %4 = vector.multi_reduction <add>, %1, %cst [1] : vector<8x32xf32> to vector<8xf32>
    %5 = vector.shape_cast %4 : vector<8xf32> to vector<8x1xf32>
    %cst_6 = arith.constant 3.200000e+01 : f32
    %6 = vector.broadcast %cst_6 : f32 to vector<8x1xf32>
    %7 = arith.divf %5, %6 : vector<8x1xf32>
    %8 = vector.broadcast %7 : vector<8x1xf32> to vector<8x32xf32>
    %9 = arith.subf %1, %8 : vector<8x32xf32>
    %10 = arith.mulf %9, %9 : vector<8x32xf32>
    %cst_7 = arith.constant dense<0.000000e+00> : vector<8xf32>
    %11 = vector.multi_reduction <add>, %10, %cst_7 [1] : vector<8x32xf32> to vector<8xf32>
    %12 = vector.shape_cast %11 : vector<8xf32> to vector<8x1xf32>
    %cst_8 = arith.constant 3.200000e+01 : f32
    %13 = vector.broadcast %cst_8 : f32 to vector<8x1xf32>
    %14 = arith.divf %12, %13 : vector<8x1xf32>
    %cst_9 = arith.constant 9.99999974E-6 : f32
    %15 = vector.broadcast %cst_9 : f32 to vector<8x1xf32>
    %16 = arith.addf %14, %15 : vector<8x1xf32>
    %17 = math.rsqrt %16 : vector<8x1xf32>
    %18 = vector.broadcast %17 : vector<8x1xf32> to vector<8x32xf32>
    %19 = arith.mulf %9, %18 : vector<8x32xf32>
    %20 = vector.broadcast %2 : vector<1x32xf32> to vector<8x32xf32>
    %21 = arith.mulf %19, %20 : vector<8x32xf32>
    %22 = vector.broadcast %3 : vector<1x32xf32> to vector<8x32xf32>
    %23 = arith.addf %21, %22 : vector<8x32xf32>
    %c0_10 = arith.constant 0 : index
    %c0_11 = arith.constant 0 : index
    %24 = vector.load %arg6[%c0_10, %c0_11] : memref<32x64xbf16, #tpu.memory_space<vmem>>, vector<32x64xbf16>
    %25 = arith.truncf %23 : vector<8x32xf32> to vector<8x32xbf16>
    %cst_12 = arith.constant dense<0.000000e+00> : vector<8x64xf32>
    %26 = tpu.matmul %25, %24, %cst_12 {dimension_numbers = #tpu.dot_dimension_numbers<[1], [0], [0], [1], [0, 0, 1, 1], [], []>} : vector<8x32xbf16>, vector<32x64xbf16>, vector<8x64xf32> -> vector<8x64xf32>
    %c0_13 = arith.constant 0 : index
    %c0_14 = arith.constant 0 : index
    %27 = vector.load %arg7[%c0_13, %c0_14] : memref<1x64xf32, #tpu.memory_space<vmem>>, vector<1x64xf32>
    %28 = vector.broadcast %27 : vector<1x64xf32> to vector<8x64xf32>
    %29 = arith.addf %26, %28 : vector<8x64xf32>
    %30 = vector.extract_strided_slice %29 {offsets = [0, 0], sizes = [8, 32], strides = [1, 1]} : vector<8x64xf32> to vector<8x32xf32>
    %31 = vector.extract_strided_slice %29 {offsets = [0, 32], sizes = [8, 32], strides = [1, 1]} : vector<8x64xf32> to vector<8x32xf32>
    %32 = arith.negf %31 : vector<8x32xf32>
    %33 = math.exp %32 : vector<8x32xf32>
    %cst_15 = arith.constant 1.000000e+00 : f32
    %34 = vector.broadcast %cst_15 : f32 to vector<8x32xf32>
    %35 = arith.addf %34, %33 : vector<8x32xf32>
    %36 = arith.divf %34, %35 : vector<8x32xf32>
    %c0_16 = arith.constant 0 : index
    %c0_17 = arith.constant 0 : index
    %c0_18 = arith.constant 0 : index
    %37 = vector.load %arg3[%c0_16, %c0_17, %c0_18] : memref<1x8x32xf32, #tpu.memory_space<vmem>>, vector<1x8x32xf32>
    %38 = vector.shape_cast %37 : vector<1x8x32xf32> to vector<8x32xf32>
    %39 = arith.mulf %36, %30 : vector<8x32xf32>
    %40 = arith.addf %38, %39 : vector<8x32xf32>
    %c0_19 = arith.constant 0 : index
    %c0_20 = arith.constant 0 : index
    %41 = vector.load %arg8[%c0_19, %c0_20] : memref<1x32xf32, #tpu.memory_space<vmem>>, vector<1x32xf32>
    %c0_21 = arith.constant 0 : index
    %c0_22 = arith.constant 0 : index
    %42 = vector.load %arg9[%c0_21, %c0_22] : memref<1x32xf32, #tpu.memory_space<vmem>>, vector<1x32xf32>
    %cst_23 = arith.constant dense<0.000000e+00> : vector<8xf32>
    %43 = vector.multi_reduction <add>, %40, %cst_23 [1] : vector<8x32xf32> to vector<8xf32>
    %44 = vector.shape_cast %43 : vector<8xf32> to vector<8x1xf32>
    %cst_24 = arith.constant 3.200000e+01 : f32
    %45 = vector.broadcast %cst_24 : f32 to vector<8x1xf32>
    %46 = arith.divf %44, %45 : vector<8x1xf32>
    %47 = vector.broadcast %46 : vector<8x1xf32> to vector<8x32xf32>
    %48 = arith.subf %40, %47 : vector<8x32xf32>
    %49 = arith.mulf %48, %48 : vector<8x32xf32>
    %cst_25 = arith.constant dense<0.000000e+00> : vector<8xf32>
    %50 = vector.multi_reduction <add>, %49, %cst_25 [1] : vector<8x32xf32> to vector<8xf32>
    %51 = vector.shape_cast %50 : vector<8xf32> to vector<8x1xf32>
    %cst_26 = arith.constant 3.200000e+01 : f32
    %52 = vector.broadcast %cst_26 : f32 to vector<8x1xf32>
    %53 = arith.divf %51, %52 : vector<8x1xf32>
    %cst_27 = arith.constant 9.99999974E-6 : f32
    %54 = vector.broadcast %cst_27 : f32 to vector<8x1xf32>
    %55 = arith.addf %53, %54 : vector<8x1xf32>
    %56 = math.rsqrt %55 : vector<8x1xf32>
    %57 = vector.broadcast %56 : vector<8x1xf32> to vector<8x32xf32>
    %58 = arith.mulf %48, %57 : vector<8x32xf32>
    %59 = vector.broadcast %41 : vector<1x32xf32> to vector<8x32xf32>
    %60 = arith.mulf %58, %59 : vector<8x32xf32>
    %61 = vector.broadcast %42 : vector<1x32xf32> to vector<8x32xf32>
    %62 = arith.addf %60, %61 : vector<8x32xf32>
    %c0_28 = arith.constant 0 : index
    %c0_29 = arith.constant 0 : index
    %63 = vector.load %arg10[%c0_28, %c0_29] : memref<32x96xbf16, #tpu.memory_space<vmem>>, vector<32x96xbf16>
    %64 = arith.truncf %62 : vector<8x32xf32> to vector<8x32xbf16>
    %cst_30 = arith.constant dense<0.000000e+00> : vector<8x96xf32>
    %65 = tpu.matmul %64, %63, %cst_30 {dimension_numbers = #tpu.dot_dimension_numbers<[1], [0], [0], [1], [0, 0, 1, 1], [], []>} : vector<8x32xbf16>, vector<32x96xbf16>, vector<8x96xf32> -> vector<8x96xf32>
    %c0_31 = arith.constant 0 : index
    %c0_32 = arith.constant 0 : index
    %66 = vector.load %arg11[%c0_31, %c0_32] : memref<1x96xf32, #tpu.memory_space<vmem>>, vector<1x96xf32>
    %67 = vector.broadcast %66 : vector<1x96xf32> to vector<8x96xf32>
    %68 = arith.addf %65, %67 : vector<8x96xf32>
    %c0_33 = arith.constant 0 : index
    %c0_34 = arith.constant 0 : index
    %c0_35 = arith.constant 0 : index
    %69 = vector.load %arg12[%c0_33, %c0_34, %c0_35] : memref<1x8x32xf32, #tpu.memory_space<vmem>>, vector<1x8x32xf32>
    %70 = vector.shape_cast %69 : vector<1x8x32xf32> to vector<8x32xf32>
    %71 = vector.shape_cast %62 : vector<8x32xf32> to vector<1x8x32xf32>
    tpu.vector_store %arg12[%c0_33, %c0_34, %c0_35], %71 {strides = array<i32>} : memref<1x8x32xf32, #tpu.memory_space<vmem>>, vector<1x8x32xf32>,
    %72 = vector.extract_strided_slice %68 {offsets = [0, 0], sizes = [8, 32], strides = [1, 1]} : vector<8x96xf32> to vector<8x32xf32>
    %cst_36 = arith.constant 0.353553385 : f32
    %73 = vector.broadcast %cst_36 : f32 to vector<8x32xf32>
    %74 = arith.mulf %72, %73 : vector<8x32xf32>
    %75 = arith.truncf %74 : vector<8x32xf32> to vector<8x32xbf16>
    %c0_37 = arith.constant 0 : index
    %c0_38 = arith.constant 0 : index
    %c0_39 = arith.constant 0 : index
    %76 = vector.load %arg13[%c0_37, %c0_38, %c0_39] : memref<1x8x32xbf16, #tpu.memory_space<vmem>>, vector<1x8x32xbf16>
    %77 = vector.shape_cast %76 : vector<1x8x32xbf16> to vector<8x32xbf16>
    %78 = vector.shape_cast %75 : vector<8x32xbf16> to vector<1x8x32xbf16>
    tpu.vector_store %arg13[%c0_37, %c0_38, %c0_39], %78 {strides = array<i32>} : memref<1x8x32xbf16, #tpu.memory_space<vmem>>, vector<1x8x32xbf16>,
    %79 = vector.extract_strided_slice %68 {offsets = [0, 32], sizes = [8, 64], strides = [1, 1]} : vector<8x96xf32> to vector<8x64xf32>
    %80 = arith.truncf %79 : vector<8x64xf32> to vector<8x64xbf16>
    %c0_40 = arith.constant 0 : index
    %c0_41 = arith.constant 0 : index
    %c0_42 = arith.constant 0 : index
    %81 = vector.load %arg14[%c0_40, %c0_41, %c0_42] : memref<1x8x64xbf16, #tpu.memory_space<vmem>>, vector<1x8x64xbf16>
    %82 = vector.shape_cast %81 : vector<1x8x64xbf16> to vector<8x64xbf16>
    %83 = vector.shape_cast %80 : vector<8x64xbf16> to vector<1x8x64xbf16>
    tpu.vector_store %arg14[%c0_40, %c0_41, %c0_42], %83 {strides = array<i32>} : memref<1x8x64xbf16, #tpu.memory_space<vmem>>, vector<1x8x64xbf16>,
    return
  }
  func.func @transform_0(%arg0: i32, %arg1: i32) -> (i32, i32, i32) {
    %c0_i32 = arith.constant 0 : i32
    %c0_i32_0 = arith.constant 0 : i32
    return %arg0, %arg1, %c0_i32 : i32, i32, i32
  }
  func.func @transform_1(%arg0: i32, %arg1: i32) -> (i32, i32, i32) {
    %c0_i32 = arith.constant 0 : i32
    %c0_i32_0 = arith.constant 0 : i32
    return %arg0, %arg1, %c0_i32 : i32, i32, i32
  }
  func.func @transform_2(%arg0: i32, %arg1: i32) -> (i32, i32) {
    %c0_i32 = arith.constant 0 : i32
    %c0_i32_0 = arith.constant 0 : i32
    %c0_i32_1 = arith.constant 0 : i32
    return %c0_i32, %c0_i32_0 : i32, i32
  }
  func.func @transform_3(%arg0: i32, %arg1: i32) -> (i32, i32) {
    %c0_i32 = arith.constant 0 : i32
    %c0_i32_0 = arith.constant 0 : i32
    %c0_i32_1 = arith.constant 0 : i32
    return %c0_i32, %c0_i32_0 : i32, i32
  }
  func.func @transform_4(%arg0: i32, %arg1: i32) -> (i32, i32) {
    %c0_i32 = arith.constant 0 : i32
    %c0_i32_0 = arith.constant 0 : i32
    %c0_i32_1 = arith.constant 0 : i32
    return %c0_i32, %c0_i32_0 : i32, i32
  }
  func.func @transform_5(%arg0: i32, %arg1: i32) -> (i32, i32) {
    %c0_i32 = arith.constant 0 : i32
    %c0_i32_0 = arith.constant 0 : i32
    %c0_i32_1 = arith.constant 0 : i32
    return %c0_i32, %c0_i32_0 : i32, i32
  }
  func.func @transform_6(%arg0: i32, %arg1: i32) -> (i32, i32) {
    %c0_i32 = arith.constant 0 : i32
    %c0_i32_0 = arith.constant 0 : i32
    %c0_i32_1 = arith.constant 0 : i32
    return %c0_i32, %c0_i32_0 : i32, i32
  }
  func.func @transform_7(%arg0: i32, %arg1: i32) -> (i32, i32) {
    %c0_i32 = arith.constant 0 : i32
    %c0_i32_0 = arith.constant 0 : i32
    %c0_i32_1 = arith.constant 0 : i32
    return %c0_i32, %c0_i32_0 : i32, i32
  }
  func.func @transform_8(%arg0: i32, %arg1: i32) -> (i32, i32) {
    %c0_i32 = arith.constant 0 : i32
    %c0_i32_0 = arith.constant 0 : i32
    %c0_i32_1 = arith.constant 0 : i32
    return %c0_i32, %c0_i32_0 : i32, i32
  }
  func.func @transform_9(%arg0: i32, %arg1: i32) -> (i32, i32) {
    %c0_i32 = arith.constant 0 : i32
    %c0_i32_0 = arith.constant 0 : i32
    %c0_i32_1 = arith.constant 0 : i32
    return %c0_i32, %c0_i32_0 : i32, i32
  }
  func.func @transform_10(%arg0: i32, %arg1: i32) -> (i32, i32, i32) {
    %c0_i32 = arith.constant 0 : i32
    %c0_i32_0 = arith.constant 0 : i32
    return %arg0, %arg1, %c0_i32 : i32, i32, i32
  }
  func.func @transform_11(%arg0: i32, %arg1: i32) -> (i32, i32, i32) {
    %c0_i32 = arith.constant 0 : i32
    %c0_i32_0 = arith.constant 0 : i32
    return %arg0, %arg1, %c0_i32 : i32, i32, i32
  }
  func.func @transform_12(%arg0: i32, %arg1: i32) -> (i32, i32, i32) {
    %c0_i32 = arith.constant 0 : i32
    %c0_i32_0 = arith.constant 0 : i32
    return %arg0, %arg1, %c0_i32 : i32, i32, i32
  }
}

</mosaic_0001>

<bundles_post_ra>
// kernel: evoformer_lite_block.6
= control target key start
LH: loop header
LB: loop body
LE: loop exit
PB: predicated region body
PF: predicated region fallthrough
CT: control target
= control target key end

     0   :  { %s529_s15 = smov 0   ;;  %s531_s16 = smov 0   ;;  %s592_s0 = inlined_call_operand.vmem [shape: f32[2,32,32], index: 0, kind: input, shape index: {}]   ;;  %s593_s1 = inlined_call_operand.vmem [shape: f32[2,32,1], index: 1, kind: input, shape index: {}]   ;;  %s594_s2 = inlined_call_operand.vmem [shape: f32[1,32], index: 2, kind: input, shape index: {}]   ;;  %s595_s3 = inlined_call_operand.vmem [shape: f32[1,32], index: 3, kind: input, shape index: {}]   ;;  %s596_s4 = inlined_call_operand.vmem [shape: f32[2,32,32], index: 4, kind: output, shape index: {}]  }
   0x1   :  { %s533_s17 = smov 0   ;;  %s535_s18 = smov 0  }
   0x2   :  { %s537_s19 = smov 0  }
   0x3 LB: > { %s23_s20 = sadd.s32 1, %s493_s17  ;;  %s26_s21 = sadd.s32 1, %s497_s18  ;;  %s501_s19 = sphi %s537_s19, %s14_s19   ;;  %s497_s18 = sphi %s535_s18, %s600_s18   ;;  %s493_s17 = sphi %s533_s17, %s599_s17   ;;  %s489_s16 = sphi %s531_s16, %s598_s16   ;;  %s485_s15 = sphi %s529_s15, %s597_s15  }
   0x4   : > { %p24_p0 = scmp.ge.s32.totalorder %s23_s20, 4  ;;  %p408_p1 = scmp.ge.s32.totalorder %s501_s19, 1 }
   0x5   : > { %p196_p2 = scmp.lt.s32.totalorder %s501_s19, 9 }
   0x6   : > { %s602_s20 = smov (%p24_p0, %s23_s20), 0  ;;  %s604_s21 = smov (!%p24_p0, %s26_s21), %s497_s18 }
   0x7   : > { %p197_p3 = pnand %p408_p1, %p196_p2  ;;  %p28_p4 = scmp.ge.s32.totalorder %s604_s21, 2 }
   0x8   : > { %p236_p5 = scmp.lt.s32.totalorder (!%p197_p3), %s489_s16, 1  ;;  %p238_p6 = scmp.lt.s32.totalorder (!%p197_p3), %s485_s15, 3 }
   0x9   : > { %s606_s21 = smov (%p28_p4, %s604_s21), 0  ;;  %200 = sbr.rel (%p197_p3) target bundleno = 455 (0x1c7), region = 36 }
   0xe   : > { %v503_v0 = vmov 0   ;;  %s608_s16 = smov (!%p236_p5, %s489_s16), 1  ;;  %s610_s15 = smov (!%p238_p6, %s485_s15), 3  ;;  %vm270_vm0 = vcmask 261120   ;;  %v415_v15 = vld [vmem:[%s594_s2] ss:$0 sm:$0xff] }
   0xf   : > { %460 = vset.pattern.permute.xlu0 %v503_v0  ;;  %s409_s22 = sshll.u32 %s608_s16, 2  ;;  %v416_v17 = vld [vmem:[%s595_s3] ss:$0 sm:$0xff] }
  0x10   : > { %s241_s23 = sadd.s32 %s409_s22, %s610_s15 }
  0x11   : > { %s410_s24 = sshll.u32 %s241_s23, 3 }
  0x12   : > { %s251_s27 = scalar_lea.vmem %s593_s1, %s410_s24  ;;  %s243_s30 = scalar_lea.vmem %s592_s0, %s410_s24 }
  0x13   : > { %v261_v1 = vld [vmem:[%s251_s27] sm:$0xff]  ;;  %s259_s11 = scalar_lea.vmem %s596_s4, %s410_s24 }
  0x14   : > { %264 = vperm.xlu0 %460, %v261_v1   ;;  %v260_v2 = vld [vmem:[%s243_s30] sm:$0xff] }
  0x8f   : > { %v265_v3 = vpop.permute.xlu0 %264 }
  0x90   : > { %v267_v4 = vmul.f32 %v265_v3, %v260_v2 }
  0x92   : > { %v271_v5 = vsel %vm270_vm0, %v267_v4, 0.0 }
  0x93   : > { %272 = vadd.xlane.f32.xlu0 %v271_v5 }
 0x11c   : > { %v273_v6 = vpop.xlane.xlu0 %272 }
 0x11d   : > { %v275_v7 = vmul.f32 0.03125, %v273_v6 }
 0x11f   : > { %v276_v8 = vsub.f32 %v267_v4, %v275_v7 }
 0x121   : > { %v277_v9 = vmul.f32 %v276_v8, %v276_v8 }
 0x123   : > { %v278_v10 = vsel %vm270_vm0, %v277_v9, 0.0 }
 0x124   : > { %279 = vadd.xlane.f32.xlu1 %v278_v10 }
 0x1ad   : > { %v280_v11 = vpop.xlane.xlu1 %279 }
 0x1ae   : > { %v281_v12 = vmul.f32 0.03125, %v280_v11 }
 0x1b0   : > { %v282_v13 = vadd.f32 1e-05, %v281_v12 }
 0x1b2   : > { %461 = vrsqrt.f32 %v282_v13 }
 0x1bf   : > { %v462_v14 = vpop.eup %461 }
 0x1c0   : > { %v284_v16 = vmul.f32 %v462_v14, %v276_v8 }
 0x1c2   : > { %v291_v18 = vmul.f32 %v415_v15, %v284_v16 }
 0x1c4   : > { %v298_v19 = vadd.f32 %v416_v17, %v291_v18 }
 0x1c6   : > { %299 = vst.msk [vmem:[%s259_s11] sm:$0xff] %vm270_vm0, %v298_v19 }
 0x1c7 PF: > { %s14_s19 = sadd.s32 1, %s501_s19   ;;  %s597_s15 = smov %s493_s17 }
 0x1c8   : > { %p11_p7 = scmp.ge.s32.totalorder %s14_s19, 10   ;;  %s598_s16 = smov %s497_s18 }
 0x1c9   : > { %s599_s17 = smov %s602_s20  ;;  %s600_s18 = smov %s606_s21 }
 0x1ca   :  { %13 = sbr.rel (!%p11_p7) target bundleno = 3 (0x3), region = 69 }

// kernel: reverse.1
= control target key start
LH: loop header
LB: loop body
LE: loop exit
PB: predicated region body
PF: predicated region fallthrough
CT: control target
= control target key end

     0   :  { %s80_s0 = inlined_call_operand.vmem [shape: f32[2,32,4,3], index: 0, kind: input, shape index: {}]   ;;  %s81_s1 = inlined_call_operand.vmem [shape: f32[2,32,4,3], index: 1, kind: output, shape index: {}]  }
   0x1   :  { %v24_v0 = vld [vmem:[%s80_s0 + $0x8] sm:$0xf]  ;;  %v25_v1 = vld [vmem:[%s80_s0 + $0x14] sm:$0xf]  ;;  %v27_v2 = vld [vmem:[%s80_s0 + $0x4] sm:$0xf] }
   0x2   :  { %4 = vst [vmem:[%s81_s1] sm:$0xf] %v24_v0  ;;  %26 = vst [vmem:[%s81_s1 + $0xc] sm:$0xf] %v25_v1  ;;  %v29_v3 = vld [vmem:[%s80_s0 + $0x10] sm:$0xf] }
   0x3   :  { %28 = vst [vmem:[%s81_s1 + $0x4] sm:$0xf] %v27_v2  ;;  %v17_v4 = vld [vmem:[%s80_s0] sm:$0xf]  ;;  %v32_v5 = vld [vmem:[%s80_s0 + $0xc] sm:$0xf] }
   0x4   :  { %30 = vst [vmem:[%s81_s1 + $0x10] sm:$0xf] %v29_v3  ;;  %31 = vst [vmem:[%s81_s1 + $0x8] sm:$0xf] %v17_v4 }
   0x5   :  { %33 = vst [vmem:[%s81_s1 + $0x14] sm:$0xf] %v32_v5 }

// kernel: evoformer_lite_block.7
= control target key start
LH: loop header
LB: loop body
LE: loop exit
PB: predicated region body
PF: predicated region fallthrough
CT: control target
= control target key end

     0   :  { %s1005_s27 = smov 0   ;;  %s1007_s28 = smov 0   ;;  %s1103_s0 = inlined_call_operand.vmem [shape: bf16[2,24,32], index: 0, kind: input, shape index: {}]   ;;  %s1104_s1 = inlined_call_operand.vmem [shape: bf16[2,24,32], index: 1, kind: input, shape index: {}]   ;;  %s1105_s2 = inlined_call_operand.vmem [shape: bf16[32,64], index: 2, kind: input, shape index: {}]   ;;  %s1106_s3 = inlined_call_operand.vmem [shape: bf16[32,64], index: 3, kind: input, shape index: {}]   ;;  %s1107_s4 = inlined_call_operand.vmem [shape: f32[1,64], index: 4, kind: input, shape index: {}]   ;;  %s1108_s5 = inlined_call_operand.vmem [shape: bf16[64,64], index: 5, kind: input, shape index: {}]   ;;  %s1109_s6 = inlined_call_operand.vmem [shape: f32[1,64], index: 6, kind: input, shape index: {}]   ;;  %s1110_s7 = inlined_call_operand.vmem [shape: f32[2,24,32], index: 7, kind: output, shape index: {0}]   ;;  %s1111_s8 = inlined_call_operand.vmem [shape: f32[2,24,32], index: 8, kind: output, shape index: {1}]  }
   0x1   :  { %s1009_s29 = smov 0   ;;  %s1011_s30 = smov 0  }
   0x2   :  { %s1013_s9 = smov 0  }
   0x3 LB: > { %s28_s10 = sadd.s32 1, %s946_s29  ;;  %s31_s11 = sadd.s32 1, %s950_s30  ;;  %s954_s9 = sphi %s1013_s9, %s19_s9   ;;  %s950_s30 = sphi %s1011_s30, %s1115_s30   ;;  %s946_s29 = sphi %s1009_s29, %s1114_s29   ;;  %s942_s28 = sphi %s1007_s28, %s1113_s28   ;;  %s938_s27 = sphi %s1005_s27, %s1112_s27  }
   0x4   : > { %p29_p0 = scmp.ge.s32.totalorder %s28_s10, 3  ;;  %p797_p1 = scmp.ge.s32.totalorder %s954_s9, 1 }
   0x5   : > { %p301_p2 = scmp.lt.s32.totalorder %s954_s9, 7 }
   0x6   : > { %s1117_s10 = smov (%p29_p0, %s28_s10), 0  ;;  %s1119_s11 = smov (!%p29_p0, %s31_s11), %s950_s30 }
   0x7   : > { %p302_p3 = pnand %p797_p1, %p301_p2  ;;  %p33_p4 = scmp.ge.s32.totalorder %s1119_s11, 2 }
   0x8   : > { %p357_p5 = scmp.lt.s32.totalorder (!%p302_p3), %s942_s28, 1  ;;  %p359_p6 = scmp.lt.s32.totalorder (!%p302_p3), %s938_s27, 2 }
   0x9   : > { %s1121_s11 = smov (%p33_p4, %s1119_s11), 0  ;;  %305 = sbr.rel (%p302_p3) target bundleno = 841 (0x349), region = 48 }
   0xa   : > { %s958_s25 = smov (!%p302_p3), 96   ;;  %s959_s13 = smov (!%p302_p3), 32  }
   0xe   : > { %v902_v0 = vld [vmem:[%s1106_s3 + $0x8] sm:$0xff]   ;;  %v956_v1 = vmov 0.0   ;;  %v903_v2 = vld [vmem:[%s1106_s3] sm:$0xff]   ;;  %vm957_vm0 = vmmov 0   ;;  %s1123_s28 = smov (!%p357_p5, %s942_s28), 1  ;;  %s1125_s27 = smov (!%p359_p6, %s938_s27), 2 }
   0xf   : > { %829 = vmatprep.subr.bf16.mxu1 %v956_v1  ;;  %845 = vmatprep.subr.bf16.mxu0 %v956_v1  ;;  %s857_s16 = smul.u32 3, %s1123_s28  ;;  %vm412_vm1 = vcmask 261120   ;;  %v904_v3 = vld [vmem:[%s1105_s2 + $0x8] sm:$0xff]   ;;  %v905_v5 = vld [vmem:[%s1105_s2] sm:$0xff]   ;;  %v906_v7 = vld [vmem:[%s1108_s5 + $0x18] sm:$0xff]   ;;  %vm568_vm2 = vcmask 523264  }
  0x10   : > { %830 = vmatpush3.bf16.msra.mxu1 %v902_v0  ;;  %833 = vmatprep.mubr.msk.bf16.mxu1 %vm957_vm0, %v956_v1  ;;  %v907_v8 = vld [vmem:[%s1108_s5 + $0x10] sm:$0xff]   ;;  %v908_v9 = vld [vmem:[%s1108_s5 + $0x8] sm:$0xff]   ;;  %v909_v10 = vld [vmem:[%s1108_s5] sm:$0xff]  }
  0x11   : > { %831 = vmatprep.subr.bf16.mxu1 %v956_v1  ;;  %853 = vmatprep.mubr.msk.bf16.mxu0 %vm957_vm0, %v956_v1  ;;  %s1043_s17 = sadd.s32 %s857_s16, %s1125_s27  ;;  %v808_v16 = vld [vmem:[%s1107_s4] ss:$0 sm:$0xff] }
  0x12   : > { %s798_s18 = sshll.u32 %s1043_s17, 2  ;;  %846 = vmatpush3.bf16.msra.mxu0 %v906_v7  ;;  %v809_v32 = vld [vmem:[%s1109_s6] ss:$0 sm:$0xff]  ;;  %s800_s26 = sshll.u32 %s1043_s17, 3 }
  0x13   : > { %s372_s23 = scalar_lea.vmem %s1104_s1, %s798_s18  ;;  %s364_s28 = scalar_lea.vmem %s1103_s0, %s798_s18  ;;  %847 = vmatprep.subr.bf16.mxu0 %v956_v1 }
  0x14   : > { %832 = vmatpush3.bf16.msra.mxu1 %v903_v2  ;;  %v395_v4 = vld [vmem:[%s372_s23] sm:$0xf]  ;;  %s380_s12 = scalar_lea.vmem %s1110_s7, %s800_s26  ;;  %s388_s16 = scalar_lea.vmem %s1111_s8, %s800_s26 }
  0x15   : > { %837 = vmatprep.subr.bf16.mxu1 %v956_v1  ;;  %v390_v6 = vld [vmem:[%s364_s28] sm:$0xf] }
  0x16   : > { %848 = vmatpush3.bf16.msra.mxu0 %v907_v8 }
  0x17   : > { %834 = vmatmul.mubr.msk.bf16.vlgmr.msra.gmra.mxu1 %vm412_vm1, %v395_v4  ;;  %849 = vmatprep.subr.bf16.mxu0 %v956_v1 }
  0x18   : > { %838 = vmatpush3.bf16.msra.mxu1 %v904_v3  ;;  %841 = vmatprep.mubr.msk.bf16.mxu1 %vm957_vm0, %v956_v1 }
  0x19   : > { %839 = vmatprep.subr.bf16.mxu1 %v956_v1 }
  0x1a   : > { %850 = vmatpush3.bf16.msra.mxu0 %v908_v9 }
  0x1b   : > { %851 = vmatprep.subr.bf16.mxu0 %v956_v1 }
  0x1c   : > { %840 = vmatpush3.bf16.msra.mxu1 %v905_v5 }
  0x1e   : > { %852 = vmatpush3.bf16.msra.mxu0 %v909_v10 }
  0x1f   : > { %842 = vmatmul.mubr.msk.bf16.vlgmr.msra.gmra.mxu1 %vm412_vm1, %v390_v6 }
  0xd7   : > { %v450_v11 = vpop.f32.mrf.mxu1 }
  0xd9   : > { %v835_v12 = vpop.f32.mrf.mxu1 }
  0xdb   : > { %v453_v13 = vpop.f32.mrf.mxu1 }
  0xdd   : > { %v836_v14 = vpop.f32.mrf.mxu1 }
  0xdf   : > { %v505_v15 = vpop.f32.mrf.mxu1 }
  0xe0   : > { %v506_v17 = vadd.f32 %v505_v15, %v450_v11 }
  0xe1   : > { %v843_v18 = vpop.f32.mrf.mxu1 }
  0xe2   : > { %v518_v19 = vadd.f32 %v808_v16, %v506_v17 }
  0xe3   : > { %v508_v20 = vpop.f32.mrf.mxu1 }
  0xe4   : > { %v520_v21 = vmul.f32 0.044715, %v518_v19  ;;  %v519_v28 = vmul.f32 0.5, %v518_v19 }
  0xe5   : > { %v844_v22 = vpop.f32.mrf.mxu1 }
  0xe6   : > { %v521_v23 = vmul.f32 %v520_v21, %v518_v19 }
  0xe8   : > { %v522_v24 = vmul.f32 %v521_v23, %v518_v19 }
  0xea   : > { %v523_v25 = vadd.f32 %v522_v24, %v518_v19 }
  0xec   : > { %v524_v26 = vmul.f32 0.7978846, %v523_v25 }
  0xee   : > { %910 = vtanh.f32 %v524_v26 }
  0xfb   : > { %v911_v27 = vpop.eup %910 }
  0xfc   : > { %v526_v29 = vadd.f32 1.0, %v911_v27 }
  0xfe   : > { %v527_v30 = vmul.f32 %v526_v29, %v519_v28 }
 0x100   : > { %v536_v31 = vpack.c.bf16 %v527_v30, %v527_v30 }
 0x102   : > { %854 = vmatmul.mubr.msk.bf16.vlgmr.msra.gmra.mxu0 %vm568_vm2, %v536_v31 }
 0x1c2   : > { %v606_v33 = vpop.f32.mrf.mxu0 }
 0x1c3   : > { %v607_v34 = vadd.f32 %v809_v32, %v606_v33 }
 0x1c4   : > { %v855_v35 = vpop.f32.mrf.mxu0 }
 0x1c5   : > { %v612_v36 = vmul.f32 %v607_v34, %v607_v34 }
 0x1c6   : > { %v609_v37 = vpop.f32.mrf.mxu0 }
 0x1c7   : > { %614 = vrot.lane.b32.xlu0 %v612_v36, %s958_s25 }
 0x1c8   : > { %v856_v38 = vpop.f32.mrf.mxu0 }
 0x239   : > { %v615_v39 = vpop.permute.xlu0 %614 }
 0x23a   : > { %v617_v40 = vadd.f32 %v615_v39, %v612_v36 }
 0x23c   : > { %912 = vrsqrt.f32 %v617_v40  ;;  %vm620_vm3 = vcmp.eq.f32.partialorder %v617_v40, inf  ;;  %v623_v43 = vand.u32 2147483648, %v617_v40  ;;  %vm622_vm4 = vcmp.eq.f32.partialorder %v617_v40, 0.0 }
 0x249   : > { %v913_v41 = vpop.eup %912 }
 0x24a   : > { %v619_v42 = vmul.f32 %v913_v41, %v617_v40 }
 0x24c   : > { %v621_v44 = vsel %vm620_vm3, %v617_v40, %v619_v42 }
 0x24d   : > { %v624_v45 = vsel %vm622_vm4, %v623_v43, %v621_v44 }
 0x24e   : > { %v627_v46 = vadd.f32 1e-09, %v624_v45  ;;  %v815_v47 = vadd.f32 -0.01, %v624_v45 }
 0x250   : > { %914 = vrcp.f32 %v627_v46  ;;  %v626_v48 = vmax.f32 %v815_v47, 0.0 }
 0x25d   : > { %v915_v49 = vpop.eup %914 }
 0x25e   : > { %v629_v50 = vmul.f32 %v915_v49, %v626_v48 }
 0x260   : > { %633 = vrot.lane.b32.xlu0 %v629_v50, %s959_s13  ;;  %v630_v51 = vmul.f32 %v629_v50, %v607_v34 }
 0x262   : > { %631 = vst.msk [vmem:[%s380_s12] sm:$0xff] %vm412_vm1, %v630_v51 }
 0x2d2   : > { %v634_v52 = vpop.permute.xlu0 %633 }
 0x2d3   : > { %v636_v53 = vmul.f32 %v634_v52, %v607_v34 }
 0x2d5   : > { %638 = vrot.lane.b32.xlu1 %v636_v53, %s958_s25 }
 0x347   : > { %v639_v54 = vpop.permute.xlu1 %638 }
 0x348   : > { %641 = vst.msk [vmem:[%s388_s16] sm:$0xff] %vm412_vm1, %v639_v54 }
 0x349 PF: > { %s19_s9 = sadd.s32 1, %s954_s9   ;;  %s1112_s27 = smov %s946_s29 }
 0x34a   : > { %p16_p7 = scmp.ge.s32.totalorder %s19_s9, 8   ;;  %s1113_s28 = smov %s950_s30 }
 0x34b   : > { %s1114_s29 = smov %s1117_s10  ;;  %s1115_s30 = smov %s1121_s11 }
 0x34c   :  { %18 = sbr.rel (!%p16_p7) target bundleno = 3 (0x3), region = 93 }

// kernel: evoformer_lite_block.8
= control target key start
LH: loop header
LB: loop body
LE: loop exit
PB: predicated region body
PF: predicated region fallthrough
CT: control target
= control target key end

     0   :  { %s1043_s13 = smov 0   ;;  %s1045_s14 = smov 0   ;;  %s1160_s0 = inlined_call_operand.vmem [shape: f32[2,32,32], index: 0, kind: input, shape index: {}]   ;;  %s1161_s1 = inlined_call_operand.vmem [shape: f32[2,32,32], index: 1, kind: input, shape index: {}]   ;;  %s1162_s2 = inlined_call_operand.vmem [shape: f32[2,32,1], index: 2, kind: input, shape index: {}]   ;;  %s1163_s3 = inlined_call_operand.vmem [shape: f32[1,32], index: 3, kind: input, shape index: {}]   ;;  %s1164_s4 = inlined_call_operand.vmem [shape: f32[1,32], index: 4, kind: input, shape index: {}]   ;;  %s1165_s5 = inlined_call_operand.vmem [shape: f32[1,32], index: 5, kind: input, shape index: {}]   ;;  %s1166_s6 = inlined_call_operand.vmem [shape: bf16[32,128], index: 6, kind: input, shape index: {}]   ;;  %s1167_s7 = inlined_call_operand.vmem [shape: f32[1,128], index: 7, kind: input, shape index: {}]   ;;  %s1168_s8 = inlined_call_operand.vmem [shape: bf16[128,32], index: 8, kind: input, shape index: {}]   ;;  %s1169_s9 = inlined_call_operand.vmem [shape: f32[1,32], index: 9, kind: input, shape index: {}]   ;;  %s1170_s10 = inlined_call_operand.vmem [shape: f32[2,32,32], index: 10, kind: output, shape index: {}]  }
   0x1   :  { %s1047_s15 = smov 0   ;;  %s1049_s16 = smov 0  }
   0x2   :  { %s1051_s17 = smov 0  }
   0x3 LB: > { %s29_s18 = sadd.s32 1, %s975_s15  ;;  %s32_s19 = sadd.s32 1, %s979_s16  ;;  %s983_s17 = sphi %s1051_s17, %s20_s17   ;;  %s979_s16 = sphi %s1049_s16, %s1174_s16   ;;  %s975_s15 = sphi %s1047_s15, %s1173_s15   ;;  %s971_s14 = sphi %s1045_s14, %s1172_s14   ;;  %s967_s13 = sphi %s1043_s13, %s1171_s13  }
   0x4   : > { %p30_p0 = scmp.ge.s32.totalorder %s29_s18, 4  ;;  %p820_p1 = scmp.ge.s32.totalorder %s983_s17, 1 }
   0x5   : > { %p361_p2 = scmp.lt.s32.totalorder %s983_s17, 9 }
   0x6   : > { %s1176_s18 = smov (%p30_p0, %s29_s18), 0  ;;  %s1178_s19 = smov (!%p30_p0, %s32_s19), %s979_s16 }
   0x7   : > { %p362_p3 = pnand %p820_p1, %p361_p2  ;;  %p34_p4 = scmp.ge.s32.totalorder %s1178_s19, 2 }
   0x8   : > { %p421_p5 = scmp.lt.s32.totalorder (!%p362_p3), %s971_s14, 1  ;;  %p423_p6 = scmp.lt.s32.totalorder (!%p362_p3), %s967_s13, 3 }
   0x9   : > { %s1180_s19 = smov (%p34_p4, %s1178_s19), 0  ;;  %365 = sbr.rel (%p362_p3) target bundleno = 884 (0x374), region = 60 }
   0xe   : > { %v985_v0 = vmov 0   ;;  %s1182_s14 = smov (!%p421_p5, %s971_s14), 1  ;;  %s1184_s13 = smov (!%p423_p6, %s967_s13), 3  ;;  %v829_v3 = vld [vmem:[%s1163_s3] ss:$0 sm:$0xff]  ;;  %vm474_vm0 = vcmask 261120  }
   0xf   : > { %930 = vset.pattern.permute.xlu0 %v985_v0  ;;  %s821_s20 = sshll.u32 %s1182_s14, 2  ;;  %v931_v15 = vld [vmem:[%s1166_s6 + $0x8] sm:$0xff]   ;;  %v986_v16 = vmov 0.0   ;;  %vm987_vm1 = vmmov 0   ;;  %v932_v17 = vld [vmem:[%s1166_s6] sm:$0xff]   ;;  %v933_v28 = vld [vmem:[%s1168_s8 + $0x38] sm:$0xff]  }
  0x10   : > { %s426_s21 = sadd.s32 %s821_s20, %s1184_s13  ;;  %859 = vmatprep.subr.bf16.mxu0 %v986_v16  ;;  %863 = vmatprep.mubr.msk.bf16.mxu0 %vm987_vm1, %v986_v16  ;;  %v830_v22 = vld [vmem:[%s1164_s4] ss:$0 sm:$0xff]  ;;  %v934_v29 = vld [vmem:[%s1168_s8 + $0x30] sm:$0xff]   ;;  %v935_v30 = vld [vmem:[%s1168_s8 + $0x28] sm:$0xff]  }
  0x11   : > { %s1073_s22 = sshll.u32 %s426_s21, 3  ;;  %860 = vmatpush3.bf16.msra.mxu0 %v931_v15  ;;  %867 = vmatprep.subr.bf16.mxu1 %v986_v16  ;;  %v831_v24 = vld [vmem:[%s1165_s5] ss:$0 sm:$0xff]  ;;  %v937_v32 = vld [vmem:[%s1168_s8 + $0x18] sm:$0xff]   ;;  %v938_v33 = vld [vmem:[%s1168_s8 + $0x10] sm:$0xff]  }
  0x12   : > { %s444_s25 = scalar_lea.vmem %s1162_s2, %s1073_s22  ;;  %s436_s28 = scalar_lea.vmem %s1161_s1, %s1073_s22  ;;  %861 = vmatprep.subr.bf16.mxu0 %v986_v16  ;;  %883 = vmatprep.mubr.msk.bf16.mxu1 %vm987_vm1, %v986_v16  ;;  %v936_v31 = vld [vmem:[%s1168_s8 + $0x20] sm:$0xff]   ;;  %v939_v34 = vld [vmem:[%s1168_s8 + $0x8] sm:$0xff]  }
  0x13   : > { %v457_v1 = vld [vmem:[%s444_s25] sm:$0xff]  ;;  %s428_s11 = scalar_lea.vmem %s1160_s0, %s1073_s22  ;;  %868 = vmatpush3.bf16.msra.mxu1 %v933_v28  ;;  %s452_s21 = scalar_lea.vmem %s1170_s10, %s1073_s22 }
  0x14   : > { %460 = vperm.xlu0 %930, %v457_v1   ;;  %v456_v2 = vld [vmem:[%s436_s28] sm:$0xff]  ;;  %869 = vmatprep.subr.bf16.mxu1 %v986_v16 }
  0x15   : > { %v454_v6 = vld [vmem:[%s428_s11] sm:$0xff]  ;;  %862 = vmatpush3.bf16.msra.mxu0 %v932_v17 }
  0x16   : > { %v940_v35 = vld [vmem:[%s1168_s8] sm:$0xff]  }
  0x17   : > { %870 = vmatpush3.bf16.msra.mxu1 %v934_v29  ;;  %v832_v36 = vld [vmem:[%s1167_s7] ss:$0 sm:$0xff] }
  0x18   : > { %871 = vmatprep.subr.bf16.mxu1 %v986_v16  ;;  %v844_v53 = vld [vmem:[%s1169_s9] ss:$0 sm:$0xff] }
  0x1b   : > { %872 = vmatpush3.bf16.msra.mxu1 %v935_v30 }
  0x1c   : > { %873 = vmatprep.subr.bf16.mxu1 %v986_v16 }
  0x1f   : > { %874 = vmatpush3.bf16.msra.mxu1 %v936_v31 }
  0x20   : > { %875 = vmatprep.subr.bf16.mxu1 %v986_v16 }
  0x23   : > { %876 = vmatpush3.bf16.msra.mxu1 %v937_v32 }
  0x24   : > { %877 = vmatprep.subr.bf16.mxu1 %v986_v16 }
  0x27   : > { %878 = vmatpush3.bf16.msra.mxu1 %v938_v33 }
  0x28   : > { %879 = vmatprep.subr.bf16.mxu1 %v986_v16 }
  0x2b   : > { %880 = vmatpush3.bf16.msra.mxu1 %v939_v34 }
  0x2c   : > { %881 = vmatprep.subr.bf16.mxu1 %v986_v16 }
  0x2f   : > { %882 = vmatpush3.bf16.msra.mxu1 %v940_v35 }
  0x8f   : > { %v461_v4 = vpop.permute.xlu0 %460 }
  0x90   : > { %v463_v5 = vmul.f32 %v461_v4, %v456_v2 }
  0x92   : > { %v470_v7 = vmul.f32 %v829_v3, %v463_v5 }
  0x94   : > { %v1090_v8 = vadd.f32 %v470_v7, %v454_v6 }
  0x96   : > { %v475_v9 = vsel %vm474_vm0, %v1090_v8, 0.0 }
  0x97   : > { %476 = vadd.xlane.f32.xlu0 %v475_v9 }
 0x120   : > { %v477_v10 = vpop.xlane.xlu0 %476 }
 0x121   : > { %v479_v11 = vmul.f32 0.03125, %v477_v10 }
 0x123   : > { %v480_v12 = vsub.f32 %v1090_v8, %v479_v11 }
 0x125   : > { %v481_v13 = vmul.f32 %v480_v12, %v480_v12 }
 0x127   : > { %v482_v14 = vsel %vm474_vm0, %v481_v13, 0.0 }
 0x128   : > { %483 = vadd.xlane.f32.xlu1 %v482_v14 }
 0x1b1   : > { %v484_v18 = vpop.xlane.xlu1 %483 }
 0x1b2   : > { %v485_v19 = vmul.f32 0.03125, %v484_v18 }
 0x1b4   : > { %v486_v20 = vadd.f32 1e-05, %v485_v19 }
 0x1b6   : > { %941 = vrsqrt.f32 %v486_v20 }
 0x1c3   : > { %v942_v21 = vpop.eup %941 }
 0x1c4   : > { %v488_v23 = vmul.f32 %v942_v21, %v480_v12 }
 0x1c6   : > { %v495_v25 = vmul.f32 %v830_v22, %v488_v23 }
 0x1c8   : > { %v502_v26 = vadd.f32 %v831_v24, %v495_v25 }
 0x1ca   : > { %v507_v27 = vpack.c.bf16 %v502_v26, %v502_v26 }
 0x1cc   : > { %864 = vmatmul.mubr.msk.bf16.vlgmr.msra.gmra.mxu0 %vm474_vm0, %v507_v27 }
 0x28c   : > { %v564_v37 = vpop.f32.mrf.mxu0 }
 0x28d   : > { %v565_v38 = vadd.f32 %v832_v36, %v564_v37 }
 0x28e   : > { %v865_v39 = vpop.f32.mrf.mxu0 }
 0x28f   : > { %v571_v40 = vmul.f32 0.044715, %v565_v38  ;;  %v570_v48 = vmul.f32 0.5, %v565_v38 }
 0x290   : > { %v567_v41 = vpop.f32.mrf.mxu0 }
 0x291   : > { %v572_v42 = vmul.f32 %v571_v40, %v565_v38 }
 0x292   : > { %v866_v43 = vpop.f32.mrf.mxu0 }
 0x293   : > { %v573_v44 = vmul.f32 %v572_v42, %v565_v38 }
 0x295   : > { %v574_v45 = vadd.f32 %v573_v44, %v565_v38 }
 0x297   : > { %v575_v46 = vmul.f32 0.7978846, %v574_v45 }
 0x299   : > { %943 = vtanh.f32 %v575_v46 }
 0x2a6   : > { %v944_v47 = vpop.eup %943 }
 0x2a7   : > { %v577_v49 = vadd.f32 1.0, %v944_v47 }
 0x2a9   : > { %v578_v50 = vmul.f32 %v577_v49, %v570_v48 }
 0x2ab   : > { %v595_v51 = vpack.c.bf16 %v578_v50, %v578_v50 }
 0x2ad   : > { %884 = vmatmul.mubr.bf16.vlgmr.msra.gmra.mxu1 %v595_v51 }
 0x36d   : > { %v678_v52 = vpop.f32.mrf.mxu1 }
 0x36e   : > { %v684_v54 = vadd.f32 %v678_v52, %v1090_v8 }
 0x36f   : > { %v885_v55 = vpop.f32.mrf.mxu1 }
 0x370   : > { %v692_v56 = vadd.f32 %v844_v53, %v684_v54 }
 0x371   : > { %v681_v57 = vpop.f32.mrf.mxu1 }
 0x372   : > { %693 = vst.msk [vmem:[%s452_s21] sm:$0xff] %vm474_vm0, %v692_v56 }
 0x373   : > { %v886_v58 = vpop.f32.mrf.mxu1 }
 0x374 PF: > { %s20_s17 = sadd.s32 1, %s983_s17   ;;  %s1171_s13 = smov %s975_s15 }
 0x375   : > { %p17_p7 = scmp.ge.s32.totalorder %s20_s17, 10   ;;  %s1172_s14 = smov %s979_s16 }
 0x376   : > { %s1173_s15 = smov %s1176_s18  ;;  %s1174_s16 = smov %s1180_s19 }
 0x377   :  { %19 = sbr.rel (!%p17_p7) target bundleno = 3 (0x3), region = 96 }

// kernel: evoformer_lite_block.9
= control target key start
LH: loop header
LB: loop body
LE: loop exit
PB: predicated region body
PF: predicated region fallthrough
CT: control target
= control target key end

     0   :  { %s561_s12 = smov 0   ;;  %s563_s13 = smov 0   ;;  %s620_s0 = inlined_call_operand.vmem [shape: f32[2,4,8,32], index: 0, kind: input, shape index: {}]   ;;  %s621_s1 = inlined_call_operand.vmem [shape: f32[2,4,1], index: 1, kind: input, shape index: {}]   ;;  %s622_s2 = inlined_call_operand.vmem [shape: f32[2,1,1], index: 2, kind: input, shape index: {}]   ;;  %s623_s3 = inlined_call_operand.vmem [shape: f32[2,8,32], index: 3, kind: output, shape index: {}]  }
   0x1   :  { %s565_s14 = smov 0  }
   0x2 LB: > { %s32_s15 = sadd.s32 1, %s532_s13  ;;  %p475_p0 = scmp.ge.s32.totalorder %s536_s14, 1  ;;  %s536_s14 = sphi %s565_s14, %s13_s14   ;;  %s532_s13 = sphi %s563_s13, %s625_s13   ;;  %s528_s12 = sphi %s561_s12, %s624_s12  }
   0x3   : > { %p34_p1 = scmp.ge.s32.totalorder %s32_s15, 2  ;;  %p192_p2 = scmp.lt.s32.totalorder %s536_s14, 3 }
   0x5   : > { %s627_s15 = smov (%p34_p1, %s32_s15), 0  ;;  %p193_p3 = pnand %p475_p0, %p192_p2 }
   0x6   : > { %p236_p4 = scmp.lt.s32.totalorder (!%p193_p3), %s528_s12, 1 }
   0x7   : > { %196 = sbr.rel (%p193_p3) target bundleno = 173 (0xad), region = 32 }
   0xc   : > { %v289_v0 = vlaneseq  ;;  %v538_v1 = vmov 0   ;;  %v539_v2 = vmov 1966171168   ;;  %s629_s12 = smov (!%p236_p4, %s528_s12), 1  ;;  %vm269_vm0 = vcmask 261120  }
   0xd   : > { %512 = vset.pattern.permute.xlu0 %v538_v1  ;;  %v287_v3 = vunpack.c.l.s4 %v539_v2  ;;  %513 = vset.pattern.permute.xlu1 %v538_v1  ;;  %s478_s16 = sshll.u32 %s629_s12, 2  ;;  %s479_s20 = sshll.u32 %s629_s12, 3  ;;  %v540_v17 = vmov 0.0  }
   0xe   : > { %v290_v4 = vshrl.u32 %v289_v0, 7  ;;  %s254_s19 = scalar_lea.vmem %s621_s1, %s478_s16  ;;  %s589_s23 = scalar_lea.vmem %s623_s3, %s479_s20 }
   0xf   : > { %v288_v5 = vunpack.c.0.s8 %v287_v3  ;;  %v480_v8 = vld.sshfl [vmem:[%s254_s19] sm:$0x33 pattern:$0x75316420]  ;;  %270 = vst.msk [vmem:[%s589_s23] sm:$0xff] %vm269_vm0, %v540_v17  ;;  %s257_s26 = scalar_lea.vmem %s622_s2, %s629_s12  ;;  %s484_s27 = sshll.u32 %s629_s12, 5 }
  0x10   : > { %v304_v7 = vsub.s32 0, %v290_v4  ;;  %v285_v10 = vcombine.high %v480_v8, %v480_v8  ;;  %v481_v19 = vld [vmem:[%s257_s26] ss:$0 sm:$0xff]  ;;  %s246_s30 = scalar_lea.vmem %s620_s0, %s484_s27 }
  0x11   : > { %v291_v6 = vsub.s32 %v288_v5, %v290_v4  ;;  %v271_v21 = vld [vmem:[%s246_s30] sm:$0xff]  ;;  %v273_v23 = vld [vmem:[%s246_s30 + $0x10] sm:$0xff]  ;;  %v272_v24 = vld [vmem:[%s246_s30 + $0x8] sm:$0xff] }
  0x12   : > { %v274_v27 = vld [vmem:[%s246_s30 + $0x18] sm:$0xff] }
  0x13   : > { %v292_v9 = vrot.slane %v480_v8, %v291_v6  ;;  %v299_v13 = vrot.slane %v285_v10, %v291_v6 }
  0x15   : > { %v305_v11 = vrot.slane %v292_v9, %v304_v7  ;;  %v300_v12 = vcombine.high %v292_v9, %v292_v9  ;;  %v309_v15 = vrot.slane %v299_v13, %v304_v7  ;;  %v301_v16 = vcombine.high %v299_v13, %v299_v13 }
  0x16   : > { %v276_v37 = vld [vmem:[%s589_s23] sm:$0xff] }
  0x17   : > { %319 = vperm.xlu0 %512, %v305_v11   ;;  %v313_v14 = vrot.slane %v300_v12, %v304_v7  ;;  %v317_v18 = vrot.slane %v301_v16, %v304_v7 }
  0x19   : > { %327 = vperm.xlu1 %513, %v313_v14  }
  0x1b   : > { %323 = vperm.xlu0 %512, %v309_v15  }
  0x1d   : > { %331 = vperm.xlu1 %513, %v317_v18  }
  0x1f   : > { %359 = vperm.xlu0 %512, %v481_v19  }
  0x92   : > { %v320_v20 = vpop.permute.xlu0 %319 }
  0x93   : > { %v334_v25 = vmul.f32 %v320_v20, %v271_v21 }
  0x94   : > { %v328_v22 = vpop.permute.xlu1 %327 }
  0x95   : > { %v336_v28 = vmul.f32 %v328_v22, %v273_v23  ;;  %v339_v31 = vsel %vm269_vm0, %v334_v25, 0.0 }
  0x96   : > { %v324_v26 = vpop.permute.xlu0 %323 }
  0x97   : > { %v335_v29 = vmul.f32 %v324_v26, %v272_v24  ;;  %v342_v35 = vsel %vm269_vm0, %v336_v28, 0.0 }
  0x98   : > { %v332_v30 = vpop.permute.xlu1 %331 }
  0x99   : > { %v340_v32 = vsel %vm269_vm0, %v335_v29, 0.0  ;;  %v337_v33 = vmul.f32 %v332_v30, %v274_v27 }
  0x9a   : > { %v341_v34 = vadd.f32 %v340_v32, %v339_v31  ;;  %v360_v41 = vpop.permute.xlu0 %359 }
  0x9b   : > { %v344_v38 = vsel %vm269_vm0, %v337_v33, 0.0 }
  0x9c   : > { %v343_v36 = vadd.f32 %v342_v35, %v341_v34 }
  0x9e   : > { %v345_v39 = vadd.f32 %v344_v38, %v343_v36 }
  0xa0   : > { %v346_v40 = vadd.f32 %v345_v39, %v276_v37 }
  0xa2   : > { %347 = vst.msk [vmem:[%s589_s23] sm:$0xff] %vm269_vm0, %v346_v40 }
  0xa9   : > { %v351_v42 = vld [vmem:[%s589_s23] sm:$0xff] }
  0xaa   : > { %v362_v43 = vmul.f32 %v360_v41, %v351_v42 }
  0xac   : > { %363 = vst.msk [vmem:[%s589_s23] sm:$0xff] %vm269_vm0, %v362_v43 }
  0xad PF: > { %s13_s14 = sadd.s32 1, %s536_s14   ;;  %s624_s12 = smov %s532_s13 }
  0xae   : > { %p10_p5 = scmp.ge.s32.totalorder %s13_s14, 4   ;;  %s625_s13 = smov %s627_s15 }
  0xb0   :  { %12 = sbr.rel (!%p10_p5) target bundleno = 2 (0x2), region = 76 }

// kernel: evoformer_lite_block.10
= control target key start
LH: loop header
LB: loop body
LE: loop exit
PB: predicated region body
PF: predicated region fallthrough
CT: control target
= control target key end

     0   :  { %s1085_s21 = smov 0   ;;  %s1087_s22 = smov 0   ;;  %s1175_s0 = inlined_call_operand.vmem [shape: f32[2,8,32], index: 0, kind: input, shape index: {}]   ;;  %s1176_s1 = inlined_call_operand.vmem [shape: f32[2,8,32], index: 1, kind: input, shape index: {}]   ;;  %s1177_s2 = inlined_call_operand.vmem [shape: f32[1,32], index: 2, kind: input, shape index: {}]   ;;  %s1178_s3 = inlined_call_operand.vmem [shape: f32[1,32], index: 3, kind: input, shape index: {}]   ;;  %s1179_s4 = inlined_call_operand.vmem [shape: bf16[32,64], index: 4, kind: input, shape index: {}]   ;;  %s1180_s5 = inlined_call_operand.vmem [shape: f32[1,64], index: 5, kind: input, shape index: {}]   ;;  %s1181_s6 = inlined_call_operand.vmem [shape: f32[1,32], index: 6, kind: input, shape index: {}]   ;;  %s1182_s7 = inlined_call_operand.vmem [shape: f32[1,32], index: 7, kind: input, shape index: {}]   ;;  %s1183_s8 = inlined_call_operand.vmem [shape: bf16[32,96], index: 8, kind: input, shape index: {}]   ;;  %s1184_s9 = inlined_call_operand.vmem [shape: f32[1,96], index: 9, kind: input, shape index: {}]   ;;  %s1185_s10 = inlined_call_operand.vmem [shape: f32[2,8,32], index: 10, kind: output, shape index: {0}]   ;;  %s1186_s11 = inlined_call_operand.vmem [shape: bf16[2,8,32], index: 11, kind: output, shape index: {1}]   ;;  %s1187_s12 = inlined_call_operand.vmem [shape: bf16[2,8,64], index: 12, kind: output, shape index: {2}]  }
   0x1   :  { %s1089_s23 = smov 0  }
   0x2 LB: > { %s35_s24 = sadd.s32 1, %s1010_s22  ;;  %p907_p0 = scmp.ge.s32.totalorder %s1014_s23, 1  ;;  %s1014_s23 = sphi %s1089_s23, %s23_s23   ;;  %s1010_s22 = sphi %s1087_s22, %s1189_s22   ;;  %s1006_s21 = sphi %s1085_s21, %s1188_s21  }
   0x3   : > { %p37_p1 = scmp.ge.s32.totalorder %s35_s24, 2  ;;  %p403_p2 = scmp.lt.s32.totalorder %s1014_s23, 3 }
   0x5   : > { %s1191_s24 = smov (%p37_p1, %s35_s24), 0  ;;  %p404_p3 = pnand %p907_p0, %p403_p2 }
   0x6   : > { %p470_p4 = scmp.lt.s32.totalorder (!%p404_p3), %s1006_s21, 1  ;;  %s1018_s26 = smov (!%p404_p3), 32  }
   0x7   : > { %407 = sbr.rel (%p404_p3) target bundleno = 1378 (0x562), region = 60  ;;  %s1019_s27 = smov (!%p404_p3), 96  }
   0xc   : > { %s1193_s21 = smov (!%p470_p4, %s1006_s21), 1  ;;  %vm509_vm0 = vcmask 261120   ;;  %v980_v7 = vld [vmem:[%s1179_s4 + $0x8] sm:$0xff]   ;;  %v1016_v8 = vmov 0.0   ;;  %vm1017_vm1 = vmmov 0   ;;  %v981_v9 = vld [vmem:[%s1179_s4] sm:$0xff]  }
   0xd   : > { %s1106_s25 = sshll.u32 %s1193_s21, 3  ;;  %936 = vmatprep.subr.bf16.mxu0 %v1016_v8  ;;  %940 = vmatprep.mubr.msk.bf16.mxu0 %vm1017_vm1, %v1016_v8  ;;  %v913_v14 = vld [vmem:[%s1177_s2] ss:$0 sm:$0xff]  ;;  %v982_v41 = vld [vmem:[%s1183_s8 + $0x8] sm:$0xff]   ;;  %s911_s14 = sshll.u32 %s1193_s21, 2  ;;  %vm721_vm2 = vcmask 257024  }
   0xe   : > { %s476_s28 = scalar_lea.vmem %s1175_s0, %s1106_s25  ;;  %937 = vmatpush3.bf16.msra.mxu0 %v980_v7  ;;  %944 = vmatprep.subr.bf16.mxu1 %v1016_v8  ;;  %v914_v16 = vld [vmem:[%s1178_s3] ss:$0 sm:$0xff]  ;;  %s483_s30 = scalar_lea.vmem %s1176_s1, %s1106_s25  ;;  %vm730_vm3 = vcmask 519168  }
   0xf   : > { %v506_v0 = vld [vmem:[%s476_s28] sm:$0xff]  ;;  %938 = vmatprep.subr.bf16.mxu0 %v1016_v8  ;;  %948 = vmatprep.mubr.msk.bf16.mxu1 %vm1017_vm1, %v1016_v8  ;;  %s490_s29 = scalar_lea.vmem %s1185_s10, %s1106_s25  ;;  %s497_s25 = scalar_lea.vmem %s1186_s11, %s911_s14 }
  0x10   : > { %v510_v1 = vsel %vm509_vm0, %v506_v0, 0.0  ;;  %v915_v20 = vld [vmem:[%s1180_s5] ss:$0 sm:$0xff]  ;;  %945 = vmatpush3.bf16.msra.mxu1 %v982_v41  ;;  %s504_s19 = scalar_lea.vmem %s1187_s12, %s911_s14 }
  0x11   : > { %511 = vadd.xlane.f32.xlu0 %v510_v1  ;;  %v611_v32 = vld [vmem:[%s483_s30] sm:$0xff]  ;;  %946 = vmatprep.subr.bf16.mxu1 %v1016_v8 }
  0x12   : > { %939 = vmatpush3.bf16.msra.mxu0 %v981_v9  ;;  %v983_v42 = vld [vmem:[%s1183_s8] sm:$0xff]  }
  0x13   : > { %v920_v47 = vld [vmem:[%s1181_s6] ss:$0 sm:$0xff] }
  0x14   : > { %947 = vmatpush3.bf16.msra.mxu1 %v983_v42  ;;  %v921_v49 = vld [vmem:[%s1182_s7] ss:$0 sm:$0xff] }
  0x15   : > { %v922_v53 = vld [vmem:[%s1184_s9] ss:$0 sm:$0xff] }
  0x9a   : > { %v512_v2 = vpop.xlane.xlu0 %511 }
  0x9b   : > { %v514_v3 = vmul.f32 0.03125, %v512_v2 }
  0x9d   : > { %v515_v4 = vsub.f32 %v506_v0, %v514_v3 }
  0x9f   : > { %v516_v5 = vmul.f32 %v515_v4, %v515_v4 }
  0xa1   : > { %v517_v6 = vsel %vm509_vm0, %v516_v5, 0.0 }
  0xa2   : > { %518 = vadd.xlane.f32.xlu0 %v517_v6 }
 0x12b   : > { %v519_v10 = vpop.xlane.xlu0 %518 }
 0x12c   : > { %v520_v11 = vmul.f32 0.03125, %v519_v10 }
 0x12e   : > { %v521_v12 = vadd.f32 1e-05, %v520_v11 }
 0x130   : > { %984 = vrsqrt.f32 %v521_v12 }
 0x13d   : > { %v985_v13 = vpop.eup %984 }
 0x13e   : > { %v523_v15 = vmul.f32 %v985_v13, %v515_v4 }
 0x140   : > { %v530_v17 = vmul.f32 %v913_v14, %v523_v15 }
 0x142   : > { %v537_v18 = vadd.f32 %v914_v16, %v530_v17 }
 0x144   : > { %v542_v19 = vpack.c.bf16 %v537_v18, %v537_v18 }
 0x146   : > { %941 = vmatmul.mubr.msk.bf16.vlgmr.msra.gmra.mxu0 %vm509_vm0, %v542_v19 }
 0x206   : > { %v599_v21 = vpop.f32.mrf.mxu0 }
 0x207   : > { %v600_v22 = vadd.f32 %v915_v20, %v599_v21 }
 0x208   : > { %v942_v23 = vpop.f32.mrf.mxu0 }
 0x209   : > { %613 = vrot.lane.b32.xlu1 %v600_v22, %s1018_s26  ;;  %v919_v26 = vmul.f32 -1.442695, %v600_v22 }
 0x20a   : > { %v602_v24 = vpop.f32.mrf.mxu0 }
 0x20b   : > { %986 = vpow2.f32 %v919_v26 }
 0x20c   : > { %v943_v25 = vpop.f32.mrf.mxu0 }
 0x218   : > { %v987_v27 = vpop.eup %986 }
 0x219   : > { %v608_v28 = vadd.f32 1.0, %v987_v27 }
 0x21b   : > { %988 = vrcp.f32 %v608_v28 }
 0x228   : > { %v989_v29 = vpop.eup %988 }
 0x27b   : > { %v614_v30 = vpop.permute.xlu1 %613 }
 0x27c   : > { %v616_v31 = vmul.f32 %v989_v29, %v614_v30 }
 0x27e   : > { %618 = vrot.lane.b32.xlu1 %v616_v31, %s1019_s27 }
 0x2f0   : > { %v619_v33 = vpop.permute.xlu1 %618 }
 0x2f1   : > { %v621_v34 = vadd.f32 %v619_v33, %v611_v32 }
 0x2f3   : > { %v624_v35 = vsel %vm509_vm0, %v621_v34, 0.0 }
 0x2f4   : > { %625 = vadd.xlane.f32.xlu0 %v624_v35 }
 0x37d   : > { %v626_v36 = vpop.xlane.xlu0 %625 }
 0x37e   : > { %v627_v37 = vmul.f32 0.03125, %v626_v36 }
 0x380   : > { %v628_v38 = vsub.f32 %v621_v34, %v627_v37 }
 0x382   : > { %v629_v39 = vmul.f32 %v628_v38, %v628_v38 }
 0x384   : > { %v630_v40 = vsel %vm509_vm0, %v629_v39, 0.0 }
 0x385   : > { %631 = vadd.xlane.f32.xlu1 %v630_v40 }
 0x40e   : > { %v632_v43 = vpop.xlane.xlu1 %631 }
 0x40f   : > { %v633_v44 = vmul.f32 0.03125, %v632_v43 }
 0x411   : > { %v634_v45 = vadd.f32 1e-05, %v633_v44 }
 0x413   : > { %990 = vrsqrt.f32 %v634_v45 }
 0x420   : > { %v991_v46 = vpop.eup %990 }
 0x421   : > { %v636_v48 = vmul.f32 %v991_v46, %v628_v38 }
 0x423   : > { %v643_v50 = vmul.f32 %v920_v47, %v636_v48 }
 0x425   : > { %v650_v51 = vadd.f32 %v921_v49, %v643_v50 }
 0x427   : > { %v655_v52 = vpack.c.bf16 %v650_v51, %v650_v51  ;;  %718 = vst.msk [vmem:[%s490_s29] sm:$0xff] %vm509_vm0, %v650_v51 }
 0x429   : > { %949 = vmatmul.mubr.msk.bf16.vlgmr.msra.gmra.mxu1 %vm509_vm0, %v655_v52 }
 0x4e9   : > { %v712_v54 = vpop.f32.mrf.mxu1 }
 0x4ea   : > { %v713_v55 = vadd.f32 %v922_v53, %v712_v54 }
 0x4eb   : > { %v950_v56 = vpop.f32.mrf.mxu1 }
 0x4ec   : > { %v719_v57 = vmul.f32 0.35355338, %v713_v55  ;;  %v929_v58 = vpack.c.bf16 %v713_v55, %v713_v55 }
 0x4ed   : > { %v715_v59 = vpop.f32.mrf.mxu1 }
 0x4ee   : > { %v720_v60 = vpack.c.bf16 %v719_v57, %v719_v57  ;;  %727 = vrot.lane.b32.xlu0 %v929_v58, %s1019_s27 }
 0x4ef   : > { %v951_v61 = vpop.f32.mrf.mxu1 }
 0x4f0   : > { %722 = vst.msk [vmem:[%s497_s25] sm:$0xf] %vm721_vm2, %v720_v60 }
 0x560   : > { %v728_v62 = vpop.permute.xlu0 %727 }
 0x561   : > { %731 = vst.msk [vmem:[%s504_s19] sm:$0xf] %vm730_vm3, %v728_v62 }
 0x562 PF: > { %s23_s23 = sadd.s32 1, %s1014_s23   ;;  %s1188_s21 = smov %s1010_s22 }
 0x563   : > { %p20_p5 = scmp.ge.s32.totalorder %s23_s23, 4   ;;  %s1189_s22 = smov %s1191_s24 }
 0x565   :  { %22 = sbr.rel (!%p20_p5) target bundleno = 2 (0x2), region = 117 }

// kernel: evoformer_lite_block.11
= control target key start
LH: loop header
LB: loop body
LE: loop exit
PB: predicated region body
PF: predicated region fallthrough
CT: control target
= control target key end

     0   :  { %17 = vsyncpa [#allocation3], 0  ;;  %s2719_s0 = inlined_call_operand.vmem [shape: f32[2,8,32], index: 0, kind: input, shape index: {}]   ;;  %s2720_s1 = inlined_call_operand.vmem [shape: bf16[2,8,32], index: 1, kind: input, shape index: {}]   ;;  %s2721_s2 = inlined_call_operand.vmem [shape: bf16[2,8,64], index: 2, kind: input, shape index: {}]   ;;  %s2722_s3 = inlined_call_operand.vmem [shape: f32[2,1,8], index: 3, kind: input, shape index: {}]   ;;  %s2723_s4 = inlined_call_operand.vmem [shape: bf16[32,32], index: 4, kind: input, shape index: {}]   ;;  %s2724_s5 = inlined_call_operand.vmem [shape: f32[1,32], index: 5, kind: input, shape index: {}]   ;;  %s2725_s6 = inlined_call_operand.vmem [shape: f32[1,32], index: 6, kind: input, shape index: {}]   ;;  %s2726_s7 = inlined_call_operand.vmem [shape: f32[1,32], index: 7, kind: input, shape index: {}]   ;;  %s2727_s8 = inlined_call_operand.vmem [shape: bf16[32,128], index: 8, kind: input, shape index: {}]   ;;  %s2728_s9 = inlined_call_operand.vmem [shape: f32[1,128], index: 9, kind: input, shape index: {}]   ;;  %s2729_s10 = inlined_call_operand.vmem [shape: bf16[128,32], index: 10, kind: input, shape index: {}]   ;;  %s2730_s11 = inlined_call_operand.vmem [shape: f32[1,32], index: 11, kind: input, shape index: {}]   ;;  %s2731_s12 = inlined_call_operand.hbm [shape: f32[2,8,32], index: 12, kind: output, shape index: {}]  }
   0x1   :  { %19 = vsyncpa [#allocation3 + $0x1], 0  ;;  %s2354_s21 = smov 0   ;;  %s2356_s22 = smov 0  }
   0x2   :  { %s2358_s23 = smov 0   ;;  %s2360_s24 = smov 0  }
   0x3   :  { %s2362_s25 = smov 0   ;;  %s2364_s26 = smov 0  }
   0x4 LB: > { %2734 = sst [smem:[#allocation5_spill]] %s2270_s25  ;;  %s1936_s27 = sadd.s32 4294967295, %s2274_s26   ;;  %s2274_s26 = sphi %s2364_s26, %s25_s26   ;;  %s2270_s25 = sphi %s2362_s25, %s2741_s25   ;;  %s2266_s24 = sphi %s2360_s24, %s2740_s24   ;;  %s2262_s23 = sphi %s2358_s23, %s2744_s23   ;;  %s2258_s22 = sphi %s2356_s22, %s2743_s22   ;;  %s2254_s21 = sphi %s2354_s21, %s2742_s21  }
   0x5   : > { %s1937_s28 = sadd.s32 4294967294, %s2274_s26   ;;  %s37_s29 = sadd.s32 1, %s2270_s25 }
   0x6   : > { %s322_s30 = sadd.s32 1, %s2262_s23  ;;  %p39_p0 = scmp.ge.s32.totalorder %s37_s29, 2 }
   0x7   : > { %p332_p1 = scmp.ne.s32.totalorder %s2262_s23, %s2258_s22  ;;  %p333_p2 = scmp.eq.s32.totalorder %s1936_s27, 1 }
   0x8   : > { %p338_p3 = scmp.ne.s32.totalorder %s2258_s22, %s2254_s21  ;;  %s2746_s29 = smov (%p39_p0, %s37_s29), 0 }
   0x9   : > { %2735 = sst [smem:[#allocation6_spill]] %s2746_s29  ;;  %p2394_p4 = por %p333_p2, %p332_p1 }
   0xa   : > { %p339_p5 = scmp.eq.s32.totalorder %s1937_s28, 1  ;;  %s317_s14 = ssub.s32 %s2270_s25, %s2746_s29 }
   0xb   : > { %p1940_p6 = scmp.ge.s32.totalorder %s2274_s26, 1  ;;  %p320_p7 = scmp.eq.s32.totalorder %s317_s14, 0 }
   0xc   : > { %p2401_p8 = por %p339_p5, %p338_p3  ;;  %p414_p9 = scmp.lt.s32.totalorder %s2274_s26, 3 }
   0xd   : > { %s2407_s16 = scalar_select %p320_p7, %s2262_s23, %s322_s30  }
   0xe   : > { %p415_p10 = pnand %p1940_p6, %p414_p9 }
   0xf   : > { %2738 = sst [smem:[#allocation7_spill]] %s2407_s16  ;;  %p472_p11 = scmp.lt.s32.totalorder (!%p415_p10), %s2266_s24, 1 }
  0x10   : > { %418 = sbr.rel (%p415_p10) target bundleno = 2019 (0x7e3), region = 68  ;;  %s2276_s30 = smov (!%p415_p10), 104  }
  0x11   : > { %s2277_s25 = smov (!%p415_p10), 120   ;;  %s2278_s16 = smov (!%p415_p10), 112  }
  0x12   : > { %s2285_s14 = smov (!%p415_p10), 16  }
  0x15   : > { %s2411_s17 = scalar_select %p472_p11, %s2266_s24, 1  ;;  %v2279_v2 = vmov 0.0   ;;  %vm2280_vm0 = vmmov 0   ;;  %v2281_v3 = vmov 1983009808   ;;  %v518_v5 = vlaneseq }
  0x16   : > { %2015 = vmatprep.subr.bf16.mxu1 %v2279_v2  ;;  %2039 = vmatprep.subr.bf16.mxu0 %v2279_v2  ;;  %v516_v4 = vunpack.c.l.s4 %v2281_v3  ;;  %v2282_v8 = vmov 1934713408   ;;  %vm952_vm1 = vcmask 64512   ;;  %vm1188_vm2 = vcmask 1043456  }
  0x17   : > { %s1943_s18 = sshll.u32 %s2411_s17, 2  ;;  %2017 = vmatprep.mubr.msk.bf16.mxu1 %vm2280_vm0, %v2279_v2  ;;  %2041 = vmatprep.mubr.msk.bf16.mxu0 %vm2280_vm0, %v2279_v2  ;;  %v2431_v7 = vshrl.u32 %v518_v5, 7  ;;  %v533_v9 = vunpack.c.l.s4 %v2282_v8  ;;  %vm1519_vm3 = vcmask 130048   ;;  %vm1521_vm4 = vcmask 195584  }
  0x18   : > { %s489_s27 = scalar_lea.vmem %s2721_s2, %s1943_s18  ;;  %s485_s29 = scalar_lea.vmem %s2720_s1, %s1943_s18  ;;  %v517_v6 = vunpack.c.0.s8 %v516_v4  ;;  %vm1547_vm5 = vcmask 261120  }
  0x19   : > { %v2420_v0 = vld [vmem:[%s489_s27] sm:$0xf]  ;;  %v534_v17 = vunpack.c.0.s8 %v533_v9  ;;  %s2284_s18 = smov 96  }
  0x1a   : > { %v494_v1 = vld [vmem:[%s485_s29] sm:$0xf]  ;;  %650 = vrot.lane.b32.xlu1 %v2420_v0, %s2276_s30  ;;  %646 = vrot.lane.b32.xlu0 %v2420_v0, %s2277_s25  ;;  %v655_v12 = vshrl.u32 %v2420_v0, 16  ;;  %v2441_v15 = vsub.s32 %v517_v6, %v2431_v7  ;;  %s1942_s29 = sshll.u32 %s2411_s17, 3 }
  0x1b   : > { %v505_v21 = vshrl.u32 %v494_v1, 16  ;;  %v2452_v27 = vsub.s32 %v534_v17, %v2431_v7  ;;  %s478_s19 = scalar_lea.vmem %s2719_s0, %s1942_s29 }
  0x1e   : > { %648 = vrot.lane.b32.xlu0 %v2420_v0, %s2278_s16  ;;  %496 = vrot.lane.b32.xlu1 %v494_v1, %s2277_s25  ;;  %s2287_s25 = smov 24  }
  0x22   : > { %498 = vrot.lane.b32.xlu0 %v494_v1, %s2278_s16  ;;  %500 = vrot.lane.b32.xlu1 %v494_v1, %s2276_s30  ;;  %s492_s16 = scalar_lea.vmem %s2722_s3, %s2411_s17  ;;  %s2286_s30 = smov 8  }
  0x8c   : > { %v2433_v10 = vpop.permute.xlu1 %650  ;;  %v2435_v11 = vpop.permute.xlu0 %646 }
  0x8d   : > { %v656_v13 = vshrl.u32 %v2435_v11, 16  ;;  %v662_v14 = vshrl.u32 %v2433_v10, 16  ;;  %v654_v16 = vpack.i.b16 %v2435_v11, %v2420_v0 }
  0x8f   : > { %v657_v18 = vpack.i.b16 %v656_v13, %v655_v12  ;;  %v671_v26 = vrot.slane %v654_v16, %v2441_v15 }
  0x90   : > { %v2445_v19 = vpop.permute.xlu0 %648  ;;  %v497_v20 = vpop.permute.xlu1 %496 }
  0x91   : > { %v660_v22 = vpack.i.b16 %v2433_v10, %v2445_v19  ;;  %v661_v23 = vshrl.u32 %v2445_v19, 16  ;;  %v504_v24 = vpack.i.b16 %v497_v20, %v494_v1  ;;  %v506_v25 = vshrl.u32 %v497_v20, 16 }
  0x92   : > { %v705_v30 = vrot.slane %v657_v18, %v2441_v15 }
  0x93   : > { %v663_v28 = vpack.i.b16 %v662_v14, %v661_v23  ;;  %v679_v29 = vrot.slane %v660_v22, %v2441_v15  ;;  %v507_v31 = vpack.i.b16 %v506_v25, %v505_v21  ;;  %v521_v38 = vrot.slane %v504_v24, %v2441_v15 }
  0x94   : > { %v499_v32 = vpop.permute.xlu0 %498  ;;  %v501_v33 = vpop.permute.xlu1 %500 }
  0x95   : > { %v680_v34 = vcombine.low %v671_v26, %v679_v29  ;;  %v681_v35 = vcombine.high %v671_v26, %v679_v29  ;;  %v713_v36 = vrot.slane %v663_v28, %v2441_v15  ;;  %v511_v37 = vshrl.u32 %v499_v32, 16 }
  0x96   : > { %v510_v39 = vpack.i.b16 %v501_v33, %v499_v32  ;;  %v512_v40 = vshrl.u32 %v501_v33, 16  ;;  %v555_v45 = vrot.slane %v507_v31, %v2441_v15 }
  0x97   : > { %v688_v41 = vrot.slane %v680_v34, %v2452_v27  ;;  %v695_v42 = vrot.slane %v681_v35, %v2452_v27  ;;  %v714_v43 = vcombine.low %v705_v30, %v713_v36  ;;  %v715_v44 = vcombine.high %v705_v30, %v713_v36 }
  0x98   : > { %v513_v46 = vpack.i.b16 %v512_v40, %v511_v37  ;;  %v529_v47 = vrot.slane %v510_v39, %v2441_v15  ;;  %v2283_v34 = vmov 0  }
  0x99   : > { %v722_v48 = vrot.slane %v714_v43, %v2452_v27  ;;  %v729_v49 = vrot.slane %v715_v44, %v2452_v27  ;;  %v732_v50 = vcombine.low %v688_v41, %v695_v42  ;;  %v1947_v51 = vcombine.high %v688_v41, %v695_v42 }
  0x9a   : > { %v530_v52 = vcombine.low %v521_v38, %v529_v47  ;;  %v531_v53 = vcombine.high %v521_v38, %v529_v47  ;;  %v563_v54 = vrot.slane %v513_v46, %v2441_v15 }
  0x9b   : > { %v739_v55 = vrot.slane %v732_v50, %v2441_v15  ;;  %v747_v56 = vrot.slane %v1947_v51, %v2441_v15  ;;  %v757_v57 = vcombine.low %v722_v48, %v729_v49  ;;  %v1948_v58 = vcombine.high %v722_v48, %v729_v49 }
  0x9c   : > { %v538_v59 = vrot.slane %v530_v52, %v2452_v27  ;;  %v545_v60 = vrot.slane %v531_v53, %v2452_v27  ;;  %v564_v61 = vcombine.low %v555_v45, %v563_v54  ;;  %v565_v62 = vcombine.high %v555_v45, %v563_v54  ;;  %v944_v52 = vld [vmem:[%s492_s16] sm:$0x1] }
  0x9d   : > { %v748_v63 = vcombine.low %v739_v55, %v747_v56  ;;  %v764_v1 = vrot.slane %v757_v57, %v2441_v15  ;;  %v772_v3 = vrot.slane %v1948_v58, %v2441_v15  ;;  %v945_v53 = vmul.f32 -1e+30, %v944_v52 }
  0x9e   : > { %v572_v4 = vrot.slane %v564_v61, %v2452_v27  ;;  %v579_v5 = vrot.slane %v565_v62, %v2452_v27  ;;  %v582_v6 = vcombine.low %v538_v59, %v545_v60  ;;  %v1945_v8 = vcombine.high %v538_v59, %v545_v60 }
  0x9f   : > { %v773_v9 = vcombine.low %v764_v1, %v772_v3  ;;  %v755_v17 = vrot.slane %v748_v63, %v2452_v27  ;;  %v949_v54 = vsub.s32 0, %v2431_v7 }
  0xa0   : > { %v607_v12 = vcombine.low %v572_v4, %v579_v5  ;;  %v1946_v13 = vcombine.high %v572_v4, %v579_v5  ;;  %v589_v14 = vrot.slane %v582_v6, %v2441_v15  ;;  %v597_v16 = vrot.slane %v1945_v8, %v2441_v15 }
  0xa1   : > { %v780_v18 = vrot.slane %v773_v9, %v2452_v27  ;;  %v785_v29 = vshrl.u32 %v755_v17, 16  ;;  %v756_v37 = vcombine.high %v755_v17, %v2283_v34  ;;  %v950_v55 = vrot.slane %v945_v53, %v949_v54 }
  0xa2   : > { %v614_v20 = vrot.slane %v607_v12, %v2441_v15  ;;  %v622_v21 = vrot.slane %v1946_v13, %v2441_v15  ;;  %v598_v24 = vcombine.low %v589_v14, %v597_v16 }
  0xa3   : > { %v784_v22 = vpack.i.b16 %v780_v18, %v755_v17  ;;  %v786_v26 = vshrl.u32 %v780_v18, 16  ;;  %v781_v35 = vcombine.high %v780_v18, %v2283_v34  ;;  %v791_v44 = vshrl.u32 %v756_v37, 16 }
  0xa4   : > { %v623_v23 = vcombine.low %v614_v20, %v622_v21  ;;  %v605_v30 = vrot.slane %v598_v24, %v2452_v27 }
  0xa5   : > { %v957_v25 = vsel %vm952_vm1, %v784_v22, 0  ;;  %v787_v31 = vpack.i.b16 %v786_v26, %v785_v29  ;;  %v790_v39 = vpack.i.b16 %v781_v35, %v756_v37  ;;  %v792_v42 = vshrl.u32 %v781_v35, 16 }
  0xa6   : > { %2016 = vmatpush3.bf16.xpose.msra.mxu1 %v957_v25  ;;  %v630_v28 = vrot.slane %v623_v23, %v2452_v27  ;;  %v635_v38 = vshrl.u32 %v605_v30, 16  ;;  %v606_v45 = vcombine.high %v605_v30, %v2283_v34 }
  0xa7   : > { %2021 = vmatprep.subr.bf16.mxu1 %v2279_v2  ;;  %v1003_v33 = vsel %vm952_vm1, %v787_v31, 0  ;;  %v1049_v41 = vsel %vm952_vm1, %v790_v39, 0  ;;  %v793_v46 = vpack.i.b16 %v792_v42, %v791_v44 }
  0xa8   : > { %v634_v32 = vpack.i.b16 %v630_v28, %v605_v30  ;;  %v636_v36 = vshrl.u32 %v630_v28, 16  ;;  %v631_v43 = vcombine.high %v630_v28, %v2283_v34  ;;  %v641_v50 = vshrl.u32 %v606_v45, 16 }
  0xa9   : > { %v1095_v48 = vsel %vm952_vm1, %v793_v46, 0 }
  0xaa   : > { %v637_v40 = vpack.i.b16 %v636_v36, %v635_v38  ;;  %v640_v47 = vpack.i.b16 %v631_v43, %v606_v45  ;;  %v642_v49 = vshrl.u32 %v631_v43, 16 }
  0xac   : > { %v643_v51 = vpack.i.b16 %v642_v49, %v641_v50 }
  0xad   : > { %2018 = vmatmul.mubr.msk.bf16.vlgmr.msra.gmra.mxu1 %vm952_vm1, %v634_v32 }
  0xae   : > { %2022 = vmatpush3.bf16.xpose.msra.mxu1 %v1003_v33  ;;  %2023 = vmatprep.mubr.msk.bf16.mxu1 %vm2280_vm0, %v2279_v2 }
  0xaf   : > { %2027 = vmatprep.subr.bf16.mxu1 %v2279_v2 }
  0xb5   : > { %2024 = vmatmul.mubr.msk.bf16.vlgmr.msra.gmra.mxu1 %vm952_vm1, %v637_v40 }
  0xb6   : > { %2028 = vmatpush3.bf16.xpose.msra.mxu1 %v1049_v41  ;;  %2029 = vmatprep.mubr.msk.bf16.mxu1 %vm2280_vm0, %v2279_v2 }
  0xb7   : > { %2033 = vmatprep.subr.bf16.mxu1 %v2279_v2 }
  0xbd   : > { %2030 = vmatmul.mubr.msk.bf16.vlgmr.msra.gmra.mxu1 %vm952_vm1, %v640_v47 }
  0xbe   : > { %2034 = vmatpush3.bf16.xpose.msra.mxu1 %v1095_v48  ;;  %2035 = vmatprep.mubr.msk.bf16.mxu1 %vm2280_vm0, %v2279_v2 }
  0xbf   : > { %2045 = vmatprep.subr.bf16.mxu1 %v2279_v2 }
  0xc5   : > { %2036 = vmatmul.mubr.msk.bf16.vlgmr.msra.gmra.mxu1 %vm952_vm1, %v643_v51 }
  0xc6   : > { %2047 = vmatprep.mubr.msk.bf16.mxu1 %vm2280_vm0, %v2279_v2 }
 0x16d   : > { %v993_v56 = vpop.f32.mrf.mxu1 }
 0x16e   : > { %v994_v57 = vadd.f32 %v993_v56, %v950_v55 }
 0x16f   : > { %v2019_v58 = vpop.f32.mrf.mxu1 }
 0x170   : > { %v1137_v59 = vsel %vm952_vm1, %v994_v57, -inf }
 0x171   : > { %1138 = vmax.xlane.f32.xlu0 %v1137_v59  ;;  %v996_v60 = vpop.f32.mrf.mxu1 }
 0x173   : > { %v2020_v61 = vpop.f32.mrf.mxu1 }
 0x175   : > { %v1039_v62 = vpop.f32.mrf.mxu1 }
 0x176   : > { %v1040_v63 = vadd.f32 %v1039_v62, %v950_v55 }
 0x177   : > { %v2025_v1 = vpop.f32.mrf.mxu1 }
 0x178   : > { %v1140_v3 = vsel %vm952_vm1, %v1040_v63, -inf }
 0x179   : > { %1141 = vmax.xlane.f32.xlu1 %v1140_v3  ;;  %v1042_v4 = vpop.f32.mrf.mxu1 }
 0x17b   : > { %v2026_v5 = vpop.f32.mrf.mxu1 }
 0x17d   : > { %v1085_v6 = vpop.f32.mrf.mxu1 }
 0x17e   : > { %v1086_v8 = vadd.f32 %v1085_v6, %v950_v55 }
 0x17f   : > { %v2031_v7 = vpop.f32.mrf.mxu1 }
 0x180   : > { %v1143_v9 = vsel %vm952_vm1, %v1086_v8, -inf }
 0x181   : > { %1144 = vmax.xlane.f32.xlu0 %v1143_v9  ;;  %v1088_v12 = vpop.f32.mrf.mxu1 }
 0x183   : > { %v2032_v13 = vpop.f32.mrf.mxu1 }
 0x185   : > { %v1131_v14 = vpop.f32.mrf.mxu1 }
 0x186   : > { %v1132_v16 = vadd.f32 %v1131_v14, %v950_v55 }
 0x187   : > { %v2037_v17 = vpop.f32.mrf.mxu1 }
 0x188   : > { %v1146_v18 = vsel %vm952_vm1, %v1132_v16, -inf }
 0x189   : > { %1147 = vmax.xlane.f32.xlu0 %v1146_v18  ;;  %v1134_v20 = vpop.f32.mrf.mxu1 }
 0x18a   : > { %794 = vrot.lane.b32.xlu1 %v2420_v0, %s2284_s18 }
 0x18b   : > { %v2038_v21 = vpop.f32.mrf.mxu1 }
 0x1fa   : > { %v1139_v22 = vpop.xlane.xlu0 %1138 }
 0x1fb   : > { %v1149_v23 = vsub.f32 %v994_v57, %v1139_v22 }
 0x1fd   : > { %v1153_v24 = vmul.f32 1.442695, %v1149_v23 }
 0x1ff   : > { %2178 = vpow2.f32 %v1153_v24 }
 0x202   : > { %v1142_v25 = vpop.xlane.xlu1 %1141 }
 0x203   : > { %v1150_v26 = vsub.f32 %v1040_v63, %v1142_v25 }
 0x205   : > { %v1155_v28 = vmul.f32 1.442695, %v1150_v26 }
 0x207   : > { %2180 = vpow2.f32 %v1155_v28 }
 0x20a   : > { %v1145_v32 = vpop.xlane.xlu0 %1144 }
 0x20b   : > { %v1151_v36 = vsub.f32 %v1086_v8, %v1145_v32 }
 0x20c   : > { %v2515_v29 = vpop.eup %2178 }
 0x20d   : > { %v1161_v30 = vsel %vm952_vm1, %v2515_v29, 0.0  ;;  %v1157_v38 = vmul.f32 1.442695, %v1151_v36 }
 0x20e   : > { %1162 = vadd.xlane.f32.xlu1 %v1161_v30 }
 0x212   : > { %v1148_v33 = vpop.xlane.xlu0 %1147 }
 0x213   : > { %v1152_v35 = vsub.f32 %v1132_v16, %v1148_v33 }
 0x214   : > { %v2519_v31 = vpop.eup %2180 }
 0x215   : > { %v1164_v0 = vsel %vm952_vm1, %v2519_v31, 0.0  ;;  %v1159_v37 = vmul.f32 1.442695, %v1152_v35 }
 0x216   : > { %1165 = vadd.xlane.f32.xlu0 %v1164_v0 }
 0x217   : > { %2182 = vpow2.f32 %v1159_v37 }
 0x218   : > { %2184 = vpow2.f32 %v1157_v38 }
 0x21f   : > { %798 = vrot.lane.b32.xlu1 %v2445_v19, %s2284_s18  ;;  %v795_v19 = vpop.permute.xlu1 %794 }
 0x220   : > { %v805_v49 = vshrl.u32 %v795_v19, 16 }
 0x223   : > { %800 = vrot.lane.b32.xlu1 %v2433_v10, %s2284_s18 }
 0x224   : > { %v2526_v39 = vpop.eup %2182 }
 0x225   : > { %v1170_v40 = vsel %vm952_vm1, %v2526_v39, 0.0  ;;  %v2530_v41 = vpop.eup %2184 }
 0x226   : > { %v1167_v10 = vsel %vm952_vm1, %v2530_v41, 0.0 }
 0x22c   : > { %796 = vrot.lane.b32.xlu0 %v2435_v11, %s2284_s18 }
 0x247   : > { %1171 = vadd.xlane.f32.xlu1 %v1170_v40 }
 0x24b   : > { %1168 = vadd.xlane.f32.xlu0 %v1167_v10 }
 0x297   : > { %v1163_v11 = vpop.xlane.xlu1 %1162 }
 0x298   : > { %2186 = vrcp.f32 %v1163_v11 }
 0x29b   : > { %v799_v42 = vpop.permute.xlu1 %798 }
 0x29c   : > { %v811_v46 = vshrl.u32 %v799_v42, 16 }
 0x29f   : > { %v801_v43 = vpop.permute.xlu1 %800  ;;  %v1166_v44 = vpop.xlane.xlu0 %1165 }
 0x2a0   : > { %v812_v45 = vshrl.u32 %v801_v43, 16  ;;  %v810_v47 = vpack.i.b16 %v801_v43, %v799_v42  ;;  %2188 = vrcp.f32 %v1166_v44 }
 0x2a2   : > { %v813_v50 = vpack.i.b16 %v812_v45, %v811_v46  ;;  %v829_v53 = vrot.slane %v810_v47, %v2441_v15 }
 0x2a3   : > { %v797_v48 = vpop.permute.xlu0 %796 }
 0x2a4   : > { %v804_v51 = vpack.i.b16 %v797_v48, %v795_v19  ;;  %v806_v52 = vshrl.u32 %v797_v48, 16  ;;  %v863_v56 = vrot.slane %v813_v50, %v2441_v15 }
 0x2a5   : > { %v2187_v16 = vpop.eup %2186 }
 0x2a6   : > { %v807_v54 = vpack.i.b16 %v806_v52, %v805_v49  ;;  %v821_v55 = vrot.slane %v804_v51, %v2441_v15  ;;  %v1177_v23 = vmul.f32 %v2187_v16, %v2515_v29 }
 0x2a8   : > { %v830_v57 = vcombine.low %v821_v55, %v829_v53  ;;  %v831_v58 = vcombine.high %v821_v55, %v829_v53  ;;  %v855_v59 = vrot.slane %v807_v54, %v2441_v15  ;;  %v1181_v38 = vpack.c.bf16 %v1177_v23, %v1177_v23 }
 0x2aa   : > { %v838_v60 = vrot.slane %v830_v57, %v2452_v27  ;;  %v845_v61 = vrot.slane %v831_v58, %v2452_v27  ;;  %v864_v62 = vcombine.low %v855_v59, %v863_v56  ;;  %v865_v63 = vcombine.high %v855_v59, %v863_v56 }
 0x2ac   : > { %v872_v1 = vrot.slane %v864_v62, %v2452_v27  ;;  %v879_v3 = vrot.slane %v865_v63, %v2452_v27  ;;  %v882_v4 = vcombine.low %v838_v60, %v845_v61  ;;  %v1949_v5 = vcombine.high %v838_v60, %v845_v61 }
 0x2ad   : > { %v2189_v20 = vpop.eup %2188 }
 0x2ae   : > { %v907_v6 = vcombine.low %v872_v1, %v879_v3  ;;  %v1950_v8 = vcombine.high %v872_v1, %v879_v3  ;;  %v889_v7 = vrot.slane %v882_v4, %v2441_v15  ;;  %v897_v9 = vrot.slane %v1949_v5, %v2441_v15 }
 0x2af   : > { %v1178_v30 = vmul.f32 %v2189_v20, %v2519_v31 }
 0x2b0   : > { %v898_v12 = vcombine.low %v889_v7, %v897_v9  ;;  %v914_v13 = vrot.slane %v907_v6, %v2441_v15  ;;  %v922_v14 = vrot.slane %v1950_v8, %v2441_v15 }
 0x2b1   : > { %v1182_v40 = vpack.c.bf16 %v1178_v30, %v1178_v30 }
 0x2b2   : > { %v905_v17 = vrot.slane %v898_v12, %v2452_v27  ;;  %v923_v18 = vcombine.low %v914_v13, %v922_v14  ;;  %v2166_v12 = vld [vmem:[%s2723_s4 + $0x8] sm:$0xff]  }
 0x2b4   : > { %v930_v21 = vrot.slane %v923_v18, %v2452_v27  ;;  %v906_v22 = vcombine.high %v905_v17, %v2283_v34  ;;  %v935_v25 = vshrl.u32 %v905_v17, 16 }
 0x2b6   : > { %v934_v24 = vpack.i.b16 %v930_v21, %v905_v17  ;;  %v936_v26 = vshrl.u32 %v930_v21, 16  ;;  %v931_v28 = vcombine.high %v930_v21, %v2283_v34  ;;  %v941_v0 = vshrl.u32 %v906_v22, 16 }
 0x2b8   : > { %v1190_v32 = vsel %vm1188_vm2, %v934_v24, 0  ;;  %v937_v33 = vpack.i.b16 %v936_v26, %v935_v25  ;;  %v940_v35 = vpack.i.b16 %v931_v28, %v906_v22  ;;  %v942_v36 = vshrl.u32 %v931_v28, 16  ;;  %v2167_v24 = vld [vmem:[%s2723_s4] sm:$0xff]  }
 0x2b9   : > { %2040 = vmatpush3.bf16.msra.mxu0 %v1190_v32 }
 0x2ba   : > { %v1236_v37 = vsel %vm1188_vm2, %v937_v33, 0  ;;  %2051 = vmatprep.subr.bf16.mxu0 %v2279_v2  ;;  %v943_v29 = vpack.i.b16 %v942_v36, %v941_v0  ;;  %v1282_v34 = vsel %vm1188_vm2, %v940_v35, 0 }
 0x2bb   : > { %2046 = vmatpush3.bf16.msra.mxu1 %v1236_v37 }
 0x2bc   : > { %2042 = vmatmul.mubr.msk.bf16.vlgmr.msra.gmra.mxu0 %vm952_vm1, %v1181_v38  ;;  %2057 = vmatprep.subr.bf16.mxu1 %v2279_v2  ;;  %v1328_v31 = vsel %vm1188_vm2, %v943_v29, 0 }
 0x2bd   : > { %2052 = vmatpush3.bf16.msra.mxu0 %v1282_v34  ;;  %2053 = vmatprep.mubr.msk.bf16.mxu0 %vm2280_vm0, %v2279_v2 }
 0x2be   : > { %2048 = vmatmul.mubr.msk.bf16.vlgmr.msra.gmra.mxu1 %vm952_vm1, %v1182_v40  ;;  %2063 = vmatprep.subr.bf16.mxu0 %v2279_v2 }
 0x2bf   : > { %2058 = vmatpush3.bf16.msra.mxu1 %v1328_v31  ;;  %2059 = vmatprep.mubr.msk.bf16.mxu1 %vm2280_vm0, %v2279_v2 }
 0x2c0   : > { %2071 = vmatprep.subr.bf16.mxu1 %v2279_v2 }
 0x2d0   : > { %v1172_v10 = vpop.xlane.xlu1 %1171 }
 0x2d1   : > { %2190 = vrcp.f32 %v1172_v10 }
 0x2d4   : > { %v1169_v19 = vpop.xlane.xlu0 %1168 }
 0x2d5   : > { %2192 = vrcp.f32 %v1169_v19 }
 0x2de   : > { %v2191_v11 = vpop.eup %2190 }
 0x2df   : > { %v1180_v42 = vmul.f32 %v2191_v11, %v2526_v39 }
 0x2e1   : > { %v1184_v43 = vpack.c.bf16 %v1180_v42, %v1180_v42 }
 0x2e2   : > { %v2193_v44 = vpop.eup %2192 }
 0x2e3   : > { %2060 = vmatmul.mubr.msk.bf16.vlgmr.msra.gmra.mxu1 %vm952_vm1, %v1184_v43  ;;  %v1179_v45 = vmul.f32 %v2193_v44, %v2530_v41 }
 0x2e4   : > { %2075 = vmatprep.mubr.msk.bf16.mxu1 %vm2280_vm0, %v2279_v2 }
 0x2e5   : > { %v1183_v46 = vpack.c.bf16 %v1179_v45, %v1179_v45  ;;  %v1961_v45 = vld [vmem:[%s2724_s5] ss:$0 sm:$0xff] }
 0x2e7   : > { %2054 = vmatmul.mubr.msk.bf16.vlgmr.msra.gmra.mxu0 %vm952_vm1, %v1183_v46 }
 0x2e8   : > { %2067 = vmatprep.mubr.msk.bf16.mxu0 %vm2280_vm0, %v2279_v2  ;;  %2064 = vmatpush3.bf16.msra.mxu0 %v2166_v12  ;;  %v2173_v12 = vld [vmem:[%s2729_s10 + $0x20] sm:$0xff]  }
 0x2e9   : > { %2065 = vmatprep.subr.bf16.mxu0 %v2279_v2 }
 0x2ec   : > { %2066 = vmatpush3.bf16.msra.mxu0 %v2167_v24 }
 0x2ed   : > { %2079 = vmatprep.subr.bf16.mxu0 %v2279_v2 }
 0x37c   : > { %v1226_v47 = vpop.f32.mrf.mxu0 }
 0x37e   : > { %v2043_v48 = vpop.f32.mrf.mxu0  ;;  %v1272_v49 = vpop.f32.mrf.mxu1 }
 0x380   : > { %v1229_v50 = vpop.f32.mrf.mxu0  ;;  %v2049_v39 = vpop.f32.mrf.mxu1 }
 0x382   : > { %v2044_v51 = vpop.f32.mrf.mxu0  ;;  %v1275_v52 = vpop.f32.mrf.mxu1 }
 0x384   : > { %v2050_v53 = vpop.f32.mrf.mxu1 }
 0x3a3   : > { %v1364_v54 = vpop.f32.mrf.mxu1 }
 0x3a4   : > { %v1386_v41 = vcombine.low %v1272_v49, %v1364_v54  ;;  %v1387_v56 = vcombine.high %v1272_v49, %v1364_v54 }
 0x3a5   : > { %v2061_v55 = vpop.f32.mrf.mxu1 }
 0x3a6   : > { %v1394_v63 = vrot.slane %v1386_v41, %v2441_v15  ;;  %v1401_v1 = vrot.slane %v1387_v56, %v2441_v15 }
 0x3a7   : > { %v1318_v57 = vpop.f32.mrf.mxu0  ;;  %v1367_v58 = vpop.f32.mrf.mxu1 }
 0x3a8   : > { %v1370_v59 = vcombine.low %v1226_v47, %v1318_v57  ;;  %v1371_v60 = vcombine.high %v1226_v47, %v1318_v57  ;;  %v1591_v47 = vld [vmem:[%s478_s19] sm:$0xff]  ;;  %v2168_v57 = vld [vmem:[%s2727_s8 + $0x8] sm:$0xff]   ;;  %s1981_s19 = sshll.u32 %s2266_s24, 7 }
 0x3a9   : > { %v2055_v61 = vpop.f32.mrf.mxu0  ;;  %v2062_v62 = vpop.f32.mrf.mxu1  ;;  %2072 = vmatpush3.bf16.msra.mxu1 %v2168_v57  ;;  %v2169_v58 = vld [vmem:[%s2727_s8] sm:$0xff]  }
 0x3aa   : > { %v1378_v3 = vrot.slane %v1370_v59, %v2441_v15  ;;  %v1385_v4 = vrot.slane %v1371_v60, %v2441_v15  ;;  %2073 = vmatprep.subr.bf16.mxu1 %v2279_v2 }
 0x3ab   : > { %v1321_v5 = vpop.f32.mrf.mxu0 }
 0x3ac   : > { %v1402_v6 = vcombine.low %v1378_v3, %v1394_v63  ;;  %v1403_v8 = vcombine.high %v1378_v3, %v1394_v63  ;;  %v1418_v7 = vcombine.low %v1385_v4, %v1401_v1  ;;  %v1419_v9 = vcombine.high %v1385_v4, %v1401_v1  ;;  %v1965_v63 = vld [vmem:[%s2725_s6] ss:$0 sm:$0xff] }
 0x3ad   : > { %v2056_v13 = vpop.f32.mrf.mxu0  ;;  %2074 = vmatpush3.bf16.msra.mxu1 %v2169_v58  ;;  %v1966_v3 = vld [vmem:[%s2726_s7] ss:$0 sm:$0xff] }
 0x3ae   : > { %v1410_v14 = vrot.slane %v1402_v6, %v2452_v27  ;;  %v1417_v16 = vrot.slane %v1403_v8, %v2452_v27  ;;  %v1426_v17 = vrot.slane %v1418_v7, %v2452_v27  ;;  %v1433_v18 = vrot.slane %v1419_v9, %v2452_v27  ;;  %v2170_v8 = vld [vmem:[%s2729_s10 + $0x38] sm:$0xff]   ;;  %v2171_v7 = vld [vmem:[%s2729_s10 + $0x30] sm:$0xff]   ;;  %v2172_v9 = vld [vmem:[%s2729_s10 + $0x28] sm:$0xff]  }
 0x3af   : > { %v2174_v13 = vld [vmem:[%s2729_s10 + $0x18] sm:$0xff]  }
 0x3b0   : > { %v1438_v20 = vcombine.low %v1410_v14, %v1417_v16  ;;  %v1959_v21 = vcombine.high %v1410_v14, %v1417_v16  ;;  %v1454_v22 = vcombine.low %v1426_v17, %v1433_v18  ;;  %v1960_v23 = vcombine.high %v1426_v17, %v1433_v18  ;;  %v2175_v14 = vld [vmem:[%s2729_s10 + $0x10] sm:$0xff]   ;;  %v2176_v16 = vld [vmem:[%s2729_s10 + $0x8] sm:$0xff]   ;;  %v2177_v17 = vld [vmem:[%s2729_s10] sm:$0xff]  }
 0x3b1   : > { %v1967_v18 = vld [vmem:[%s2728_s9] ss:$0 sm:$0xff] }
 0x3b2   : > { %v1445_v25 = vrot.slane %v1438_v20, %v2441_v15  ;;  %v1453_v26 = vrot.slane %v1959_v21, %v2441_v15  ;;  %v1461_v28 = vrot.slane %v1454_v22, %v2441_v15  ;;  %v1469_v30 = vrot.slane %v1960_v23, %v2441_v15 }
 0x3b4   : > { %v1471_v0 = vcombine.high %v1445_v25, %v1453_v26  ;;  %v1487_v32 = vcombine.high %v1461_v28, %v1469_v30  ;;  %v1470_v33 = vcombine.low %v1445_v25, %v1453_v26  ;;  %v1486_v35 = vcombine.low %v1461_v28, %v1469_v30 }
 0x3b6   : > { %v1485_v36 = vrot.slane %v1471_v0, %v2452_v27  ;;  %v1501_v37 = vrot.slane %v1487_v32, %v2452_v27  ;;  %v1478_v38 = vrot.slane %v1470_v33, %v2452_v27  ;;  %v1494_v29 = vrot.slane %v1486_v35, %v2452_v27 }
 0x3b8   : > { %v1504_v34 = vcombine.low %v1485_v36, %v1501_v37  ;;  %v1503_v40 = vcombine.high %v1478_v38, %v1494_v29  ;;  %v1502_v31 = vcombine.low %v1478_v38, %v1494_v29  ;;  %v1505_v15 = vcombine.high %v1485_v36, %v1501_v37  ;;  %v1979_v38 = vld [vmem:[%s2730_s11] ss:$0 sm:$0xff] }
 0x3ba   : > { %1511 = vrot.lane.b32.xlu1 %v1504_v34, %s2285_s14  ;;  %1507 = vrot.lane.b32.xlu0 %v1503_v40, %s2286_s30  ;;  %s2672_s14 = scalar_lea.hbm %s2731_s12, %s1981_s19 }
 0x3be   : > { %1515 = vrot.lane.b32.xlu0 %v1505_v15, %s2287_s25  ;;  %s469_s25 = sand.u32 1, %s2258_s22  }
 0x3bf   : > { %s1941_s29 = sshll.u32 %s469_s25, 3  ;;  %s1815_s24 = scalar_lea.sflag [#allocation3], %s469_s25 }
 0x3c0   : > { %s471_s20 = scalar_lea.vmem [#allocation2], %s1941_s29  ;;  %s2288_s29 = smov [#allocation2]  }
 0x3c1   : > { %s1829_s27 = sshll.u32 %s471_s20, 4  ;;  %s2202_s16 = sshll.u32 %s2288_s29, 4  ;;  %s2674_s27 = int_to_ptr.vmem [resolvable:$true] %s1829_s27  ;;  %s2203_s16 = int_to_ptr.vmem [resolvable:$false] %s2202_s16 }
 0x3c2   : > { %s2198_s30 = scalar_lea.vmem %s2674_s27, 128  ;;  %s2204_s18 = scalar_lea.vmem %s2203_s16, 256 }
 0x3c3   : > { %p2199_p12 = scmp.ne.s32.totalorder %s2674_s27, %s2198_s30  ;;  %p2205_p1 = scmp.lt.s32.totalorder %s2674_s27, %s2203_s16 }
 0x3c4   : > { %p2206_p2 = scmp.lt.s32.totalorder %s2204_s18, %s2198_s30 }
 0x3c5   : > { %p2200_p13 = pnand %p2199_p12, %p2394_p4 }
 0x3c6   : > { %p2207_p3 = por %p2206_p2, %p2205_p1 }
 0x3c7   : > { %p2201_p0 = pneg %p2200_p13 }
 0x3c9   : > { %p2208_p5 = pnand %p2207_p3, %p2201_p0 }
 0x42c   : > { %v1508_v10 = vpop.permute.xlu0 %1507  ;;  %v1512_v19 = vpop.permute.xlu1 %1511 }
 0x42d   : > { %v1518_v11 = vsel %vm952_vm1, %v1502_v31, %v1508_v10 }
 0x42e   : > { %v1520_v43 = vsel %vm1519_vm3, %v1518_v11, %v1512_v19 }
 0x430   : > { %v1516_v42 = vpop.permute.xlu0 %1515 }
 0x431   : > { %v1522_v27 = vsel %vm1521_vm4, %v1520_v43, %v1516_v42 }
 0x432   : > { %v1527_v44 = vpack.c.bf16 %v1522_v27, %v1522_v27 }
 0x434   : > { %2068 = vmatmul.mubr.msk.bf16.vlgmr.msra.gmra.mxu0 %vm1547_vm5, %v1527_v44 }
 0x435   : > { %2095 = vmatprep.mubr.msk.bf16.mxu0 %vm2280_vm0, %v2279_v2  ;;  %2080 = vmatpush3.bf16.msra.mxu0 %v2170_v8 }
 0x436   : > { %2081 = vmatprep.subr.bf16.mxu0 %v2279_v2 }
 0x439   : > { %2082 = vmatpush3.bf16.msra.mxu0 %v2171_v7 }
 0x43a   : > { %2083 = vmatprep.subr.bf16.mxu0 %v2279_v2 }
 0x43d   : > { %2084 = vmatpush3.bf16.msra.mxu0 %v2172_v9 }
 0x43e   : > { %2085 = vmatprep.subr.bf16.mxu0 %v2279_v2 }
 0x441   : > { %2086 = vmatpush3.bf16.msra.mxu0 %v2173_v12 }
 0x442   : > { %2087 = vmatprep.subr.bf16.mxu0 %v2279_v2 }
 0x445   : > { %2088 = vmatpush3.bf16.msra.mxu0 %v2174_v13 }
 0x446   : > { %2089 = vmatprep.subr.bf16.mxu0 %v2279_v2 }
 0x449   : > { %2090 = vmatpush3.bf16.msra.mxu0 %v2175_v14 }
 0x44a   : > { %2091 = vmatprep.subr.bf16.mxu0 %v2279_v2 }
 0x44d   : > { %2092 = vmatpush3.bf16.msra.mxu0 %v2176_v16 }
 0x44e   : > { %2093 = vmatprep.subr.bf16.mxu0 %v2279_v2 }
 0x451   : > { %2094 = vmatpush3.bf16.msra.mxu0 %v2177_v17 }
 0x4f4   : > { %v1585_v46 = vpop.f32.mrf.mxu0 }
 0x4f5   : > { %v1586_v48 = vadd.f32 %v1961_v45, %v1585_v46 }
 0x4f6   : > { %v2069_v49 = vpop.f32.mrf.mxu0 }
 0x4f7   : > { %v2609_v50 = vadd.f32 %v1591_v47, %v1586_v48 }
 0x4f8   : > { %v1588_v39 = vpop.f32.mrf.mxu0 }
 0x4f9   : > { %v1595_v51 = vsel %vm1547_vm5, %v2609_v50, 0.0 }
 0x4fa   : > { %v2070_v52 = vpop.f32.mrf.mxu0  ;;  %1596 = vadd.xlane.f32.xlu1 %v1595_v51 }
 0x583   : > { %v1597_v53 = vpop.xlane.xlu1 %1596 }
 0x584   : > { %v1599_v54 = vmul.f32 0.03125, %v1597_v53 }
 0x586   : > { %v1600_v55 = vsub.f32 %v2609_v50, %v1599_v54 }
 0x588   : > { %v1601_v41 = vmul.f32 %v1600_v55, %v1600_v55 }
 0x58a   : > { %v1602_v56 = vsel %vm1547_vm5, %v1601_v41, 0.0 }
 0x58b   : > { %1603 = vadd.xlane.f32.xlu0 %v1602_v56 }
 0x614   : > { %v1604_v59 = vpop.xlane.xlu0 %1603 }
 0x615   : > { %v1605_v60 = vmul.f32 0.03125, %v1604_v59 }
 0x617   : > { %v1606_v61 = vadd.f32 1e-05, %v1605_v60 }
 0x619   : > { %2194 = vrsqrt.f32 %v1606_v61 }
 0x626   : > { %v2195_v62 = vpop.eup %2194 }
 0x627   : > { %v1608_v1 = vmul.f32 %v2195_v62, %v1600_v55 }
 0x629   : > { %v1615_v4 = vmul.f32 %v1965_v63, %v1608_v1 }
 0x62b   : > { %v1622_v5 = vadd.f32 %v1966_v3, %v1615_v4 }
 0x62d   : > { %v1627_v6 = vpack.c.bf16 %v1622_v5, %v1622_v5 }
 0x62f   : > { %2076 = vmatmul.mubr.msk.bf16.vlgmr.msra.gmra.mxu1 %vm1547_vm5, %v1627_v6 }
 0x6ef   : > { %v1684_v20 = vpop.f32.mrf.mxu1 }
 0x6f0   : > { %v1685_v21 = vadd.f32 %v1967_v18, %v1684_v20 }
 0x6f1   : > { %v2077_v22 = vpop.f32.mrf.mxu1 }
 0x6f2   : > { %v1691_v23 = vmul.f32 0.044715, %v1685_v21  ;;  %v1690_v2 = vmul.f32 0.5, %v1685_v21 }
 0x6f3   : > { %v1687_v24 = vpop.f32.mrf.mxu1 }
 0x6f4   : > { %v1692_v25 = vmul.f32 %v1691_v23, %v1685_v21 }
 0x6f5   : > { %v2078_v26 = vpop.f32.mrf.mxu1 }
 0x6f6   : > { %v1693_v28 = vmul.f32 %v1692_v25, %v1685_v21 }
 0x6f8   : > { %v1694_v30 = vadd.f32 %v1693_v28, %v1685_v21 }
 0x6fa   : > { %v1695_v0 = vmul.f32 0.7978846, %v1694_v30 }
 0x6fc   : > { %2196 = vtanh.f32 %v1695_v0 }
 0x709   : > { %v2197_v32 = vpop.eup %2196 }
 0x70a   : > { %v1697_v33 = vadd.f32 1.0, %v2197_v32 }
 0x70c   : > { %v1698_v35 = vmul.f32 %v1697_v33, %v1690_v2 }
 0x70e   : > { %v1715_v36 = vpack.c.bf16 %v1698_v35, %v1698_v35 }
 0x710   : > { %2096 = vmatmul.mubr.bf16.vlgmr.msra.gmra.mxu0 %v1715_v36 }
 0x7d0   : > { %v1798_v37 = vpop.f32.mrf.mxu0 }
 0x7d1   : > { %v1804_v29 = vadd.f32 %v1798_v37, %v2609_v50 }
 0x7d2   : > { %v2097_v34 = vpop.f32.mrf.mxu0 }
 0x7d3   : > { %v1812_v40 = vadd.f32 %v1979_v38, %v1804_v29 }
 0x7d4   : > { %v1801_v31 = vpop.f32.mrf.mxu0 }
 0x7d5   : > { %1813 = vst.msk [vmem:[%s471_s20] sm:$0xff] %vm1547_vm5, %v1812_v40 }
 0x7d6   : > { %v2098_v15 = vpop.f32.mrf.mxu0 }
 0x7d7   : > { %2211 = shalt.err (!%p2208_p5)
}
 0x7d8   : > { %s2212_s19 = scalar_lea.hbm %s2672_s14, 128  ;;  %s2216_s17 = scalar_lea.hbm %s2731_s12, 256 }
 0x7d9   : > { %p2213_p6 = scmp.ne.s32.totalorder %s2672_s14, %s2212_s19  ;;  %p2217_p10 = scmp.lt.s32.totalorder %s2672_s14, %s2731_s12 }
 0x7da   : > { %p2218_p11 = scmp.lt.s32.totalorder %s2216_s17, %s2212_s19 }
 0x7db   : > { %p2214_p7 = pnand %p2213_p6, %p2394_p4 }
 0x7dc   : > { %p2219_p12 = por %p2218_p11, %p2217_p10 }
 0x7dd   : > { %p2215_p9 = pneg %p2214_p7 }
 0x7df   : > { %p2220_p13 = pnand %p2219_p12, %p2215_p9 }
 0x7e1   : > { %2223 = shalt.err (!%p2220_p13)
}
 0x7e2   : > { %2099 = dma.vmem_to_hbm [thread:$0]  (%p2394_p4), %s2674_s27, 128, %s2672_s14, %s1815_s24  }
 0x7e3 PF: > { %p2105_p0 = scmp.ge.s32.totalorder %s2274_s26, 2  ;;  %s1841_s30 = sand.u32 1, %s2254_s21  }
 0x7e4   : > { %s1842_s16 = scalar_lea.sflag [#allocation3], %s1841_s30 }
 0x7e5   : > { %p2102_p1 = pnand %p2105_p0, %p2401_p8 }
 0x7e7   : > { %p2103_p2 = pneg %p2102_p1 }
 0x7e9   : > { %2249 = dma.done.wait (%p2103_p2), %s1842_s16, 128  }
 0x7ea   : > { %2251 = vsyncadd (%p2103_p2), %s1842_s16, 4294967168  ;;  %s25_s26 = sadd.s32 1, %s2274_s26   ;;  %s2739_s13 = sld [smem:[#allocation7_spill]] }
 0x7eb   : > { %p22_p3 = scmp.ge.s32.totalorder %s25_s26, 4   ;;  %s2740_s24 = sld [smem:[#allocation5_spill]] }
 0x7ec   : > { %s2741_s25 = sld [smem:[#allocation6_spill]]  ;;  %s2742_s21 = smov %s2258_s22 }
 0x7ed   : > { %s2743_s22 = smov %s2262_s23  ;;  %24 = sbr.rel (!%p22_p3) target bundleno = 4 (0x4), region = 112 }
 0x7f0   : > { %s2744_s23 = smov %s2739_s13 }
 0x7f2   :  { %1847 = vsyncpa [#allocation3], 1 }
 0x7f3   :  { %1849 = vsyncpa [#allocation3 + $0x1], 1 }

</bundles_post_ra>
